<compile_context>
chip_gen: v7x
topology: tpu7x:2x2x1
jax: 0.10.0
libtpu: 0.0.40
codegen_flags: <defaults>
</compile_context>

<pallas_src>
import functools

import jax
import jax.numpy as jnp
import numpy as np
from jax.experimental import pallas as pl
from jax.experimental.pallas import tpu as pltpu


def _widen(parts):
    """Concatenate slabs along the lane axis (no-op for a single slab)."""
    return parts[0] if len(parts) == 1 else jnp.concatenate(parts, axis=-1)


# --------------------------------------------------------------------------
# Fused Pallas kernel: whole FASAM forward for a tile of NB batch elements
# --------------------------------------------------------------------------
def _fasam_kernel(*refs, NB, L, Lp):
    """refs = [x, (w1,b1,w2,b2,w3,b3,ws,bs) x 3 blocks, out].

    x_ref : (NB, Cin, Lp)  NCL, L on lanes; lanes [L, Lp) of every element zero.
    w refs: (K, Cout, Cin) BN-scale folded.   b refs: (Cout, 1).
    o_ref : (NB, Cmid, Lp)
    """
    x_ref = refs[0]
    o_ref = refs[-1]
    prm = refs[1:-1]
    W = NB * Lp                                                  # fused lane width

    # Per-element lane position, tiled across the NB batch elements
    # (avoids a vector integer modulo).
    pos1 = jax.lax.broadcasted_iota(jnp.int32, (1, Lp), 1)
    pos = _widen([pos1] * NB)
    mask_l = jnp.where(pos < L, 1.0, 0.0)                        # valid lanes
    even = jnp.where(jnp.bitwise_and(pos, 1) == 0, 1.0, 0.0)
    even_l = even * mask_l                                       # even valid lanes
    endp = jnp.where(pos == 0, 1.0, 0.0) + jnp.where(pos == L - 1, 1.0, 0.0)

    # Fold NB batch elements onto the lane axis: (NB, Cin, Lp) -> (Cin, NB*Lp).
    x = _widen([x_ref[b].astype(jnp.float32) for b in range(NB)])

    def conv_bn(v, w_ref, b_ref, *, dil, relu, mask):
        # 1D conv (stride 1, "same" zero pad) with BN folded; taps realized as
        # circular lane rolls — wrapped lanes always land in a zeroed pad tail,
        # so halos never cross batch-element boundaries.
        w = w_ref[...]                                           # (K, Cout, Cin)
        K = w.shape[0]
        p = (K - 1) // 2
        acc = jnp.zeros((w.shape[1], W), jnp.float32)
        for k in range(K):                                       # tiny static tap loop
            shift = ((p - k) * dil) % W                          # rolled[l] = v[l + (k-p)*dil]
            vs = v if shift == 0 else pltpu.roll(v, shift=shift, axis=1)
            acc = acc + jnp.dot(w[k], vs, preferred_element_type=jnp.float32)
        y = acc + b_ref[...]                                     # (Cout,1) lane-broadcast
        if relu:
            y = jnp.maximum(y, 0.0)
        if mask is not None:
            y = y * mask                                         # keep pad lanes at zero
        return y

    def res_block(v, p8, *, dil):
        w1, b1, w2, b2, w3, b3, ws, bs = p8
        h = conv_bn(v, w1, b1, dil=dil, relu=True, mask=mask_l)
        h = conv_bn(h, w2, b2, dil=dil, relu=True, mask=mask_l)
        h = conv_bn(h, w3, b3, dil=dil, relu=False, mask=None)
        s = conv_bn(v, ws, bs, dil=dil, relu=False, mask=None)
        return jnp.maximum(h + s, 0.0)

    raw_p, f1_p, f2_p = prm[0:8], prm[8:16], prm[16:24]

    # ---- raw branch -------------------------------------------------------
    raw = res_block(x, raw_p, dil=1)

    # ---- feature branch ---------------------------------------------------
    # MaxPool1d(2): pooled value j lives (dilated) at even lane 2j.
    x_next = pltpu.roll(x, shift=W - 1, axis=1)                  # x[l+1]
    mp = jnp.maximum(x, x_next) * mask_l

    # Residual block at half resolution: convs run lane-dilated (dil=2) so the
    # pooled samples never need to be compacted along the lane axis.
    f = res_block(mp, f1_p, dil=2)

    # F.interpolate(size=L, mode='linear', align_corners=False) == 2x lerp:
    #   out[2j]   = 0.25 f[j-1] + 0.75 f[j]    (out[0]   = f[0])
    #   out[2j+1] = 0.75 f[j]   + 0.25 f[j+1]  (out[L-1] = f[L/2-1])
    fc = f * even_l                                              # only f[j] @ lane 2j
    a = fc + pltpu.roll(fc, shift=1, axis=1)                     # a[l] = f[l // 2]
    a_prev = pltpu.roll(a, shift=1, axis=1)                      # a[l-1]
    a_next = pltpu.roll(a, shift=W - 1, axis=1)                  # a[l+1]
    g = even * (0.25 * a_prev + 0.75 * a) + (1.0 - even) * (0.75 * a + 0.25 * a_next)
    g = endp * a + (1.0 - endp) * g                              # clamp endpoints
    g = g * mask_l

    f2 = res_block(g, f2_p, dil=1)

    # ---- attention fuse: relu(raw * sigmoid(feature) + raw) ---------------
    out = jnp.maximum(raw * jax.nn.sigmoid(f2) + raw, 0.0)

    # Un-fold the lane axis back into the batch dim (128-aligned lane slices
    # -> plain unmasked stores).
    for b in range(NB):
        o_ref[b] = out[:, b * Lp:(b + 1) * Lp].astype(o_ref.dtype)


# --------------------------------------------------------------------------
# Wrapper
# --------------------------------------------------------------------------
def _zero_index_map(ndim):
    return lambda n: (0,) * ndim


def fasam_forward(x_ncl, params, *, batch_tile=8):
    """x_ncl: (N, C_in, L) float32, PyTorch NCL layout.  Returns (N, C_mid, L)."""
    N, Cin, L = x_ncl.shape
    assert L % 2 == 0, "MaxPool1d(2) + interpolate(size=L) path assumes even L"
    Cmid = params["raw_res"]["conv1"]["w"].shape[1]

    # Batch elements processed per grid step (folded onto the lane axis).
    NB = max(1, min(batch_tile, N))
    Npad = int(pl.cdiv(N, NB)) * NB

    # Pad L once to a lane-dense multiple of 128 with >= 8 lanes of margin so
    # every conv halo / circular roll lands inside an element's zeroed tail.
    Lp = int(np.ceil((L + 8) / 128.0)) * 128
    x_p = jnp.pad(x_ncl.astype(jnp.float32),
                  ((0, Npad - N), (0, 0), (0, Lp - L)))

    flat = []
    for blk in ("raw_res", "feature_res1", "feature_res2"):
        for cv in ("conv1", "conv2", "conv3", "short"):
            flat.append(params[blk][cv]["w"])
            flat.append(params[blk][cv]["b"])

    in_specs = [pl.BlockSpec((NB, Cin, Lp), lambda n: (n, 0, 0))]
    in_specs += [pl.BlockSpec(a.shape, _zero_index_map(a.ndim)) for a in flat]

    kernel = functools.partial(_fasam_kernel, NB=NB, L=L, Lp=Lp)
    out = pl.pallas_call(
        kernel,
        out_shape=jax.ShapeDtypeStruct((Npad, Cmid, Lp), jnp.float32),
        grid=(Npad // NB,),                          # parallel over batch tiles
        in_specs=in_specs,
        out_specs=pl.BlockSpec((NB, Cmid, Lp), lambda n: (n, 0, 0)),
        compiler_params=pltpu.CompilerParams(
            dimension_semantics=("parallel",),
            vmem_limit_bytes=64 * 1024 * 1024,
        ),
    )(x_p, *flat)
    # TODO(synk): for very large L add a second (L-tile + K-1 halo) grid axis so
    # per-step VMEM stays inside v7x's 64 MiB budget.
    return out[:N, :, :L]


# --------------------------------------------------------------------------
# Parameter init (BN folded in inference mode; scale folded into the weights)
# --------------------------------------------------------------------------
def init_conv_bn(key, cin, cout, k):
    kw, kg, kb, km, kv = jax.random.split(key, 5)
    w = jax.random.normal(kw, (cout, cin, k), jnp.float32) / np.sqrt(cin * k)  # torch layout
    gamma = 1.0 + 0.1 * jax.random.normal(kg, (cout,), jnp.float32)
    beta = 0.1 * jax.random.normal(kb, (cout,), jnp.float32)
    mean = 0.1 * jax.random.normal(km, (cout,), jnp.float32)
    var = 1.0 + 0.1 * jnp.abs(jax.random.normal(kv, (cout,), jnp.float32))
    scale = gamma / jnp.sqrt(var + 1e-5)                 # inference-mode BN fold
    bias = beta - mean * scale
    w_folded = jnp.transpose(w * scale[:, None, None], (2, 0, 1))   # (K, Cout, Cin)
    return {"w": w_folded, "b": bias.reshape(cout, 1)}


def init_residual(key, cin, cout):
    k1, k2, k3, ks = jax.random.split(key, 4)
    return {
        "conv1": init_conv_bn(k1, cin, cout, 7),
        "conv2": init_conv_bn(k2, cout, cout, 5),
        "conv3": init_conv_bn(k3, cout, cout, 3),
        "short": init_conv_bn(ks, cin, cout, 1),
    }


def init_fasam(key, in_channel, out_channel, num_heads):
    cmid = out_channel // num_heads
    kr, kf1, kf2 = jax.random.split(key, 3)
    return {
        "raw_res": init_residual(kr, in_channel, cmid),
        "feature_res1": init_residual(kf1, in_channel, cmid),
        "feature_res2": init_residual(kf2, cmid, cmid),
    }


# --------------------------------------------------------------------------
if __name__ == "__main__":
    N, C_in, L = 2, 4, 16
    out_channel, num_heads = 32, 4               # C_mid = 8

    key = jax.random.PRNGKey(0)
    kx, kp = jax.random.split(key)
    x = jax.random.normal(kx, (N, C_in, L), jnp.float32)
    params = init_fasam(kp, C_in, out_channel, num_heads)

    out = jax.jit(fasam_forward)(x, params)
    jax.block_until_ready(out)
    assert out.shape == (N, out_channel // num_heads, L)
    assert bool(jnp.all(jnp.isfinite(out)))
    print("KERNEL_OK")
</pallas_src>

<mosaic_0001>
module attributes {stable_mosaic.version = 11 : i64} {
  func.func @_fasam_kernel(%arg0: i32, %arg1: memref<2x4x128xf32, #tpu.memory_space<vmem>>, %arg2: memref<7x8x4xf32, #tpu.memory_space<vmem>>, %arg3: memref<8x1xf32, #tpu.memory_space<vmem>>, %arg4: memref<5x8x8xf32, #tpu.memory_space<vmem>>, %arg5: memref<8x1xf32, #tpu.memory_space<vmem>>, %arg6: memref<3x8x8xf32, #tpu.memory_space<vmem>>, %arg7: memref<8x1xf32, #tpu.memory_space<vmem>>, %arg8: memref<1x8x4xf32, #tpu.memory_space<vmem>>, %arg9: memref<8x1xf32, #tpu.memory_space<vmem>>, %arg10: memref<7x8x4xf32, #tpu.memory_space<vmem>>, %arg11: memref<8x1xf32, #tpu.memory_space<vmem>>, %arg12: memref<5x8x8xf32, #tpu.memory_space<vmem>>, %arg13: memref<8x1xf32, #tpu.memory_space<vmem>>, %arg14: memref<3x8x8xf32, #tpu.memory_space<vmem>>, %arg15: memref<8x1xf32, #tpu.memory_space<vmem>>, %arg16: memref<1x8x4xf32, #tpu.memory_space<vmem>>, %arg17: memref<8x1xf32, #tpu.memory_space<vmem>>, %arg18: memref<7x8x8xf32, #tpu.memory_space<vmem>>, %arg19: memref<8x1xf32, #tpu.memory_space<vmem>>, %arg20: memref<5x8x8xf32, #tpu.memory_space<vmem>>, %arg21: memref<8x1xf32, #tpu.memory_space<vmem>>, %arg22: memref<3x8x8xf32, #tpu.memory_space<vmem>>, %arg23: memref<8x1xf32, #tpu.memory_space<vmem>>, %arg24: memref<1x8x8xf32, #tpu.memory_space<vmem>>, %arg25: memref<8x1xf32, #tpu.memory_space<vmem>>, %arg26: memref<2x8x128xf32, #tpu.memory_space<vmem>>) attributes {dimension_semantics = [#tpu.dimension_semantics<parallel>], iteration_bounds = array<i64: 1>, scalar_prefetch = 0 : i64, scratch_operands = 0 : i64, tpu.core_type = #tpu.core_type<tc>, window_params = [{transform_indices = @transform_0, window_bounds = array<i64: 2, 4, 128>}, {pipeline_mode = #tpu.pipeline_mode<synchronous>, transform_indices = @transform_1, window_bounds = array<i64: 7, 8, 4>}, {pipeline_mode = #tpu.pipeline_mode<synchronous>, transform_indices = @transform_2, window_bounds = array<i64: 8, 1>}, {pipeline_mode = #tpu.pipeline_mode<synchronous>, transform_indices = @transform_3, window_bounds = array<i64: 5, 8, 8>}, {pipeline_mode = #tpu.pipeline_mode<synchronous>, transform_indices = @transform_4, window_bounds = array<i64: 8, 1>}, {pipeline_mode = #tpu.pipeline_mode<synchronous>, transform_indices = @transform_5, window_bounds = array<i64: 3, 8, 8>}, {pipeline_mode = #tpu.pipeline_mode<synchronous>, transform_indices = @transform_6, window_bounds = array<i64: 8, 1>}, {pipeline_mode = #tpu.pipeline_mode<synchronous>, transform_indices = @transform_7, window_bounds = array<i64: 1, 8, 4>}, {pipeline_mode = #tpu.pipeline_mode<synchronous>, transform_indices = @transform_8, window_bounds = array<i64: 8, 1>}, {pipeline_mode = #tpu.pipeline_mode<synchronous>, transform_indices = @transform_9, window_bounds = array<i64: 7, 8, 4>}, {pipeline_mode = #tpu.pipeline_mode<synchronous>, transform_indices = @transform_10, window_bounds = array<i64: 8, 1>}, {pipeline_mode = #tpu.pipeline_mode<synchronous>, transform_indices = @transform_11, window_bounds = array<i64: 5, 8, 8>}, {pipeline_mode = #tpu.pipeline_mode<synchronous>, transform_indices = @transform_12, window_bounds = array<i64: 8, 1>}, {pipeline_mode = #tpu.pipeline_mode<synchronous>, transform_indices = @transform_13, window_bounds = array<i64: 3, 8, 8>}, {pipeline_mode = #tpu.pipeline_mode<synchronous>, transform_indices = @transform_14, window_bounds = array<i64: 8, 1>}, {pipeline_mode = #tpu.pipeline_mode<synchronous>, transform_indices = @transform_15, window_bounds = array<i64: 1, 8, 4>}, {pipeline_mode = #tpu.pipeline_mode<synchronous>, transform_indices = @transform_16, window_bounds = array<i64: 8, 1>}, {pipeline_mode = #tpu.pipeline_mode<synchronous>, transform_indices = @transform_17, window_bounds = array<i64: 7, 8, 8>}, {pipeline_mode = #tpu.pipeline_mode<synchronous>, transform_indices = @transform_18, window_bounds = array<i64: 8, 1>}, {pipeline_mode = #tpu.pipeline_mode<synchronous>, transform_indices = @transform_19, window_bounds = array<i64: 5, 8, 8>}, {pipeline_mode = #tpu.pipeline_mode<synchronous>, transform_indices = @transform_20, window_bounds = array<i64: 8, 1>}, {pipeline_mode = #tpu.pipeline_mode<synchronous>, transform_indices = @transform_21, window_bounds = array<i64: 3, 8, 8>}, {pipeline_mode = #tpu.pipeline_mode<synchronous>, transform_indices = @transform_22, window_bounds = array<i64: 8, 1>}, {pipeline_mode = #tpu.pipeline_mode<synchronous>, transform_indices = @transform_23, window_bounds = array<i64: 1, 8, 8>}, {pipeline_mode = #tpu.pipeline_mode<synchronous>, transform_indices = @transform_24, window_bounds = array<i64: 8, 1>}, {transform_indices = @transform_25, window_bounds = array<i64: 2, 8, 128>}]} {
    %0 = tpu.iota {dimensions = array<i32: 1>} : vector<1x128xi32>
    %1 = tpu.concatenate %0, %0 in 1 : vector<1x128xi32>, vector<1x128xi32> -> vector<1x256xi32>
    %c16_i32 = arith.constant 16 : i32
    %2 = vector.broadcast %c16_i32 : i32 to vector<1x256xi32>
    %3 = arith.cmpi slt, %1, %2 : vector<1x256xi32>
    %cst = arith.constant 1.000000e+00 : f32
    %cst_0 = arith.constant 0.000000e+00 : f32
    %4 = vector.broadcast %cst : f32 to vector<1x256xf32>
    %5 = vector.broadcast %cst_0 : f32 to vector<1x256xf32>
    %6 = arith.select %3, %4, %5 : vector<1x256xi1>, vector<1x256xf32>
    %c1_i32 = arith.constant 1 : i32
    %7 = vector.broadcast %c1_i32 : i32 to vector<1x256xi32>
    %8 = arith.andi %1, %7 : vector<1x256xi32>
    %c0_i32 = arith.constant 0 : i32
    %9 = vector.broadcast %c0_i32 : i32 to vector<1x256xi32>
    %10 = arith.cmpi eq, %8, %9 : vector<1x256xi32>
    %cst_1 = arith.constant 1.000000e+00 : f32
    %cst_2 = arith.constant 0.000000e+00 : f32
    %11 = vector.broadcast %cst_1 : f32 to vector<1x256xf32>
    %12 = vector.broadcast %cst_2 : f32 to vector<1x256xf32>
    %13 = arith.select %10, %11, %12 : vector<1x256xi1>, vector<1x256xf32>
    %14 = arith.mulf %13, %6 : vector<1x256xf32>
    %c0_i32_3 = arith.constant 0 : i32
    %15 = vector.broadcast %c0_i32_3 : i32 to vector<1x256xi32>
    %16 = arith.cmpi eq, %1, %15 : vector<1x256xi32>
    %cst_4 = arith.constant 1.000000e+00 : f32
    %cst_5 = arith.constant 0.000000e+00 : f32
    %17 = vector.broadcast %cst_4 : f32 to vector<1x256xf32>
    %18 = vector.broadcast %cst_5 : f32 to vector<1x256xf32>
    %19 = arith.select %16, %17, %18 : vector<1x256xi1>, vector<1x256xf32>
    %c15_i32 = arith.constant 15 : i32
    %20 = vector.broadcast %c15_i32 : i32 to vector<1x256xi32>
    %21 = arith.cmpi eq, %1, %20 : vector<1x256xi32>
    %cst_6 = arith.constant 1.000000e+00 : f32
    %cst_7 = arith.constant 0.000000e+00 : f32
    %22 = vector.broadcast %cst_6 : f32 to vector<1x256xf32>
    %23 = vector.broadcast %cst_7 : f32 to vector<1x256xf32>
    %24 = arith.select %21, %22, %23 : vector<1x256xi1>, vector<1x256xf32>
    %25 = arith.addf %19, %24 : vector<1x256xf32>
    %c0 = arith.constant 0 : index
    %c0_8 = arith.constant 0 : index
    %c0_9 = arith.constant 0 : index
    %26 = vector.load %arg1[%c0, %c0_8, %c0_9] : memref<2x4x128xf32, #tpu.memory_space<vmem>>, vector<1x4x128xf32>
    %27 = vector.shape_cast %26 : vector<1x4x128xf32> to vector<4x128xf32>
    %c1 = arith.constant 1 : index
    %c0_10 = arith.constant 0 : index
    %c0_11 = arith.constant 0 : index
    %28 = vector.load %arg1[%c1, %c0_10, %c0_11] : memref<2x4x128xf32, #tpu.memory_space<vmem>>, vector<1x4x128xf32>
    %29 = vector.shape_cast %28 : vector<1x4x128xf32> to vector<4x128xf32>
    %30 = tpu.concatenate %27, %29 in 1 : vector<4x128xf32>, vector<4x128xf32> -> vector<4x256xf32>
    %c0_12 = arith.constant 0 : index
    %c0_13 = arith.constant 0 : index
    %c0_14 = arith.constant 0 : index
    %31 = vector.load %arg2[%c0_12, %c0_13, %c0_14] : memref<7x8x4xf32, #tpu.memory_space<vmem>>, vector<7x8x4xf32>
    %cst_15 = arith.constant 0.000000e+00 : f32
    %32 = vector.broadcast %cst_15 : f32 to vector<8x256xf32>
    %c3_i32 = arith.constant 3 : i32
    %33 = tpu.dynamic_rotate %30 by %c3_i32 dim 1 : vector<4x256xf32>, i32 -> vector<4x256xf32>
    %34 = vector.extract_strided_slice %31 {offsets = [0, 0, 0], sizes = [1, 8, 4], strides = [1, 1, 1]} : vector<7x8x4xf32> to vector<1x8x4xf32>
    %35 = vector.shape_cast %34 : vector<1x8x4xf32> to vector<8x4xf32>
    %cst_16 = arith.constant dense<0.000000e+00> : vector<8x256xf32>
    %36 = tpu.matmul %35, %33, %cst_16 {dimension_numbers = #tpu.dot_dimension_numbers<[1], [0], [0], [1], [0, 0, 1, 1], [], []>} : vector<8x4xf32>, vector<4x256xf32>, vector<8x256xf32> -> vector<8x256xf32>
    %37 = arith.addf %32, %36 : vector<8x256xf32>
    %c2_i32 = arith.constant 2 : i32
    %38 = tpu.dynamic_rotate %30 by %c2_i32 dim 1 : vector<4x256xf32>, i32 -> vector<4x256xf32>
    %39 = vector.extract_strided_slice %31 {offsets = [1, 0, 0], sizes = [1, 8, 4], strides = [1, 1, 1]} : vector<7x8x4xf32> to vector<1x8x4xf32>
    %40 = vector.shape_cast %39 : vector<1x8x4xf32> to vector<8x4xf32>
    %cst_17 = arith.constant dense<0.000000e+00> : vector<8x256xf32>
    %41 = tpu.matmul %40, %38, %cst_17 {dimension_numbers = #tpu.dot_dimension_numbers<[1], [0], [0], [1], [0, 0, 1, 1], [], []>} : vector<8x4xf32>, vector<4x256xf32>, vector<8x256xf32> -> vector<8x256xf32>
    %42 = arith.addf %37, %41 : vector<8x256xf32>
    %c1_i32_18 = arith.constant 1 : i32
    %43 = tpu.dynamic_rotate %30 by %c1_i32_18 dim 1 : vector<4x256xf32>, i32 -> vector<4x256xf32>
    %44 = vector.extract_strided_slice %31 {offsets = [2, 0, 0], sizes = [1, 8, 4], strides = [1, 1, 1]} : vector<7x8x4xf32> to vector<1x8x4xf32>
    %45 = vector.shape_cast %44 : vector<1x8x4xf32> to vector<8x4xf32>
    %cst_19 = arith.constant dense<0.000000e+00> : vector<8x256xf32>
    %46 = tpu.matmul %45, %43, %cst_19 {dimension_numbers = #tpu.dot_dimension_numbers<[1], [0], [0], [1], [0, 0, 1, 1], [], []>} : vector<8x4xf32>, vector<4x256xf32>, vector<8x256xf32> -> vector<8x256xf32>
    %47 = arith.addf %42, %46 : vector<8x256xf32>
    %48 = vector.extract_strided_slice %31 {offsets = [3, 0, 0], sizes = [1, 8, 4], strides = [1, 1, 1]} : vector<7x8x4xf32> to vector<1x8x4xf32>
    %49 = vector.shape_cast %48 : vector<1x8x4xf32> to vector<8x4xf32>
    %cst_20 = arith.constant dense<0.000000e+00> : vector<8x256xf32>
    %50 = tpu.matmul %49, %30, %cst_20 {dimension_numbers = #tpu.dot_dimension_numbers<[1], [0], [0], [1], [0, 0, 1, 1], [], []>} : vector<8x4xf32>, vector<4x256xf32>, vector<8x256xf32> -> vector<8x256xf32>
    %51 = arith.addf %47, %50 : vector<8x256xf32>
    %c255_i32 = arith.constant 255 : i32
    %52 = tpu.dynamic_rotate %30 by %c255_i32 dim 1 : vector<4x256xf32>, i32 -> vector<4x256xf32>
    %53 = vector.extract_strided_slice %31 {offsets = [4, 0, 0], sizes = [1, 8, 4], strides = [1, 1, 1]} : vector<7x8x4xf32> to vector<1x8x4xf32>
    %54 = vector.shape_cast %53 : vector<1x8x4xf32> to vector<8x4xf32>
    %cst_21 = arith.constant dense<0.000000e+00> : vector<8x256xf32>
    %55 = tpu.matmul %54, %52, %cst_21 {dimension_numbers = #tpu.dot_dimension_numbers<[1], [0], [0], [1], [0, 0, 1, 1], [], []>} : vector<8x4xf32>, vector<4x256xf32>, vector<8x256xf32> -> vector<8x256xf32>
    %56 = arith.addf %51, %55 : vector<8x256xf32>
    %c254_i32 = arith.constant 254 : i32
    %57 = tpu.dynamic_rotate %30 by %c254_i32 dim 1 : vector<4x256xf32>, i32 -> vector<4x256xf32>
    %58 = vector.extract_strided_slice %31 {offsets = [5, 0, 0], sizes = [1, 8, 4], strides = [1, 1, 1]} : vector<7x8x4xf32> to vector<1x8x4xf32>
    %59 = vector.shape_cast %58 : vector<1x8x4xf32> to vector<8x4xf32>
    %cst_22 = arith.constant dense<0.000000e+00> : vector<8x256xf32>
    %60 = tpu.matmul %59, %57, %cst_22 {dimension_numbers = #tpu.dot_dimension_numbers<[1], [0], [0], [1], [0, 0, 1, 1], [], []>} : vector<8x4xf32>, vector<4x256xf32>, vector<8x256xf32> -> vector<8x256xf32>
    %61 = arith.addf %56, %60 : vector<8x256xf32>
    %c253_i32 = arith.constant 253 : i32
    %62 = tpu.dynamic_rotate %30 by %c253_i32 dim 1 : vector<4x256xf32>, i32 -> vector<4x256xf32>
    %63 = vector.extract_strided_slice %31 {offsets = [6, 0, 0], sizes = [1, 8, 4], strides = [1, 1, 1]} : vector<7x8x4xf32> to vector<1x8x4xf32>
    %64 = vector.shape_cast %63 : vector<1x8x4xf32> to vector<8x4xf32>
    %cst_23 = arith.constant dense<0.000000e+00> : vector<8x256xf32>
    %65 = tpu.matmul %64, %62, %cst_23 {dimension_numbers = #tpu.dot_dimension_numbers<[1], [0], [0], [1], [0, 0, 1, 1], [], []>} : vector<8x4xf32>, vector<4x256xf32>, vector<8x256xf32> -> vector<8x256xf32>
    %66 = arith.addf %61, %65 : vector<8x256xf32>
    %c0_24 = arith.constant 0 : index
    %c0_25 = arith.constant 0 : index
    %67 = vector.load %arg3[%c0_24, %c0_25] : memref<8x1xf32, #tpu.memory_space<vmem>>, vector<8x1xf32>
    %68 = vector.broadcast %67 : vector<8x1xf32> to vector<8x256xf32>
    %69 = arith.addf %66, %68 : vector<8x256xf32>
    %cst_26 = arith.constant 0.000000e+00 : f32
    %70 = vector.broadcast %cst_26 : f32 to vector<8x256xf32>
    %71 = arith.maximumf %69, %70 : vector<8x256xf32>
    %72 = vector.broadcast %6 : vector<1x256xf32> to vector<8x256xf32>
    %73 = arith.mulf %71, %72 : vector<8x256xf32>
    %c0_27 = arith.constant 0 : index
    %c0_28 = arith.constant 0 : index
    %c0_29 = arith.constant 0 : index
    %74 = vector.load %arg4[%c0_27, %c0_28, %c0_29] : memref<5x8x8xf32, #tpu.memory_space<vmem>>, vector<5x8x8xf32>
    %cst_30 = arith.constant 0.000000e+00 : f32
    %75 = vector.broadcast %cst_30 : f32 to vector<8x256xf32>
    %c2_i32_31 = arith.constant 2 : i32
    %76 = tpu.dynamic_rotate %73 by %c2_i32_31 dim 1 : vector<8x256xf32>, i32 -> vector<8x256xf32>
    %77 = vector.extract_strided_slice %74 {offsets = [0, 0, 0], sizes = [1, 8, 8], strides = [1, 1, 1]} : vector<5x8x8xf32> to vector<1x8x8xf32>
    %78 = vector.shape_cast %77 : vector<1x8x8xf32> to vector<8x8xf32>
    %cst_32 = arith.constant dense<0.000000e+00> : vector<8x256xf32>
    %79 = tpu.matmul %78, %76, %cst_32 {dimension_numbers = #tpu.dot_dimension_numbers<[1], [0], [0], [1], [0, 0, 1, 1], [], []>} : vector<8x8xf32>, vector<8x256xf32>, vector<8x256xf32> -> vector<8x256xf32>
    %80 = arith.addf %75, %79 : vector<8x256xf32>
    %c1_i32_33 = arith.constant 1 : i32
    %81 = tpu.dynamic_rotate %73 by %c1_i32_33 dim 1 : vector<8x256xf32>, i32 -> vector<8x256xf32>
    %82 = vector.extract_strided_slice %74 {offsets = [1, 0, 0], sizes = [1, 8, 8], strides = [1, 1, 1]} : vector<5x8x8xf32> to vector<1x8x8xf32>
    %83 = vector.shape_cast %82 : vector<1x8x8xf32> to vector<8x8xf32>
    %cst_34 = arith.constant dense<0.000000e+00> : vector<8x256xf32>
    %84 = tpu.matmul %83, %81, %cst_34 {dimension_numbers = #tpu.dot_dimension_numbers<[1], [0], [0], [1], [0, 0, 1, 1], [], []>} : vector<8x8xf32>, vector<8x256xf32>, vector<8x256xf32> -> vector<8x256xf32>
    %85 = arith.addf %80, %84 : vector<8x256xf32>
    %86 = vector.extract_strided_slice %74 {offsets = [2, 0, 0], sizes = [1, 8, 8], strides = [1, 1, 1]} : vector<5x8x8xf32> to vector<1x8x8xf32>
    %87 = vector.shape_cast %86 : vector<1x8x8xf32> to vector<8x8xf32>
    %cst_35 = arith.constant dense<0.000000e+00> : vector<8x256xf32>
    %88 = tpu.matmul %87, %73, %cst_35 {dimension_numbers = #tpu.dot_dimension_numbers<[1], [0], [0], [1], [0, 0, 1, 1], [], []>} : vector<8x8xf32>, vector<8x256xf32>, vector<8x256xf32> -> vector<8x256xf32>
    %89 = arith.addf %85, %88 : vector<8x256xf32>
    %c255_i32_36 = arith.constant 255 : i32
    %90 = tpu.dynamic_rotate %73 by %c255_i32_36 dim 1 : vector<8x256xf32>, i32 -> vector<8x256xf32>
    %91 = vector.extract_strided_slice %74 {offsets = [3, 0, 0], sizes = [1, 8, 8], strides = [1, 1, 1]} : vector<5x8x8xf32> to vector<1x8x8xf32>
    %92 = vector.shape_cast %91 : vector<1x8x8xf32> to vector<8x8xf32>
    %cst_37 = arith.constant dense<0.000000e+00> : vector<8x256xf32>
    %93 = tpu.matmul %92, %90, %cst_37 {dimension_numbers = #tpu.dot_dimension_numbers<[1], [0], [0], [1], [0, 0, 1, 1], [], []>} : vector<8x8xf32>, vector<8x256xf32>, vector<8x256xf32> -> vector<8x256xf32>
    %94 = arith.addf %89, %93 : vector<8x256xf32>
    %c254_i32_38 = arith.constant 254 : i32
    %95 = tpu.dynamic_rotate %73 by %c254_i32_38 dim 1 : vector<8x256xf32>, i32 -> vector<8x256xf32>
    %96 = vector.extract_strided_slice %74 {offsets = [4, 0, 0], sizes = [1, 8, 8], strides = [1, 1, 1]} : vector<5x8x8xf32> to vector<1x8x8xf32>
    %97 = vector.shape_cast %96 : vector<1x8x8xf32> to vector<8x8xf32>
    %cst_39 = arith.constant dense<0.000000e+00> : vector<8x256xf32>
    %98 = tpu.matmul %97, %95, %cst_39 {dimension_numbers = #tpu.dot_dimension_numbers<[1], [0], [0], [1], [0, 0, 1, 1], [], []>} : vector<8x8xf32>, vector<8x256xf32>, vector<8x256xf32> -> vector<8x256xf32>
    %99 = arith.addf %94, %98 : vector<8x256xf32>
    %c0_40 = arith.constant 0 : index
    %c0_41 = arith.constant 0 : index
    %100 = vector.load %arg5[%c0_40, %c0_41] : memref<8x1xf32, #tpu.memory_space<vmem>>, vector<8x1xf32>
    %101 = vector.broadcast %100 : vector<8x1xf32> to vector<8x256xf32>
    %102 = arith.addf %99, %101 : vector<8x256xf32>
    %cst_42 = arith.constant 0.000000e+00 : f32
    %103 = vector.broadcast %cst_42 : f32 to vector<8x256xf32>
    %104 = arith.maximumf %102, %103 : vector<8x256xf32>
    %105 = vector.broadcast %6 : vector<1x256xf32> to vector<8x256xf32>
    %106 = arith.mulf %104, %105 : vector<8x256xf32>
    %c0_43 = arith.constant 0 : index
    %c0_44 = arith.constant 0 : index
    %c0_45 = arith.constant 0 : index
    %107 = vector.load %arg6[%c0_43, %c0_44, %c0_45] : memref<3x8x8xf32, #tpu.memory_space<vmem>>, vector<3x8x8xf32>
    %cst_46 = arith.constant 0.000000e+00 : f32
    %108 = vector.broadcast %cst_46 : f32 to vector<8x256xf32>
    %c1_i32_47 = arith.constant 1 : i32
    %109 = tpu.dynamic_rotate %106 by %c1_i32_47 dim 1 : vector<8x256xf32>, i32 -> vector<8x256xf32>
    %110 = vector.extract_strided_slice %107 {offsets = [0, 0, 0], sizes = [1, 8, 8], strides = [1, 1, 1]} : vector<3x8x8xf32> to vector<1x8x8xf32>
    %111 = vector.shape_cast %110 : vector<1x8x8xf32> to vector<8x8xf32>
    %cst_48 = arith.constant dense<0.000000e+00> : vector<8x256xf32>
    %112 = tpu.matmul %111, %109, %cst_48 {dimension_numbers = #tpu.dot_dimension_numbers<[1], [0], [0], [1], [0, 0, 1, 1], [], []>} : vector<8x8xf32>, vector<8x256xf32>, vector<8x256xf32> -> vector<8x256xf32>
    %113 = arith.addf %108, %112 : vector<8x256xf32>
    %114 = vector.extract_strided_slice %107 {offsets = [1, 0, 0], sizes = [1, 8, 8], strides = [1, 1, 1]} : vector<3x8x8xf32> to vector<1x8x8xf32>
    %115 = vector.shape_cast %114 : vector<1x8x8xf32> to vector<8x8xf32>
    %cst_49 = arith.constant dense<0.000000e+00> : vector<8x256xf32>
    %116 = tpu.matmul %115, %106, %cst_49 {dimension_numbers = #tpu.dot_dimension_numbers<[1], [0], [0], [1], [0, 0, 1, 1], [], []>} : vector<8x8xf32>, vector<8x256xf32>, vector<8x256xf32> -> vector<8x256xf32>
    %117 = arith.addf %113, %116 : vector<8x256xf32>
    %c255_i32_50 = arith.constant 255 : i32
    %118 = tpu.dynamic_rotate %106 by %c255_i32_50 dim 1 : vector<8x256xf32>, i32 -> vector<8x256xf32>
    %119 = vector.extract_strided_slice %107 {offsets = [2, 0, 0], sizes = [1, 8, 8], strides = [1, 1, 1]} : vector<3x8x8xf32> to vector<1x8x8xf32>
    %120 = vector.shape_cast %119 : vector<1x8x8xf32> to vector<8x8xf32>
    %cst_51 = arith.constant dense<0.000000e+00> : vector<8x256xf32>
    %121 = tpu.matmul %120, %118, %cst_51 {dimension_numbers = #tpu.dot_dimension_numbers<[1], [0], [0], [1], [0, 0, 1, 1], [], []>} : vector<8x8xf32>, vector<8x256xf32>, vector<8x256xf32> -> vector<8x256xf32>
    %122 = arith.addf %117, %121 : vector<8x256xf32>
    %c0_52 = arith.constant 0 : index
    %c0_53 = arith.constant 0 : index
    %123 = vector.load %arg7[%c0_52, %c0_53] : memref<8x1xf32, #tpu.memory_space<vmem>>, vector<8x1xf32>
    %124 = vector.broadcast %123 : vector<8x1xf32> to vector<8x256xf32>
    %125 = arith.addf %122, %124 : vector<8x256xf32>
    %c0_54 = arith.constant 0 : index
    %c0_55 = arith.constant 0 : index
    %c0_56 = arith.constant 0 : index
    %126 = vector.load %arg8[%c0_54, %c0_55, %c0_56] : memref<1x8x4xf32, #tpu.memory_space<vmem>>, vector<1x8x4xf32>
    %cst_57 = arith.constant 0.000000e+00 : f32
    %127 = vector.broadcast %cst_57 : f32 to vector<8x256xf32>
    %128 = vector.shape_cast %126 : vector<1x8x4xf32> to vector<8x4xf32>
    %cst_58 = arith.constant dense<0.000000e+00> : vector<8x256xf32>
    %129 = tpu.matmul %128, %30, %cst_58 {dimension_numbers = #tpu.dot_dimension_numbers<[1], [0], [0], [1], [0, 0, 1, 1], [], []>} : vector<8x4xf32>, vector<4x256xf32>, vector<8x256xf32> -> vector<8x256xf32>
    %130 = arith.addf %127, %129 : vector<8x256xf32>
    %c0_59 = arith.constant 0 : index
    %c0_60 = arith.constant 0 : index
    %131 = vector.load %arg9[%c0_59, %c0_60] : memref<8x1xf32, #tpu.memory_space<vmem>>, vector<8x1xf32>
    %132 = vector.broadcast %131 : vector<8x1xf32> to vector<8x256xf32>
    %133 = arith.addf %130, %132 : vector<8x256xf32>
    %134 = arith.addf %125, %133 : vector<8x256xf32>
    %cst_61 = arith.constant 0.000000e+00 : f32
    %135 = vector.broadcast %cst_61 : f32 to vector<8x256xf32>
    %136 = arith.maximumf %134, %135 : vector<8x256xf32>
    %c255_i32_62 = arith.constant 255 : i32
    %137 = tpu.dynamic_rotate %30 by %c255_i32_62 dim 1 : vector<4x256xf32>, i32 -> vector<4x256xf32>
    %138 = arith.maximumf %30, %137 : vector<4x256xf32>
    %139 = vector.broadcast %6 : vector<1x256xf32> to vector<4x256xf32>
    %140 = arith.mulf %138, %139 : vector<4x256xf32>
    %c0_63 = arith.constant 0 : index
    %c0_64 = arith.constant 0 : index
    %c0_65 = arith.constant 0 : index
    %141 = vector.load %arg10[%c0_63, %c0_64, %c0_65] : memref<7x8x4xf32, #tpu.memory_space<vmem>>, vector<7x8x4xf32>
    %cst_66 = arith.constant 0.000000e+00 : f32
    %142 = vector.broadcast %cst_66 : f32 to vector<8x256xf32>
    %c6_i32 = arith.constant 6 : i32
    %143 = tpu.dynamic_rotate %140 by %c6_i32 dim 1 : vector<4x256xf32>, i32 -> vector<4x256xf32>
    %144 = vector.extract_strided_slice %141 {offsets = [0, 0, 0], sizes = [1, 8, 4], strides = [1, 1, 1]} : vector<7x8x4xf32> to vector<1x8x4xf32>
    %145 = vector.shape_cast %144 : vector<1x8x4xf32> to vector<8x4xf32>
    %cst_67 = arith.constant dense<0.000000e+00> : vector<8x256xf32>
    %146 = tpu.matmul %145, %143, %cst_67 {dimension_numbers = #tpu.dot_dimension_numbers<[1], [0], [0], [1], [0, 0, 1, 1], [], []>} : vector<8x4xf32>, vector<4x256xf32>, vector<8x256xf32> -> vector<8x256xf32>
    %147 = arith.addf %142, %146 : vector<8x256xf32>
    %c4_i32 = arith.constant 4 : i32
    %148 = tpu.dynamic_rotate %140 by %c4_i32 dim 1 : vector<4x256xf32>, i32 -> vector<4x256xf32>
    %149 = vector.extract_strided_slice %141 {offsets = [1, 0, 0], sizes = [1, 8, 4], strides = [1, 1, 1]} : vector<7x8x4xf32> to vector<1x8x4xf32>
    %150 = vector.shape_cast %149 : vector<1x8x4xf32> to vector<8x4xf32>
    %cst_68 = arith.constant dense<0.000000e+00> : vector<8x256xf32>
    %151 = tpu.matmul %150, %148, %cst_68 {dimension_numbers = #tpu.dot_dimension_numbers<[1], [0], [0], [1], [0, 0, 1, 1], [], []>} : vector<8x4xf32>, vector<4x256xf32>, vector<8x256xf32> -> vector<8x256xf32>
    %152 = arith.addf %147, %151 : vector<8x256xf32>
    %c2_i32_69 = arith.constant 2 : i32
    %153 = tpu.dynamic_rotate %140 by %c2_i32_69 dim 1 : vector<4x256xf32>, i32 -> vector<4x256xf32>
    %154 = vector.extract_strided_slice %141 {offsets = [2, 0, 0], sizes = [1, 8, 4], strides = [1, 1, 1]} : vector<7x8x4xf32> to vector<1x8x4xf32>
    %155 = vector.shape_cast %154 : vector<1x8x4xf32> to vector<8x4xf32>
    %cst_70 = arith.constant dense<0.000000e+00> : vector<8x256xf32>
    %156 = tpu.matmul %155, %153, %cst_70 {dimension_numbers = #tpu.dot_dimension_numbers<[1], [0], [0], [1], [0, 0, 1, 1], [], []>} : vector<8x4xf32>, vector<4x256xf32>, vector<8x256xf32> -> vector<8x256xf32>
    %157 = arith.addf %152, %156 : vector<8x256xf32>
    %158 = vector.extract_strided_slice %141 {offsets = [3, 0, 0], sizes = [1, 8, 4], strides = [1, 1, 1]} : vector<7x8x4xf32> to vector<1x8x4xf32>
    %159 = vector.shape_cast %158 : vector<1x8x4xf32> to vector<8x4xf32>
    %cst_71 = arith.constant dense<0.000000e+00> : vector<8x256xf32>
    %160 = tpu.matmul %159, %140, %cst_71 {dimension_numbers = #tpu.dot_dimension_numbers<[1], [0], [0], [1], [0, 0, 1, 1], [], []>} : vector<8x4xf32>, vector<4x256xf32>, vector<8x256xf32> -> vector<8x256xf32>
    %161 = arith.addf %157, %160 : vector<8x256xf32>
    %c254_i32_72 = arith.constant 254 : i32
    %162 = tpu.dynamic_rotate %140 by %c254_i32_72 dim 1 : vector<4x256xf32>, i32 -> vector<4x256xf32>
    %163 = vector.extract_strided_slice %141 {offsets = [4, 0, 0], sizes = [1, 8, 4], strides = [1, 1, 1]} : vector<7x8x4xf32> to vector<1x8x4xf32>
    %164 = vector.shape_cast %163 : vector<1x8x4xf32> to vector<8x4xf32>
    %cst_73 = arith.constant dense<0.000000e+00> : vector<8x256xf32>
    %165 = tpu.matmul %164, %162, %cst_73 {dimension_numbers = #tpu.dot_dimension_numbers<[1], [0], [0], [1], [0, 0, 1, 1], [], []>} : vector<8x4xf32>, vector<4x256xf32>, vector<8x256xf32> -> vector<8x256xf32>
    %166 = arith.addf %161, %165 : vector<8x256xf32>
    %c252_i32 = arith.constant 252 : i32
    %167 = tpu.dynamic_rotate %140 by %c252_i32 dim 1 : vector<4x256xf32>, i32 -> vector<4x256xf32>
    %168 = vector.extract_strided_slice %141 {offsets = [5, 0, 0], sizes = [1, 8, 4], strides = [1, 1, 1]} : vector<7x8x4xf32> to vector<1x8x4xf32>
    %169 = vector.shape_cast %168 : vector<1x8x4xf32> to vector<8x4xf32>
    %cst_74 = arith.constant dense<0.000000e+00> : vector<8x256xf32>
    %170 = tpu.matmul %169, %167, %cst_74 {dimension_numbers = #tpu.dot_dimension_numbers<[1], [0], [0], [1], [0, 0, 1, 1], [], []>} : vector<8x4xf32>, vector<4x256xf32>, vector<8x256xf32> -> vector<8x256xf32>
    %171 = arith.addf %166, %170 : vector<8x256xf32>
    %c250_i32 = arith.constant 250 : i32
    %172 = tpu.dynamic_rotate %140 by %c250_i32 dim 1 : vector<4x256xf32>, i32 -> vector<4x256xf32>
    %173 = vector.extract_strided_slice %141 {offsets = [6, 0, 0], sizes = [1, 8, 4], strides = [1, 1, 1]} : vector<7x8x4xf32> to vector<1x8x4xf32>
    %174 = vector.shape_cast %173 : vector<1x8x4xf32> to vector<8x4xf32>
    %cst_75 = arith.constant dense<0.000000e+00> : vector<8x256xf32>
    %175 = tpu.matmul %174, %172, %cst_75 {dimension_numbers = #tpu.dot_dimension_numbers<[1], [0], [0], [1], [0, 0, 1, 1], [], []>} : vector<8x4xf32>, vector<4x256xf32>, vector<8x256xf32> -> vector<8x256xf32>
    %176 = arith.addf %171, %175 : vector<8x256xf32>
    %c0_76 = arith.constant 0 : index
    %c0_77 = arith.constant 0 : index
    %177 = vector.load %arg11[%c0_76, %c0_77] : memref<8x1xf32, #tpu.memory_space<vmem>>, vector<8x1xf32>
    %178 = vector.broadcast %177 : vector<8x1xf32> to vector<8x256xf32>
    %179 = arith.addf %176, %178 : vector<8x256xf32>
    %cst_78 = arith.constant 0.000000e+00 : f32
    %180 = vector.broadcast %cst_78 : f32 to vector<8x256xf32>
    %181 = arith.maximumf %179, %180 : vector<8x256xf32>
    %182 = vector.broadcast %6 : vector<1x256xf32> to vector<8x256xf32>
    %183 = arith.mulf %181, %182 : vector<8x256xf32>
    %c0_79 = arith.constant 0 : index
    %c0_80 = arith.constant 0 : index
    %c0_81 = arith.constant 0 : index
    %184 = vector.load %arg12[%c0_79, %c0_80, %c0_81] : memref<5x8x8xf32, #tpu.memory_space<vmem>>, vector<5x8x8xf32>
    %cst_82 = arith.constant 0.000000e+00 : f32
    %185 = vector.broadcast %cst_82 : f32 to vector<8x256xf32>
    %c4_i32_83 = arith.constant 4 : i32
    %186 = tpu.dynamic_rotate %183 by %c4_i32_83 dim 1 : vector<8x256xf32>, i32 -> vector<8x256xf32>
    %187 = vector.extract_strided_slice %184 {offsets = [0, 0, 0], sizes = [1, 8, 8], strides = [1, 1, 1]} : vector<5x8x8xf32> to vector<1x8x8xf32>
    %188 = vector.shape_cast %187 : vector<1x8x8xf32> to vector<8x8xf32>
    %cst_84 = arith.constant dense<0.000000e+00> : vector<8x256xf32>
    %189 = tpu.matmul %188, %186, %cst_84 {dimension_numbers = #tpu.dot_dimension_numbers<[1], [0], [0], [1], [0, 0, 1, 1], [], []>} : vector<8x8xf32>, vector<8x256xf32>, vector<8x256xf32> -> vector<8x256xf32>
    %190 = arith.addf %185, %189 : vector<8x256xf32>
    %c2_i32_85 = arith.constant 2 : i32
    %191 = tpu.dynamic_rotate %183 by %c2_i32_85 dim 1 : vector<8x256xf32>, i32 -> vector<8x256xf32>
    %192 = vector.extract_strided_slice %184 {offsets = [1, 0, 0], sizes = [1, 8, 8], strides = [1, 1, 1]} : vector<5x8x8xf32> to vector<1x8x8xf32>
    %193 = vector.shape_cast %192 : vector<1x8x8xf32> to vector<8x8xf32>
    %cst_86 = arith.constant dense<0.000000e+00> : vector<8x256xf32>
    %194 = tpu.matmul %193, %191, %cst_86 {dimension_numbers = #tpu.dot_dimension_numbers<[1], [0], [0], [1], [0, 0, 1, 1], [], []>} : vector<8x8xf32>, vector<8x256xf32>, vector<8x256xf32> -> vector<8x256xf32>
    %195 = arith.addf %190, %194 : vector<8x256xf32>
    %196 = vector.extract_strided_slice %184 {offsets = [2, 0, 0], sizes = [1, 8, 8], strides = [1, 1, 1]} : vector<5x8x8xf32> to vector<1x8x8xf32>
    %197 = vector.shape_cast %196 : vector<1x8x8xf32> to vector<8x8xf32>
    %cst_87 = arith.constant dense<0.000000e+00> : vector<8x256xf32>
    %198 = tpu.matmul %197, %183, %cst_87 {dimension_numbers = #tpu.dot_dimension_numbers<[1], [0], [0], [1], [0, 0, 1, 1], [], []>} : vector<8x8xf32>, vector<8x256xf32>, vector<8x256xf32> -> vector<8x256xf32>
    %199 = arith.addf %195, %198 : vector<8x256xf32>
    %c254_i32_88 = arith.constant 254 : i32
    %200 = tpu.dynamic_rotate %183 by %c254_i32_88 dim 1 : vector<8x256xf32>, i32 -> vector<8x256xf32>
    %201 = vector.extract_strided_slice %184 {offsets = [3, 0, 0], sizes = [1, 8, 8], strides = [1, 1, 1]} : vector<5x8x8xf32> to vector<1x8x8xf32>
    %202 = vector.shape_cast %201 : vector<1x8x8xf32> to vector<8x8xf32>
    %cst_89 = arith.constant dense<0.000000e+00> : vector<8x256xf32>
    %203 = tpu.matmul %202, %200, %cst_89 {dimension_numbers = #tpu.dot_dimension_numbers<[1], [0], [0], [1], [0, 0, 1, 1], [], []>} : vector<8x8xf32>, vector<8x256xf32>, vector<8x256xf32> -> vector<8x256xf32>
    %204 = arith.addf %199, %203 : vector<8x256xf32>
    %c252_i32_90 = arith.constant 252 : i32
    %205 = tpu.dynamic_rotate %183 by %c252_i32_90 dim 1 : vector<8x256xf32>, i32 -> vector<8x256xf32>
    %206 = vector.extract_strided_slice %184 {offsets = [4, 0, 0], sizes = [1, 8, 8], strides = [1, 1, 1]} : vector<5x8x8xf32> to vector<1x8x8xf32>
    %207 = vector.shape_cast %206 : vector<1x8x8xf32> to vector<8x8xf32>
    %cst_91 = arith.constant dense<0.000000e+00> : vector<8x256xf32>
    %208 = tpu.matmul %207, %205, %cst_91 {dimension_numbers = #tpu.dot_dimension_numbers<[1], [0], [0], [1], [0, 0, 1, 1], [], []>} : vector<8x8xf32>, vector<8x256xf32>, vector<8x256xf32> -> vector<8x256xf32>
    %209 = arith.addf %204, %208 : vector<8x256xf32>
    %c0_92 = arith.constant 0 : index
    %c0_93 = arith.constant 0 : index
    %210 = vector.load %arg13[%c0_92, %c0_93] : memref<8x1xf32, #tpu.memory_space<vmem>>, vector<8x1xf32>
    %211 = vector.broadcast %210 : vector<8x1xf32> to vector<8x256xf32>
    %212 = arith.addf %209, %211 : vector<8x256xf32>
    %cst_94 = arith.constant 0.000000e+00 : f32
    %213 = vector.broadcast %cst_94 : f32 to vector<8x256xf32>
    %214 = arith.maximumf %212, %213 : vector<8x256xf32>
    %215 = vector.broadcast %6 : vector<1x256xf32> to vector<8x256xf32>
    %216 = arith.mulf %214, %215 : vector<8x256xf32>
    %c0_95 = arith.constant 0 : index
    %c0_96 = arith.constant 0 : index
    %c0_97 = arith.constant 0 : index
    %217 = vector.load %arg14[%c0_95, %c0_96, %c0_97] : memref<3x8x8xf32, #tpu.memory_space<vmem>>, vector<3x8x8xf32>
    %cst_98 = arith.constant 0.000000e+00 : f32
    %218 = vector.broadcast %cst_98 : f32 to vector<8x256xf32>
    %c2_i32_99 = arith.constant 2 : i32
    %219 = tpu.dynamic_rotate %216 by %c2_i32_99 dim 1 : vector<8x256xf32>, i32 -> vector<8x256xf32>
    %220 = vector.extract_strided_slice %217 {offsets = [0, 0, 0], sizes = [1, 8, 8], strides = [1, 1, 1]} : vector<3x8x8xf32> to vector<1x8x8xf32>
    %221 = vector.shape_cast %220 : vector<1x8x8xf32> to vector<8x8xf32>
    %cst_100 = arith.constant dense<0.000000e+00> : vector<8x256xf32>
    %222 = tpu.matmul %221, %219, %cst_100 {dimension_numbers = #tpu.dot_dimension_numbers<[1], [0], [0], [1], [0, 0, 1, 1], [], []>} : vector<8x8xf32>, vector<8x256xf32>, vector<8x256xf32> -> vector<8x256xf32>
    %223 = arith.addf %218, %222 : vector<8x256xf32>
    %224 = vector.extract_strided_slice %217 {offsets = [1, 0, 0], sizes = [1, 8, 8], strides = [1, 1, 1]} : vector<3x8x8xf32> to vector<1x8x8xf32>
    %225 = vector.shape_cast %224 : vector<1x8x8xf32> to vector<8x8xf32>
    %cst_101 = arith.constant dense<0.000000e+00> : vector<8x256xf32>
    %226 = tpu.matmul %225, %216, %cst_101 {dimension_numbers = #tpu.dot_dimension_numbers<[1], [0], [0], [1], [0, 0, 1, 1], [], []>} : vector<8x8xf32>, vector<8x256xf32>, vector<8x256xf32> -> vector<8x256xf32>
    %227 = arith.addf %223, %226 : vector<8x256xf32>
    %c254_i32_102 = arith.constant 254 : i32
    %228 = tpu.dynamic_rotate %216 by %c254_i32_102 dim 1 : vector<8x256xf32>, i32 -> vector<8x256xf32>
    %229 = vector.extract_strided_slice %217 {offsets = [2, 0, 0], sizes = [1, 8, 8], strides = [1, 1, 1]} : vector<3x8x8xf32> to vector<1x8x8xf32>
    %230 = vector.shape_cast %229 : vector<1x8x8xf32> to vector<8x8xf32>
    %cst_103 = arith.constant dense<0.000000e+00> : vector<8x256xf32>
    %231 = tpu.matmul %230, %228, %cst_103 {dimension_numbers = #tpu.dot_dimension_numbers<[1], [0], [0], [1], [0, 0, 1, 1], [], []>} : vector<8x8xf32>, vector<8x256xf32>, vector<8x256xf32> -> vector<8x256xf32>
    %232 = arith.addf %227, %231 : vector<8x256xf32>
    %c0_104 = arith.constant 0 : index
    %c0_105 = arith.constant 0 : index
    %233 = vector.load %arg15[%c0_104, %c0_105] : memref<8x1xf32, #tpu.memory_space<vmem>>, vector<8x1xf32>
    %234 = vector.broadcast %233 : vector<8x1xf32> to vector<8x256xf32>
    %235 = arith.addf %232, %234 : vector<8x256xf32>
    %c0_106 = arith.constant 0 : index
    %c0_107 = arith.constant 0 : index
    %c0_108 = arith.constant 0 : index
    %236 = vector.load %arg16[%c0_106, %c0_107, %c0_108] : memref<1x8x4xf32, #tpu.memory_space<vmem>>, vector<1x8x4xf32>
    %cst_109 = arith.constant 0.000000e+00 : f32
    %237 = vector.broadcast %cst_109 : f32 to vector<8x256xf32>
    %238 = vector.shape_cast %236 : vector<1x8x4xf32> to vector<8x4xf32>
    %cst_110 = arith.constant dense<0.000000e+00> : vector<8x256xf32>
    %239 = tpu.matmul %238, %140, %cst_110 {dimension_numbers = #tpu.dot_dimension_numbers<[1], [0], [0], [1], [0, 0, 1, 1], [], []>} : vector<8x4xf32>, vector<4x256xf32>, vector<8x256xf32> -> vector<8x256xf32>
    %240 = arith.addf %237, %239 : vector<8x256xf32>
    %c0_111 = arith.constant 0 : index
    %c0_112 = arith.constant 0 : index
    %241 = vector.load %arg17[%c0_111, %c0_112] : memref<8x1xf32, #tpu.memory_space<vmem>>, vector<8x1xf32>
    %242 = vector.broadcast %241 : vector<8x1xf32> to vector<8x256xf32>
    %243 = arith.addf %240, %242 : vector<8x256xf32>
    %244 = arith.addf %235, %243 : vector<8x256xf32>
    %cst_113 = arith.constant 0.000000e+00 : f32
    %245 = vector.broadcast %cst_113 : f32 to vector<8x256xf32>
    %246 = arith.maximumf %244, %245 : vector<8x256xf32>
    %247 = vector.broadcast %14 : vector<1x256xf32> to vector<8x256xf32>
    %248 = arith.mulf %246, %247 : vector<8x256xf32>
    %c1_i32_114 = arith.constant 1 : i32
    %249 = tpu.dynamic_rotate %248 by %c1_i32_114 dim 1 : vector<8x256xf32>, i32 -> vector<8x256xf32>
    %250 = arith.addf %248, %249 : vector<8x256xf32>
    %c1_i32_115 = arith.constant 1 : i32
    %251 = tpu.dynamic_rotate %250 by %c1_i32_115 dim 1 : vector<8x256xf32>, i32 -> vector<8x256xf32>
    %c255_i32_116 = arith.constant 255 : i32
    %252 = tpu.dynamic_rotate %250 by %c255_i32_116 dim 1 : vector<8x256xf32>, i32 -> vector<8x256xf32>
    %cst_117 = arith.constant 2.500000e-01 : f32
    %253 = vector.broadcast %cst_117 : f32 to vector<8x256xf32>
    %254 = arith.mulf %253, %251 : vector<8x256xf32>
    %cst_118 = arith.constant 7.500000e-01 : f32
    %255 = vector.broadcast %cst_118 : f32 to vector<8x256xf32>
    %256 = arith.mulf %255, %250 : vector<8x256xf32>
    %257 = arith.addf %254, %256 : vector<8x256xf32>
    %258 = vector.broadcast %13 : vector<1x256xf32> to vector<8x256xf32>
    %259 = arith.mulf %258, %257 : vector<8x256xf32>
    %cst_119 = arith.constant 1.000000e+00 : f32
    %260 = vector.broadcast %cst_119 : f32 to vector<1x256xf32>
    %261 = arith.subf %260, %13 : vector<1x256xf32>
    %cst_120 = arith.constant 7.500000e-01 : f32
    %262 = vector.broadcast %cst_120 : f32 to vector<8x256xf32>
    %263 = arith.mulf %262, %250 : vector<8x256xf32>
    %cst_121 = arith.constant 2.500000e-01 : f32
    %264 = vector.broadcast %cst_121 : f32 to vector<8x256xf32>
    %265 = arith.mulf %264, %252 : vector<8x256xf32>
    %266 = arith.addf %263, %265 : vector<8x256xf32>
    %267 = vector.broadcast %261 : vector<1x256xf32> to vector<8x256xf32>
    %268 = arith.mulf %267, %266 : vector<8x256xf32>
    %269 = arith.addf %259, %268 : vector<8x256xf32>
    %270 = vector.broadcast %25 : vector<1x256xf32> to vector<8x256xf32>
    %271 = arith.mulf %270, %250 : vector<8x256xf32>
    %cst_122 = arith.constant 1.000000e+00 : f32
    %272 = vector.broadcast %cst_122 : f32 to vector<1x256xf32>
    %273 = arith.subf %272, %25 : vector<1x256xf32>
    %274 = vector.broadcast %273 : vector<1x256xf32> to vector<8x256xf32>
    %275 = arith.mulf %274, %269 : vector<8x256xf32>
    %276 = arith.addf %271, %275 : vector<8x256xf32>
    %277 = vector.broadcast %6 : vector<1x256xf32> to vector<8x256xf32>
    %278 = arith.mulf %276, %277 : vector<8x256xf32>
    %c0_123 = arith.constant 0 : index
    %c0_124 = arith.constant 0 : index
    %c0_125 = arith.constant 0 : index
    %279 = vector.load %arg18[%c0_123, %c0_124, %c0_125] : memref<7x8x8xf32, #tpu.memory_space<vmem>>, vector<7x8x8xf32>
    %cst_126 = arith.constant 0.000000e+00 : f32
    %280 = vector.broadcast %cst_126 : f32 to vector<8x256xf32>
    %c3_i32_127 = arith.constant 3 : i32
    %281 = tpu.dynamic_rotate %278 by %c3_i32_127 dim 1 : vector<8x256xf32>, i32 -> vector<8x256xf32>
    %282 = vector.extract_strided_slice %279 {offsets = [0, 0, 0], sizes = [1, 8, 8], strides = [1, 1, 1]} : vector<7x8x8xf32> to vector<1x8x8xf32>
    %283 = vector.shape_cast %282 : vector<1x8x8xf32> to vector<8x8xf32>
    %cst_128 = arith.constant dense<0.000000e+00> : vector<8x256xf32>
    %284 = tpu.matmul %283, %281, %cst_128 {dimension_numbers = #tpu.dot_dimension_numbers<[1], [0], [0], [1], [0, 0, 1, 1], [], []>} : vector<8x8xf32>, vector<8x256xf32>, vector<8x256xf32> -> vector<8x256xf32>
    %285 = arith.addf %280, %284 : vector<8x256xf32>
    %c2_i32_129 = arith.constant 2 : i32
    %286 = tpu.dynamic_rotate %278 by %c2_i32_129 dim 1 : vector<8x256xf32>, i32 -> vector<8x256xf32>
    %287 = vector.extract_strided_slice %279 {offsets = [1, 0, 0], sizes = [1, 8, 8], strides = [1, 1, 1]} : vector<7x8x8xf32> to vector<1x8x8xf32>
    %288 = vector.shape_cast %287 : vector<1x8x8xf32> to vector<8x8xf32>
    %cst_130 = arith.constant dense<0.000000e+00> : vector<8x256xf32>
    %289 = tpu.matmul %288, %286, %cst_130 {dimension_numbers = #tpu.dot_dimension_numbers<[1], [0], [0], [1], [0, 0, 1, 1], [], []>} : vector<8x8xf32>, vector<8x256xf32>, vector<8x256xf32> -> vector<8x256xf32>
    %290 = arith.addf %285, %289 : vector<8x256xf32>
    %c1_i32_131 = arith.constant 1 : i32
    %291 = tpu.dynamic_rotate %278 by %c1_i32_131 dim 1 : vector<8x256xf32>, i32 -> vector<8x256xf32>
    %292 = vector.extract_strided_slice %279 {offsets = [2, 0, 0], sizes = [1, 8, 8], strides = [1, 1, 1]} : vector<7x8x8xf32> to vector<1x8x8xf32>
    %293 = vector.shape_cast %292 : vector<1x8x8xf32> to vector<8x8xf32>
    %cst_132 = arith.constant dense<0.000000e+00> : vector<8x256xf32>
    %294 = tpu.matmul %293, %291, %cst_132 {dimension_numbers = #tpu.dot_dimension_numbers<[1], [0], [0], [1], [0, 0, 1, 1], [], []>} : vector<8x8xf32>, vector<8x256xf32>, vector<8x256xf32> -> vector<8x256xf32>
    %295 = arith.addf %290, %294 : vector<8x256xf32>
    %296 = vector.extract_strided_slice %279 {offsets = [3, 0, 0], sizes = [1, 8, 8], strides = [1, 1, 1]} : vector<7x8x8xf32> to vector<1x8x8xf32>
    %297 = vector.shape_cast %296 : vector<1x8x8xf32> to vector<8x8xf32>
    %cst_133 = arith.constant dense<0.000000e+00> : vector<8x256xf32>
    %298 = tpu.matmul %297, %278, %cst_133 {dimension_numbers = #tpu.dot_dimension_numbers<[1], [0], [0], [1], [0, 0, 1, 1], [], []>} : vector<8x8xf32>, vector<8x256xf32>, vector<8x256xf32> -> vector<8x256xf32>
    %299 = arith.addf %295, %298 : vector<8x256xf32>
    %c255_i32_134 = arith.constant 255 : i32
    %300 = tpu.dynamic_rotate %278 by %c255_i32_134 dim 1 : vector<8x256xf32>, i32 -> vector<8x256xf32>
    %301 = vector.extract_strided_slice %279 {offsets = [4, 0, 0], sizes = [1, 8, 8], strides = [1, 1, 1]} : vector<7x8x8xf32> to vector<1x8x8xf32>
    %302 = vector.shape_cast %301 : vector<1x8x8xf32> to vector<8x8xf32>
    %cst_135 = arith.constant dense<0.000000e+00> : vector<8x256xf32>
    %303 = tpu.matmul %302, %300, %cst_135 {dimension_numbers = #tpu.dot_dimension_numbers<[1], [0], [0], [1], [0, 0, 1, 1], [], []>} : vector<8x8xf32>, vector<8x256xf32>, vector<8x256xf32> -> vector<8x256xf32>
    %304 = arith.addf %299, %303 : vector<8x256xf32>
    %c254_i32_136 = arith.constant 254 : i32
    %305 = tpu.dynamic_rotate %278 by %c254_i32_136 dim 1 : vector<8x256xf32>, i32 -> vector<8x256xf32>
    %306 = vector.extract_strided_slice %279 {offsets = [5, 0, 0], sizes = [1, 8, 8], strides = [1, 1, 1]} : vector<7x8x8xf32> to vector<1x8x8xf32>
    %307 = vector.shape_cast %306 : vector<1x8x8xf32> to vector<8x8xf32>
    %cst_137 = arith.constant dense<0.000000e+00> : vector<8x256xf32>
    %308 = tpu.matmul %307, %305, %cst_137 {dimension_numbers = #tpu.dot_dimension_numbers<[1], [0], [0], [1], [0, 0, 1, 1], [], []>} : vector<8x8xf32>, vector<8x256xf32>, vector<8x256xf32> -> vector<8x256xf32>
    %309 = arith.addf %304, %308 : vector<8x256xf32>
    %c253_i32_138 = arith.constant 253 : i32
    %310 = tpu.dynamic_rotate %278 by %c253_i32_138 dim 1 : vector<8x256xf32>, i32 -> vector<8x256xf32>
    %311 = vector.extract_strided_slice %279 {offsets = [6, 0, 0], sizes = [1, 8, 8], strides = [1, 1, 1]} : vector<7x8x8xf32> to vector<1x8x8xf32>
    %312 = vector.shape_cast %311 : vector<1x8x8xf32> to vector<8x8xf32>
    %cst_139 = arith.constant dense<0.000000e+00> : vector<8x256xf32>
    %313 = tpu.matmul %312, %310, %cst_139 {dimension_numbers = #tpu.dot_dimension_numbers<[1], [0], [0], [1], [0, 0, 1, 1], [], []>} : vector<8x8xf32>, vector<8x256xf32>, vector<8x256xf32> -> vector<8x256xf32>
    %314 = arith.addf %309, %313 : vector<8x256xf32>
    %c0_140 = arith.constant 0 : index
    %c0_141 = arith.constant 0 : index
    %315 = vector.load %arg19[%c0_140, %c0_141] : memref<8x1xf32, #tpu.memory_space<vmem>>, vector<8x1xf32>
    %316 = vector.broadcast %315 : vector<8x1xf32> to vector<8x256xf32>
    %317 = arith.addf %314, %316 : vector<8x256xf32>
    %cst_142 = arith.constant 0.000000e+00 : f32
    %318 = vector.broadcast %cst_142 : f32 to vector<8x256xf32>
    %319 = arith.maximumf %317, %318 : vector<8x256xf32>
    %320 = vector.broadcast %6 : vector<1x256xf32> to vector<8x256xf32>
    %321 = arith.mulf %319, %320 : vector<8x256xf32>
    %c0_143 = arith.constant 0 : index
    %c0_144 = arith.constant 0 : index
    %c0_145 = arith.constant 0 : index
    %322 = vector.load %arg20[%c0_143, %c0_144, %c0_145] : memref<5x8x8xf32, #tpu.memory_space<vmem>>, vector<5x8x8xf32>
    %cst_146 = arith.constant 0.000000e+00 : f32
    %323 = vector.broadcast %cst_146 : f32 to vector<8x256xf32>
    %c2_i32_147 = arith.constant 2 : i32
    %324 = tpu.dynamic_rotate %321 by %c2_i32_147 dim 1 : vector<8x256xf32>, i32 -> vector<8x256xf32>
    %325 = vector.extract_strided_slice %322 {offsets = [0, 0, 0], sizes = [1, 8, 8], strides = [1, 1, 1]} : vector<5x8x8xf32> to vector<1x8x8xf32>
    %326 = vector.shape_cast %325 : vector<1x8x8xf32> to vector<8x8xf32>
    %cst_148 = arith.constant dense<0.000000e+00> : vector<8x256xf32>
    %327 = tpu.matmul %326, %324, %cst_148 {dimension_numbers = #tpu.dot_dimension_numbers<[1], [0], [0], [1], [0, 0, 1, 1], [], []>} : vector<8x8xf32>, vector<8x256xf32>, vector<8x256xf32> -> vector<8x256xf32>
    %328 = arith.addf %323, %327 : vector<8x256xf32>
    %c1_i32_149 = arith.constant 1 : i32
    %329 = tpu.dynamic_rotate %321 by %c1_i32_149 dim 1 : vector<8x256xf32>, i32 -> vector<8x256xf32>
    %330 = vector.extract_strided_slice %322 {offsets = [1, 0, 0], sizes = [1, 8, 8], strides = [1, 1, 1]} : vector<5x8x8xf32> to vector<1x8x8xf32>
    %331 = vector.shape_cast %330 : vector<1x8x8xf32> to vector<8x8xf32>
    %cst_150 = arith.constant dense<0.000000e+00> : vector<8x256xf32>
    %332 = tpu.matmul %331, %329, %cst_150 {dimension_numbers = #tpu.dot_dimension_numbers<[1], [0], [0], [1], [0, 0, 1, 1], [], []>} : vector<8x8xf32>, vector<8x256xf32>, vector<8x256xf32> -> vector<8x256xf32>
    %333 = arith.addf %328, %332 : vector<8x256xf32>
    %334 = vector.extract_strided_slice %322 {offsets = [2, 0, 0], sizes = [1, 8, 8], strides = [1, 1, 1]} : vector<5x8x8xf32> to vector<1x8x8xf32>
    %335 = vector.shape_cast %334 : vector<1x8x8xf32> to vector<8x8xf32>
    %cst_151 = arith.constant dense<0.000000e+00> : vector<8x256xf32>
    %336 = tpu.matmul %335, %321, %cst_151 {dimension_numbers = #tpu.dot_dimension_numbers<[1], [0], [0], [1], [0, 0, 1, 1], [], []>} : vector<8x8xf32>, vector<8x256xf32>, vector<8x256xf32> -> vector<8x256xf32>
    %337 = arith.addf %333, %336 : vector<8x256xf32>
    %c255_i32_152 = arith.constant 255 : i32
    %338 = tpu.dynamic_rotate %321 by %c255_i32_152 dim 1 : vector<8x256xf32>, i32 -> vector<8x256xf32>
    %339 = vector.extract_strided_slice %322 {offsets = [3, 0, 0], sizes = [1, 8, 8], strides = [1, 1, 1]} : vector<5x8x8xf32> to vector<1x8x8xf32>
    %340 = vector.shape_cast %339 : vector<1x8x8xf32> to vector<8x8xf32>
    %cst_153 = arith.constant dense<0.000000e+00> : vector<8x256xf32>
    %341 = tpu.matmul %340, %338, %cst_153 {dimension_numbers = #tpu.dot_dimension_numbers<[1], [0], [0], [1], [0, 0, 1, 1], [], []>} : vector<8x8xf32>, vector<8x256xf32>, vector<8x256xf32> -> vector<8x256xf32>
    %342 = arith.addf %337, %341 : vector<8x256xf32>
    %c254_i32_154 = arith.constant 254 : i32
    %343 = tpu.dynamic_rotate %321 by %c254_i32_154 dim 1 : vector<8x256xf32>, i32 -> vector<8x256xf32>
    %344 = vector.extract_strided_slice %322 {offsets = [4, 0, 0], sizes = [1, 8, 8], strides = [1, 1, 1]} : vector<5x8x8xf32> to vector<1x8x8xf32>
    %345 = vector.shape_cast %344 : vector<1x8x8xf32> to vector<8x8xf32>
    %cst_155 = arith.constant dense<0.000000e+00> : vector<8x256xf32>
    %346 = tpu.matmul %345, %343, %cst_155 {dimension_numbers = #tpu.dot_dimension_numbers<[1], [0], [0], [1], [0, 0, 1, 1], [], []>} : vector<8x8xf32>, vector<8x256xf32>, vector<8x256xf32> -> vector<8x256xf32>
    %347 = arith.addf %342, %346 : vector<8x256xf32>
    %c0_156 = arith.constant 0 : index
    %c0_157 = arith.constant 0 : index
    %348 = vector.load %arg21[%c0_156, %c0_157] : memref<8x1xf32, #tpu.memory_space<vmem>>, vector<8x1xf32>
    %349 = vector.broadcast %348 : vector<8x1xf32> to vector<8x256xf32>
    %350 = arith.addf %347, %349 : vector<8x256xf32>
    %cst_158 = arith.constant 0.000000e+00 : f32
    %351 = vector.broadcast %cst_158 : f32 to vector<8x256xf32>
    %352 = arith.maximumf %350, %351 : vector<8x256xf32>
    %353 = vector.broadcast %6 : vector<1x256xf32> to vector<8x256xf32>
    %354 = arith.mulf %352, %353 : vector<8x256xf32>
    %c0_159 = arith.constant 0 : index
    %c0_160 = arith.constant 0 : index
    %c0_161 = arith.constant 0 : index
    %355 = vector.load %arg22[%c0_159, %c0_160, %c0_161] : memref<3x8x8xf32, #tpu.memory_space<vmem>>, vector<3x8x8xf32>
    %cst_162 = arith.constant 0.000000e+00 : f32
    %356 = vector.broadcast %cst_162 : f32 to vector<8x256xf32>
    %c1_i32_163 = arith.constant 1 : i32
    %357 = tpu.dynamic_rotate %354 by %c1_i32_163 dim 1 : vector<8x256xf32>, i32 -> vector<8x256xf32>
    %358 = vector.extract_strided_slice %355 {offsets = [0, 0, 0], sizes = [1, 8, 8], strides = [1, 1, 1]} : vector<3x8x8xf32> to vector<1x8x8xf32>
    %359 = vector.shape_cast %358 : vector<1x8x8xf32> to vector<8x8xf32>
    %cst_164 = arith.constant dense<0.000000e+00> : vector<8x256xf32>
    %360 = tpu.matmul %359, %357, %cst_164 {dimension_numbers = #tpu.dot_dimension_numbers<[1], [0], [0], [1], [0, 0, 1, 1], [], []>} : vector<8x8xf32>, vector<8x256xf32>, vector<8x256xf32> -> vector<8x256xf32>
    %361 = arith.addf %356, %360 : vector<8x256xf32>
    %362 = vector.extract_strided_slice %355 {offsets = [1, 0, 0], sizes = [1, 8, 8], strides = [1, 1, 1]} : vector<3x8x8xf32> to vector<1x8x8xf32>
    %363 = vector.shape_cast %362 : vector<1x8x8xf32> to vector<8x8xf32>
    %cst_165 = arith.constant dense<0.000000e+00> : vector<8x256xf32>
    %364 = tpu.matmul %363, %354, %cst_165 {dimension_numbers = #tpu.dot_dimension_numbers<[1], [0], [0], [1], [0, 0, 1, 1], [], []>} : vector<8x8xf32>, vector<8x256xf32>, vector<8x256xf32> -> vector<8x256xf32>
    %365 = arith.addf %361, %364 : vector<8x256xf32>
    %c255_i32_166 = arith.constant 255 : i32
    %366 = tpu.dynamic_rotate %354 by %c255_i32_166 dim 1 : vector<8x256xf32>, i32 -> vector<8x256xf32>
    %367 = vector.extract_strided_slice %355 {offsets = [2, 0, 0], sizes = [1, 8, 8], strides = [1, 1, 1]} : vector<3x8x8xf32> to vector<1x8x8xf32>
    %368 = vector.shape_cast %367 : vector<1x8x8xf32> to vector<8x8xf32>
    %cst_167 = arith.constant dense<0.000000e+00> : vector<8x256xf32>
    %369 = tpu.matmul %368, %366, %cst_167 {dimension_numbers = #tpu.dot_dimension_numbers<[1], [0], [0], [1], [0, 0, 1, 1], [], []>} : vector<8x8xf32>, vector<8x256xf32>, vector<8x256xf32> -> vector<8x256xf32>
    %370 = arith.addf %365, %369 : vector<8x256xf32>
    %c0_168 = arith.constant 0 : index
    %c0_169 = arith.constant 0 : index
    %371 = vector.load %arg23[%c0_168, %c0_169] : memref<8x1xf32, #tpu.memory_space<vmem>>, vector<8x1xf32>
    %372 = vector.broadcast %371 : vector<8x1xf32> to vector<8x256xf32>
    %373 = arith.addf %370, %372 : vector<8x256xf32>
    %c0_170 = arith.constant 0 : index
    %c0_171 = arith.constant 0 : index
    %c0_172 = arith.constant 0 : index
    %374 = vector.load %arg24[%c0_170, %c0_171, %c0_172] : memref<1x8x8xf32, #tpu.memory_space<vmem>>, vector<1x8x8xf32>
    %cst_173 = arith.constant 0.000000e+00 : f32
    %375 = vector.broadcast %cst_173 : f32 to vector<8x256xf32>
    %376 = vector.shape_cast %374 : vector<1x8x8xf32> to vector<8x8xf32>
    %cst_174 = arith.constant dense<0.000000e+00> : vector<8x256xf32>
    %377 = tpu.matmul %376, %278, %cst_174 {dimension_numbers = #tpu.dot_dimension_numbers<[1], [0], [0], [1], [0, 0, 1, 1], [], []>} : vector<8x8xf32>, vector<8x256xf32>, vector<8x256xf32> -> vector<8x256xf32>
    %378 = arith.addf %375, %377 : vector<8x256xf32>
    %c0_175 = arith.constant 0 : index
    %c0_176 = arith.constant 0 : index
    %379 = vector.load %arg25[%c0_175, %c0_176] : memref<8x1xf32, #tpu.memory_space<vmem>>, vector<8x1xf32>
    %380 = vector.broadcast %379 : vector<8x1xf32> to vector<8x256xf32>
    %381 = arith.addf %378, %380 : vector<8x256xf32>
    %382 = arith.addf %373, %381 : vector<8x256xf32>
    %cst_177 = arith.constant 0.000000e+00 : f32
    %383 = vector.broadcast %cst_177 : f32 to vector<8x256xf32>
    %384 = arith.maximumf %382, %383 : vector<8x256xf32>
    %385 = arith.negf %384 : vector<8x256xf32>
    %386 = math.exp %385 : vector<8x256xf32>
    %cst_178 = arith.constant 1.000000e+00 : f32
    %387 = vector.broadcast %cst_178 : f32 to vector<8x256xf32>
    %388 = arith.addf %387, %386 : vector<8x256xf32>
    %389 = arith.divf %387, %388 : vector<8x256xf32>
    %390 = arith.mulf %136, %389 : vector<8x256xf32>
    %391 = arith.addf %390, %136 : vector<8x256xf32>
    %cst_179 = arith.constant 0.000000e+00 : f32
    %392 = vector.broadcast %cst_179 : f32 to vector<8x256xf32>
    %393 = arith.maximumf %391, %392 : vector<8x256xf32>
    %394 = vector.extract_strided_slice %393 {offsets = [0, 0], sizes = [8, 128], strides = [1, 1]} : vector<8x256xf32> to vector<8x128xf32>
    %c0_180 = arith.constant 0 : index
    %c0_181 = arith.constant 0 : index
    %c0_182 = arith.constant 0 : index
    %395 = vector.load %arg26[%c0_180, %c0_181, %c0_182] : memref<2x8x128xf32, #tpu.memory_space<vmem>>, vector<1x8x128xf32>
    %396 = vector.shape_cast %395 : vector<1x8x128xf32> to vector<8x128xf32>
    %397 = vector.shape_cast %394 : vector<8x128xf32> to vector<1x8x128xf32>
    tpu.vector_store %arg26[%c0_180, %c0_181, %c0_182], %397 {strides = array<i32>} : memref<2x8x128xf32, #tpu.memory_space<vmem>>, vector<1x8x128xf32>,
    %398 = vector.extract_strided_slice %393 {offsets = [0, 128], sizes = [8, 128], strides = [1, 1]} : vector<8x256xf32> to vector<8x128xf32>
    %c1_183 = arith.constant 1 : index
    %c0_184 = arith.constant 0 : index
    %c0_185 = arith.constant 0 : index
    %399 = vector.load %arg26[%c1_183, %c0_184, %c0_185] : memref<2x8x128xf32, #tpu.memory_space<vmem>>, vector<1x8x128xf32>
    %400 = vector.shape_cast %399 : vector<1x8x128xf32> to vector<8x128xf32>
    %401 = vector.shape_cast %398 : vector<8x128xf32> to vector<1x8x128xf32>
    tpu.vector_store %arg26[%c1_183, %c0_184, %c0_185], %401 {strides = array<i32>} : memref<2x8x128xf32, #tpu.memory_space<vmem>>, vector<1x8x128xf32>,
    return
  }
  func.func @transform_0(%arg0: i32) -> (i32, i32, i32) {
    %c0_i32 = arith.constant 0 : i32
    %c0_i32_0 = arith.constant 0 : i32
    %c0_i32_1 = arith.constant 0 : i32
    return %arg0, %c0_i32, %c0_i32_0 : i32, i32, i32
  }
  func.func @transform_1(%arg0: i32) -> (i32, i32, i32) {
    %c0_i32 = arith.constant 0 : i32
    %c0_i32_0 = arith.constant 0 : i32
    %c0_i32_1 = arith.constant 0 : i32
    %c0_i32_2 = arith.constant 0 : i32
    return %c0_i32, %c0_i32_0, %c0_i32_1 : i32, i32, i32
  }
  func.func @transform_2(%arg0: i32) -> (i32, i32) {
    %c0_i32 = arith.constant 0 : i32
    %c0_i32_0 = arith.constant 0 : i32
    %c0_i32_1 = arith.constant 0 : i32
    return %c0_i32, %c0_i32_0 : i32, i32
  }
  func.func @transform_3(%arg0: i32) -> (i32, i32, i32) {
    %c0_i32 = arith.constant 0 : i32
    %c0_i32_0 = arith.constant 0 : i32
    %c0_i32_1 = arith.constant 0 : i32
    %c0_i32_2 = arith.constant 0 : i32
    return %c0_i32, %c0_i32_0, %c0_i32_1 : i32, i32, i32
  }
  func.func @transform_4(%arg0: i32) -> (i32, i32) {
    %c0_i32 = arith.constant 0 : i32
    %c0_i32_0 = arith.constant 0 : i32
    %c0_i32_1 = arith.constant 0 : i32
    return %c0_i32, %c0_i32_0 : i32, i32
  }
  func.func @transform_5(%arg0: i32) -> (i32, i32, i32) {
    %c0_i32 = arith.constant 0 : i32
    %c0_i32_0 = arith.constant 0 : i32
    %c0_i32_1 = arith.constant 0 : i32
    %c0_i32_2 = arith.constant 0 : i32
    return %c0_i32, %c0_i32_0, %c0_i32_1 : i32, i32, i32
  }
  func.func @transform_6(%arg0: i32) -> (i32, i32) {
    %c0_i32 = arith.constant 0 : i32
    %c0_i32_0 = arith.constant 0 : i32
    %c0_i32_1 = arith.constant 0 : i32
    return %c0_i32, %c0_i32_0 : i32, i32
  }
  func.func @transform_7(%arg0: i32) -> (i32, i32, i32) {
    %c0_i32 = arith.constant 0 : i32
    %c0_i32_0 = arith.constant 0 : i32
    %c0_i32_1 = arith.constant 0 : i32
    %c0_i32_2 = arith.constant 0 : i32
    return %c0_i32, %c0_i32_0, %c0_i32_1 : i32, i32, i32
  }
  func.func @transform_8(%arg0: i32) -> (i32, i32) {
    %c0_i32 = arith.constant 0 : i32
    %c0_i32_0 = arith.constant 0 : i32
    %c0_i32_1 = arith.constant 0 : i32
    return %c0_i32, %c0_i32_0 : i32, i32
  }
  func.func @transform_9(%arg0: i32) -> (i32, i32, i32) {
    %c0_i32 = arith.constant 0 : i32
    %c0_i32_0 = arith.constant 0 : i32
    %c0_i32_1 = arith.constant 0 : i32
    %c0_i32_2 = arith.constant 0 : i32
    return %c0_i32, %c0_i32_0, %c0_i32_1 : i32, i32, i32
  }
  func.func @transform_10(%arg0: i32) -> (i32, i32) {
    %c0_i32 = arith.constant 0 : i32
    %c0_i32_0 = arith.constant 0 : i32
    %c0_i32_1 = arith.constant 0 : i32
    return %c0_i32, %c0_i32_0 : i32, i32
  }
  func.func @transform_11(%arg0: i32) -> (i32, i32, i32) {
    %c0_i32 = arith.constant 0 : i32
    %c0_i32_0 = arith.constant 0 : i32
    %c0_i32_1 = arith.constant 0 : i32
    %c0_i32_2 = arith.constant 0 : i32
    return %c0_i32, %c0_i32_0, %c0_i32_1 : i32, i32, i32
  }
  func.func @transform_12(%arg0: i32) -> (i32, i32) {
    %c0_i32 = arith.constant 0 : i32
    %c0_i32_0 = arith.constant 0 : i32
    %c0_i32_1 = arith.constant 0 : i32
    return %c0_i32, %c0_i32_0 : i32, i32
  }
  func.func @transform_13(%arg0: i32) -> (i32, i32, i32) {
    %c0_i32 = arith.constant 0 : i32
    %c0_i32_0 = arith.constant 0 : i32
    %c0_i32_1 = arith.constant 0 : i32
    %c0_i32_2 = arith.constant 0 : i32
    return %c0_i32, %c0_i32_0, %c0_i32_1 : i32, i32, i32
  }
  func.func @transform_14(%arg0: i32) -> (i32, i32) {
    %c0_i32 = arith.constant 0 : i32
    %c0_i32_0 = arith.constant 0 : i32
    %c0_i32_1 = arith.constant 0 : i32
    return %c0_i32, %c0_i32_0 : i32, i32
  }
  func.func @transform_15(%arg0: i32) -> (i32, i32, i32) {
    %c0_i32 = arith.constant 0 : i32
    %c0_i32_0 = arith.constant 0 : i32
    %c0_i32_1 = arith.constant 0 : i32
    %c0_i32_2 = arith.constant 0 : i32
    return %c0_i32, %c0_i32_0, %c0_i32_1 : i32, i32, i32
  }
  func.func @transform_16(%arg0: i32) -> (i32, i32) {
    %c0_i32 = arith.constant 0 : i32
    %c0_i32_0 = arith.constant 0 : i32
    %c0_i32_1 = arith.constant 0 : i32
    return %c0_i32, %c0_i32_0 : i32, i32
  }
  func.func @transform_17(%arg0: i32) -> (i32, i32, i32) {
    %c0_i32 = arith.constant 0 : i32
    %c0_i32_0 = arith.constant 0 : i32
    %c0_i32_1 = arith.constant 0 : i32
    %c0_i32_2 = arith.constant 0 : i32
    return %c0_i32, %c0_i32_0, %c0_i32_1 : i32, i32, i32
  }
  func.func @transform_18(%arg0: i32) -> (i32, i32) {
    %c0_i32 = arith.constant 0 : i32
    %c0_i32_0 = arith.constant 0 : i32
    %c0_i32_1 = arith.constant 0 : i32
    return %c0_i32, %c0_i32_0 : i32, i32
  }
  func.func @transform_19(%arg0: i32) -> (i32, i32, i32) {
    %c0_i32 = arith.constant 0 : i32
    %c0_i32_0 = arith.constant 0 : i32
    %c0_i32_1 = arith.constant 0 : i32
    %c0_i32_2 = arith.constant 0 : i32
    return %c0_i32, %c0_i32_0, %c0_i32_1 : i32, i32, i32
  }
  func.func @transform_20(%arg0: i32) -> (i32, i32) {
    %c0_i32 = arith.constant 0 : i32
    %c0_i32_0 = arith.constant 0 : i32
    %c0_i32_1 = arith.constant 0 : i32
    return %c0_i32, %c0_i32_0 : i32, i32
  }
  func.func @transform_21(%arg0: i32) -> (i32, i32, i32) {
    %c0_i32 = arith.constant 0 : i32
    %c0_i32_0 = arith.constant 0 : i32
    %c0_i32_1 = arith.constant 0 : i32
    %c0_i32_2 = arith.constant 0 : i32
    return %c0_i32, %c0_i32_0, %c0_i32_1 : i32, i32, i32
  }
  func.func @transform_22(%arg0: i32) -> (i32, i32) {
    %c0_i32 = arith.constant 0 : i32
    %c0_i32_0 = arith.constant 0 : i32
    %c0_i32_1 = arith.constant 0 : i32
    return %c0_i32, %c0_i32_0 : i32, i32
  }
  func.func @transform_23(%arg0: i32) -> (i32, i32, i32) {
    %c0_i32 = arith.constant 0 : i32
    %c0_i32_0 = arith.constant 0 : i32
    %c0_i32_1 = arith.constant 0 : i32
    %c0_i32_2 = arith.constant 0 : i32
    return %c0_i32, %c0_i32_0, %c0_i32_1 : i32, i32, i32
  }
  func.func @transform_24(%arg0: i32) -> (i32, i32) {
    %c0_i32 = arith.constant 0 : i32
    %c0_i32_0 = arith.constant 0 : i32
    %c0_i32_1 = arith.constant 0 : i32
    return %c0_i32, %c0_i32_0 : i32, i32
  }
  func.func @transform_25(%arg0: i32) -> (i32, i32, i32) {
    %c0_i32 = arith.constant 0 : i32
    %c0_i32_0 = arith.constant 0 : i32
    %c0_i32_1 = arith.constant 0 : i32
    return %arg0, %c0_i32, %c0_i32_0 : i32, i32, i32
  }
}

</mosaic_0001>

<bundles_post_ra>
// kernel: fasam_forward.1
= control target key start
LH: loop header
LB: loop body
LE: loop exit
PB: predicated region body
PF: predicated region fallthrough
CT: control target
= control target key end

     0   :  { %s6436_s0 = inlined_call_operand.hbm [shape: f32[2,4,128], index: 0, kind: input, shape index: {}]   ;;  %s6437_s1 = inlined_call_operand.hbm [shape: f32[7,8,4], index: 1, kind: input, shape index: {}]   ;;  %s6438_s2 = inlined_call_operand.hbm [shape: f32[8,1], index: 2, kind: input, shape index: {}]   ;;  %s6439_s3 = inlined_call_operand.hbm [shape: f32[5,8,8], index: 3, kind: input, shape index: {}]   ;;  %s6440_s4 = inlined_call_operand.hbm [shape: f32[8,1], index: 4, kind: input, shape index: {}]   ;;  %s6441_s5 = inlined_call_operand.hbm [shape: f32[3,8,8], index: 5, kind: input, shape index: {}]   ;;  %s6442_s6 = inlined_call_operand.hbm [shape: f32[8,1], index: 6, kind: input, shape index: {}]   ;;  %s6443_s7 = inlined_call_operand.hbm [shape: f32[1,8,4], index: 7, kind: input, shape index: {}]   ;;  %s6444_s8 = inlined_call_operand.hbm [shape: f32[8,1], index: 8, kind: input, shape index: {}]   ;;  %s6445_s9 = inlined_call_operand.hbm [shape: f32[7,8,4], index: 9, kind: input, shape index: {}]   ;;  %s6446_s10 = inlined_call_operand.hbm [shape: f32[8,1], index: 10, kind: input, shape index: {}]   ;;  %s6447_s11 = inlined_call_operand.hbm [shape: f32[5,8,8], index: 11, kind: input, shape index: {}]   ;;  %s6448_s12 = inlined_call_operand.hbm [shape: f32[8,1], index: 12, kind: input, shape index: {}]   ;;  %s6449_s13 = inlined_call_operand.hbm [shape: f32[3,8,8], index: 13, kind: input, shape index: {}]   ;;  %s6450_s14 = inlined_call_operand.hbm [shape: f32[8,1], index: 14, kind: input, shape index: {}]   ;;  %s6451_s15 = inlined_call_operand.hbm [shape: f32[1,8,4], index: 15, kind: input, shape index: {}]   ;;  %s6452_s16 = inlined_call_operand.hbm [shape: f32[8,1], index: 16, kind: input, shape index: {}]   ;;  %s6453_s17 = inlined_call_operand.hbm [shape: f32[7,8,8], index: 17, kind: input, shape index: {}]   ;;  %s6454_s18 = inlined_call_operand.hbm [shape: f32[8,1], index: 18, kind: input, shape index: {}]   ;;  %s6455_s19 = inlined_call_operand.hbm [shape: f32[5,8,8], index: 19, kind: input, shape index: {}]   ;;  %s6456_s20 = inlined_call_operand.hbm [shape: f32[8,1], index: 20, kind: input, shape index: {}]   ;;  %s6457_s21 = inlined_call_operand.hbm [shape: f32[3,8,8], index: 21, kind: input, shape index: {}]   ;;  %s6458_s22 = inlined_call_operand.hbm [shape: f32[8,1], index: 22, kind: input, shape index: {}]   ;;  %s6459_s23 = inlined_call_operand.hbm [shape: f32[1,8,8], index: 23, kind: input, shape index: {}]   ;;  %s6460_s24 = inlined_call_operand.hbm [shape: f32[8,1], index: 24, kind: input, shape index: {}]   ;;  %s6461_s25 = inlined_call_operand.hbm [shape: f32[2,8,128], index: 25, kind: output, shape index: {}]  }
   0x1   :  { %6475 = sst [smem:[#allocation56_spill]] %s6436_s0 }
   0x2   :  { %6476 = sst [smem:[#allocation57_spill]] %s6437_s1 }
   0x3   :  { %6477 = sst [smem:[#allocation58_spill]] %s6438_s2 }
   0x4   :  { %6478 = sst [smem:[#allocation59_spill]] %s6439_s3 }
   0x5   :  { %6479 = sst [smem:[#allocation60_spill]] %s6440_s4 }
   0x6   :  { %6480 = sst [smem:[#allocation61_spill]] %s6441_s5 }
   0x7   :  { %6481 = sst [smem:[#allocation62_spill]] %s6442_s6 }
   0x8   :  { %6482 = sst [smem:[#allocation63_spill]] %s6443_s7 }
   0x9   :  { %6483 = sst [smem:[#allocation64_spill]] %s6444_s8 }
   0xa   :  { %6484 = sst [smem:[#allocation65_spill]] %s6445_s9 }
   0xb   :  { %6485 = sst [smem:[#allocation66_spill]] %s6458_s22 }
   0xc   :  { %6486 = sst [smem:[#allocation67_spill]] %s6460_s24 }
   0xd   :  { %6487 = sst [smem:[#allocation68_spill]] %s6461_s25 }
   0xe   :  { %30 = vsyncpa [#allocation3], 0 }
   0xf   :  { %31 = vsyncpa [#allocation6], 0 }
  0x10   :  { %32 = vsyncpa [#allocation9], 0 }
  0x11   :  { %33 = vsyncpa [#allocation12], 0 }
  0x12   :  { %34 = vsyncpa [#allocation15], 0 }
  0x13   :  { %35 = vsyncpa [#allocation18], 0 }
  0x14   :  { %36 = vsyncpa [#allocation21], 0 }
  0x15   :  { %37 = vsyncpa [#allocation24], 0 }
  0x16   :  { %38 = vsyncpa [#allocation27], 0 }
  0x17   :  { %39 = vsyncpa [#allocation30], 0 }
  0x18   :  { %40 = vsyncpa [#allocation33], 0 }
  0x19   :  { %41 = vsyncpa [#allocation36], 0 }
  0x1a   :  { %42 = vsyncpa [#allocation39], 0 }
  0x1b   :  { %43 = vsyncpa [#allocation4], 0  ;;  %s5447_s29 = smov [#allocation5]   ;;  %s6488_s7 = sld [smem:[#allocation57_spill]] }
  0x1c   :  { %s61_s2 = sshll.u32 %s5447_s29, 4  ;;  %s62_s2 = int_to_ptr.vmem [resolvable:$true] %s61_s2 }
  0x21   :  { %s4847_s3 = scalar_lea.hbm %s6488_s7, 896 }
  0x22   :  { %p4848_p0 = scmp.ne.s32.totalorder %s6488_s7, %s4847_s3  ;;  %p4851_p1 = scmp.lt.u32.totalorder %s4847_s3, %s6488_s7 }
  0x24   :  { %p4853_p2 = pnand %p4851_p1, %p4848_p0 }
  0x26   :  { %4856 = shalt.err (!%p4853_p2)
}
  0x27   :  { %s4857_s4 = scalar_lea.vmem %s62_s2, 896  ;;  %p4862_p4 = scmp.lt.s32.totalorder %s62_s2, %s62_s2 }
  0x28   :  { %p4858_p3 = scmp.ne.s32.totalorder %s62_s2, %s4857_s4  ;;  %p4863_p5 = scmp.lt.s32.totalorder %s4857_s4, %s4857_s4 }
  0x2a   :  { %p4864_p6 = por %p4863_p5, %p4862_p4 }
  0x2c   :  { %p4865_p7 = pnand %p4864_p6, %p4858_p3 }
  0x2e   :  { %4868 = shalt.err (!%p4865_p7)
}
  0x2f   :  { %s5448_s28 = smov 128   ;;  %s5449_s9 = smov 8  }
  0x30   :  { %67 = dma.hbm_to_vmem [thread:$0]  %s6488_s7, 896, %s62_s2, [#allocation6], %s5448_s28, %s5448_s28, %s5449_s9  }
  0x31   :  { %s5450_s29 = smov [#allocation8]   ;;  %s5451_s30 = smov [#allocation11]  }
  0x32   :  { %s83_s6 = sshll.u32 %s5450_s29, 4  ;;  %s105_s3 = sshll.u32 %s5451_s30, 4  ;;  %s84_s6 = int_to_ptr.vmem [resolvable:$true] %s83_s6  ;;  %s106_s3 = int_to_ptr.vmem [resolvable:$true] %s105_s3 }
  0x33   :  { %s6489_s8 = sld [smem:[#allocation59_spill]] }
  0x39   :  { %s4869_s27 = scalar_lea.hbm %s6489_s8, 640 }
  0x3a   :  { %p4870_p8 = scmp.ne.s32.totalorder %s6489_s8, %s4869_s27  ;;  %p4873_p9 = scmp.lt.u32.totalorder %s4869_s27, %s6489_s8 }
  0x3c   :  { %p4875_p10 = pnand %p4873_p9, %p4870_p8 }
  0x3e   :  { %4878 = shalt.err (!%p4875_p10)
}
  0x3f   :  { %s4879_s2 = scalar_lea.vmem %s84_s6, 640  ;;  %p4884_p12 = scmp.lt.s32.totalorder %s84_s6, %s84_s6 }
  0x40   :  { %p4880_p11 = scmp.ne.s32.totalorder %s84_s6, %s4879_s2  ;;  %p4885_p13 = scmp.lt.s32.totalorder %s4879_s2, %s4879_s2 }
  0x42   :  { %p4886_p0 = por %p4885_p13, %p4884_p12 }
  0x44   :  { %p4887_p1 = pnand %p4886_p0, %p4880_p11 }
  0x46   :  { %4890 = shalt.err (!%p4887_p1)
}
  0x47   :  { %89 = dma.hbm_to_vmem [thread:$0]  %s6489_s8, 640, %s84_s6, [#allocation9], %s5448_s28, %s5448_s28, %s5449_s9  }
  0x48   :  { %s6490_s24 = sld [smem:[#allocation61_spill]] }
  0x4e   :  { %s4891_s0 = scalar_lea.hbm %s6490_s24, 384 }
  0x4f   :  { %p4892_p2 = scmp.ne.s32.totalorder %s6490_s24, %s4891_s0  ;;  %p4895_p3 = scmp.lt.u32.totalorder %s4891_s0, %s6490_s24 }
  0x51   :  { %p4897_p4 = pnand %p4895_p3, %p4892_p2 }
  0x53   :  { %4900 = shalt.err (!%p4897_p4)
}
  0x54   :  { %s4901_s27 = scalar_lea.vmem %s106_s3, 384  ;;  %p4906_p6 = scmp.lt.s32.totalorder %s106_s3, %s106_s3 }
  0x55   :  { %p4902_p5 = scmp.ne.s32.totalorder %s106_s3, %s4901_s27  ;;  %p4907_p7 = scmp.lt.s32.totalorder %s4901_s27, %s4901_s27 }
  0x57   :  { %p4908_p8 = por %p4907_p7, %p4906_p6 }
  0x59   :  { %p4909_p9 = pnand %p4908_p8, %p4902_p5 }
  0x5b   :  { %4912 = shalt.err (!%p4909_p9)
}
  0x5c   :  { %111 = dma.hbm_to_vmem [thread:$0]  %s6490_s24, 384, %s106_s3, [#allocation12], %s5448_s28, %s5448_s28, %s5449_s9  }
  0x5d   :  { %s5452_s4 = smov [#allocation14]   ;;  %s5453_s7 = smov [#allocation17]  }
  0x5e   :  { %s128_s2 = sshll.u32 %s5452_s4, 4  ;;  %s147_s5 = sshll.u32 %s5453_s7, 4  ;;  %s129_s2 = int_to_ptr.vmem [resolvable:$true] %s128_s2  ;;  %s148_s5 = int_to_ptr.vmem [resolvable:$true] %s147_s5 }
  0x5f   :  { %s6491_s0 = sld [smem:[#allocation63_spill]] }
  0x65   :  { %s4913_s29 = scalar_lea.hbm %s6491_s0, 128 }
  0x66   :  { %p4914_p10 = scmp.ne.s32.totalorder %s6491_s0, %s4913_s29  ;;  %p4917_p11 = scmp.lt.u32.totalorder %s4913_s29, %s6491_s0 }
  0x68   :  { %p4919_p12 = pnand %p4917_p11, %p4914_p10 }
  0x6a   :  { %4922 = shalt.err (!%p4919_p12)
}
  0x6b   :  { %s4923_s3 = scalar_lea.vmem %s129_s2, 128  ;;  %p4928_p0 = scmp.lt.s32.totalorder %s129_s2, %s129_s2 }
  0x6c   :  { %p4924_p13 = scmp.ne.s32.totalorder %s129_s2, %s4923_s3  ;;  %p4929_p1 = scmp.lt.s32.totalorder %s4923_s3, %s4923_s3 }
  0x6e   :  { %p4930_p2 = por %p4929_p1, %p4928_p0 }
  0x70   :  { %p4931_p3 = pnand %p4930_p2, %p4924_p13 }
  0x72   :  { %4934 = shalt.err (!%p4931_p3)
}
  0x73   :  { %131 = dma.hbm_to_vmem [thread:$0]  %s6491_s0, 128, %s129_s2, [#allocation15]  }
  0x74   :  { %s6492_s7 = sld [smem:[#allocation65_spill]] }
  0x7a   :  { %s4935_s25 = scalar_lea.hbm %s6492_s7, 896 }
  0x7b   :  { %p4936_p4 = scmp.ne.s32.totalorder %s6492_s7, %s4935_s25  ;;  %p4939_p5 = scmp.lt.u32.totalorder %s4935_s25, %s6492_s7 }
  0x7d   :  { %p4941_p6 = pnand %p4939_p5, %p4936_p4 }
  0x7f   :  { %4944 = shalt.err (!%p4941_p6)
}
  0x80   :  { %s4945_s1 = scalar_lea.vmem %s148_s5, 896  ;;  %p4950_p8 = scmp.lt.s32.totalorder %s148_s5, %s148_s5 }
  0x81   :  { %p4946_p7 = scmp.ne.s32.totalorder %s148_s5, %s4945_s1  ;;  %p4951_p9 = scmp.lt.s32.totalorder %s4945_s1, %s4945_s1 }
  0x83   :  { %p4952_p10 = por %p4951_p9, %p4950_p8 }
  0x85   :  { %p4953_p11 = pnand %p4952_p10, %p4946_p7 }
  0x87   :  { %4956 = shalt.err (!%p4953_p11)
}
  0x88   :  { %153 = dma.hbm_to_vmem [thread:$0]  %s6492_s7, 896, %s148_s5, [#allocation18], %s5448_s28, %s5448_s28, %s5449_s9  }
  0x89   :  { %s5454_s27 = smov [#allocation20]   ;;  %s5455_s24 = smov [#allocation23]  }
  0x8a   :  { %s169_s3 = sshll.u32 %s5454_s27, 4  ;;  %s191_s6 = sshll.u32 %s5455_s24, 4  ;;  %s170_s3 = int_to_ptr.vmem [resolvable:$true] %s169_s3  ;;  %s192_s6 = int_to_ptr.vmem [resolvable:$true] %s191_s6 }
  0x8b   :  { %s4957_s25 = scalar_lea.hbm %s6447_s11, 640 }
  0x8c   :  { %p4958_p12 = scmp.ne.s32.totalorder %s6447_s11, %s4957_s25  ;;  %p4961_p13 = scmp.lt.u32.totalorder %s4957_s25, %s6447_s11 }
  0x8e   :  { %p4963_p0 = pnand %p4961_p13, %p4958_p12 }
  0x90   :  { %4966 = shalt.err (!%p4963_p0)
}
  0x91   :  { %s4967_s5 = scalar_lea.vmem %s170_s3, 640  ;;  %p4972_p2 = scmp.lt.s32.totalorder %s170_s3, %s170_s3 }
  0x92   :  { %p4968_p1 = scmp.ne.s32.totalorder %s170_s3, %s4967_s5  ;;  %p4973_p3 = scmp.lt.s32.totalorder %s4967_s5, %s4967_s5 }
  0x94   :  { %p4974_p4 = por %p4973_p3, %p4972_p2 }
  0x96   :  { %p4975_p5 = pnand %p4974_p4, %p4968_p1 }
  0x98   :  { %4978 = shalt.err (!%p4975_p5)
}
  0x99   :  { %175 = dma.hbm_to_vmem [thread:$0]  %s6447_s11, 640, %s170_s3, [#allocation21], %s5448_s28, %s5448_s28, %s5449_s9  }
  0x9a   :  { %s4979_s27 = scalar_lea.hbm %s6449_s13, 384 }
  0x9b   :  { %p4980_p6 = scmp.ne.s32.totalorder %s6449_s13, %s4979_s27  ;;  %p4983_p7 = scmp.lt.u32.totalorder %s4979_s27, %s6449_s13 }
  0x9d   :  { %p4985_p8 = pnand %p4983_p7, %p4980_p6 }
  0x9f   :  { %4988 = shalt.err (!%p4985_p8)
}
  0xa0   :  { %s4989_s22 = scalar_lea.vmem %s192_s6, 384  ;;  %p4994_p10 = scmp.lt.s32.totalorder %s192_s6, %s192_s6 }
  0xa1   :  { %p4990_p9 = scmp.ne.s32.totalorder %s192_s6, %s4989_s22  ;;  %p4995_p11 = scmp.lt.s32.totalorder %s4989_s22, %s4989_s22 }
  0xa3   :  { %p4996_p12 = por %p4995_p11, %p4994_p10 }
  0xa5   :  { %p4997_p13 = pnand %p4996_p12, %p4990_p9 }
  0xa7   :  { %5000 = shalt.err (!%p4997_p13)
}
  0xa8   :  { %197 = dma.hbm_to_vmem [thread:$0]  %s6449_s13, 384, %s192_s6, [#allocation24], %s5448_s28, %s5448_s28, %s5449_s9  }
  0xa9   :  { %s5456_s29 = smov [#allocation26]   ;;  %s5457_s26 = smov [#allocation29]  }
  0xaa   :  { %s214_s30 = sshll.u32 %s5456_s29, 4  ;;  %s233_s5 = sshll.u32 %s5457_s26, 4  ;;  %s215_s30 = int_to_ptr.vmem [resolvable:$true] %s214_s30  ;;  %s234_s5 = int_to_ptr.vmem [resolvable:$true] %s233_s5 }
  0xab   :  { %s5001_s2 = scalar_lea.hbm %s6451_s15, 128 }
  0xac   :  { %p5002_p0 = scmp.ne.s32.totalorder %s6451_s15, %s5001_s2  ;;  %p5005_p1 = scmp.lt.u32.totalorder %s5001_s2, %s6451_s15 }
  0xae   :  { %p5007_p2 = pnand %p5005_p1, %p5002_p0 }
  0xb0   :  { %5010 = shalt.err (!%p5007_p2)
}
  0xb1   :  { %s5011_s13 = scalar_lea.vmem %s215_s30, 128  ;;  %p5016_p4 = scmp.lt.s32.totalorder %s215_s30, %s215_s30 }
  0xb2   :  { %p5012_p3 = scmp.ne.s32.totalorder %s215_s30, %s5011_s13  ;;  %p5017_p5 = scmp.lt.s32.totalorder %s5011_s13, %s5011_s13 }
  0xb4   :  { %p5018_p6 = por %p5017_p5, %p5016_p4 }
  0xb6   :  { %p5019_p7 = pnand %p5018_p6, %p5012_p3 }
  0xb8   :  { %5022 = shalt.err (!%p5019_p7)
}
  0xb9   :  { %217 = dma.hbm_to_vmem [thread:$0]  %s6451_s15, 128, %s215_s30, [#allocation27]  }
  0xba   :  { %s5023_s11 = scalar_lea.hbm %s6453_s17, 896 }
  0xbb   :  { %p5024_p8 = scmp.ne.s32.totalorder %s6453_s17, %s5023_s11  ;;  %p5027_p9 = scmp.lt.u32.totalorder %s5023_s11, %s6453_s17 }
  0xbd   :  { %p5029_p10 = pnand %p5027_p9, %p5024_p8 }
  0xbf   :  { %5032 = shalt.err (!%p5029_p10)
}
  0xc0   :  { %s5033_s1 = scalar_lea.vmem %s234_s5, 896  ;;  %p5038_p12 = scmp.lt.s32.totalorder %s234_s5, %s234_s5 }
  0xc1   :  { %p5034_p11 = scmp.ne.s32.totalorder %s234_s5, %s5033_s1  ;;  %p5039_p13 = scmp.lt.s32.totalorder %s5033_s1, %s5033_s1 }
  0xc3   :  { %p5040_p0 = por %p5039_p13, %p5038_p12 }
  0xc5   :  { %p5041_p1 = pnand %p5040_p0, %p5034_p11 }
  0xc7   :  { %5044 = shalt.err (!%p5041_p1)
}
  0xc8   :  { %239 = dma.hbm_to_vmem [thread:$0]  %s6453_s17, 896, %s234_s5, [#allocation30], %s5448_s28, %s5448_s28, %s5449_s9  }
  0xc9   :  { %s5458_s2 = smov [#allocation32]   ;;  %s5459_s27 = smov [#allocation35]  }
  0xca   :  { %s255_s0 = sshll.u32 %s5458_s2, 4  ;;  %s277_s24 = sshll.u32 %s5459_s27, 4  ;;  %s256_s0 = int_to_ptr.vmem [resolvable:$true] %s255_s0  ;;  %s278_s24 = int_to_ptr.vmem [resolvable:$true] %s277_s24 }
  0xcb   :  { %s5045_s6 = scalar_lea.hbm %s6455_s19, 640 }
  0xcc   :  { %p5046_p2 = scmp.ne.s32.totalorder %s6455_s19, %s5045_s6  ;;  %p5049_p3 = scmp.lt.u32.totalorder %s5045_s6, %s6455_s19 }
  0xce   :  { %p5051_p4 = pnand %p5049_p3, %p5046_p2 }
  0xd0   :  { %5054 = shalt.err (!%p5051_p4)
}
  0xd1   :  { %s5055_s17 = scalar_lea.vmem %s256_s0, 640  ;;  %p5060_p6 = scmp.lt.s32.totalorder %s256_s0, %s256_s0 }
  0xd2   :  { %p5056_p5 = scmp.ne.s32.totalorder %s256_s0, %s5055_s17  ;;  %p5061_p7 = scmp.lt.s32.totalorder %s5055_s17, %s5055_s17 }
  0xd4   :  { %p5062_p8 = por %p5061_p7, %p5060_p6 }
  0xd6   :  { %p5063_p9 = pnand %p5062_p8, %p5056_p5 }
  0xd8   :  { %5066 = shalt.err (!%p5063_p9)
}
  0xd9   :  { %261 = dma.hbm_to_vmem [thread:$0]  %s6455_s19, 640, %s256_s0, [#allocation33], %s5448_s28, %s5448_s28, %s5449_s9  }
  0xda   :  { %s5067_s7 = scalar_lea.hbm %s6457_s21, 384 }
  0xdb   :  { %p5068_p10 = scmp.ne.s32.totalorder %s6457_s21, %s5067_s7  ;;  %p5071_p11 = scmp.lt.u32.totalorder %s5067_s7, %s6457_s21 }
  0xdd   :  { %p5073_p12 = pnand %p5071_p11, %p5068_p10 }
  0xdf   :  { %5076 = shalt.err (!%p5073_p12)
}
  0xe0   :  { %s5077_s27 = scalar_lea.vmem %s278_s24, 384  ;;  %p5082_p0 = scmp.lt.s32.totalorder %s278_s24, %s278_s24 }
  0xe1   :  { %p5078_p13 = scmp.ne.s32.totalorder %s278_s24, %s5077_s27  ;;  %p5083_p1 = scmp.lt.s32.totalorder %s5077_s27, %s5077_s27 }
  0xe3   :  { %p5084_p2 = por %p5083_p1, %p5082_p0 }
  0xe5   :  { %p5085_p3 = pnand %p5084_p2, %p5078_p13 }
  0xe7   :  { %5088 = shalt.err (!%p5085_p3)
}
  0xe8   :  { %283 = dma.hbm_to_vmem [thread:$0]  %s6457_s21, 384, %s278_s24, [#allocation36], %s5448_s28, %s5448_s28, %s5449_s9  }
  0xe9   :  { %s5460_s8 = smov [#allocation38]   ;;  %s5461_s6 = smov [#allocation2]  }
  0xea   :  { %s300_s13 = sshll.u32 %s5460_s8, 4  ;;  %s49_s4 = sshll.u32 %s5461_s6, 4  ;;  %s301_s13 = int_to_ptr.vmem [resolvable:$true] %s300_s13  ;;  %s50_s4 = int_to_ptr.vmem [resolvable:$true] %s49_s4 }
  0xeb   :  { %s5089_s11 = scalar_lea.hbm %s6459_s23, 128 }
  0xec   :  { %p5090_p4 = scmp.ne.s32.totalorder %s6459_s23, %s5089_s11  ;;  %p5093_p5 = scmp.lt.u32.totalorder %s5089_s11, %s6459_s23 }
  0xee   :  { %p5095_p6 = pnand %p5093_p5, %p5090_p4 }
  0xf0   :  { %5098 = shalt.err (!%p5095_p6)
}
  0xf1   :  { %s5099_s21 = scalar_lea.vmem %s301_s13, 128  ;;  %p5104_p8 = scmp.lt.s32.totalorder %s301_s13, %s301_s13 }
  0xf2   :  { %p5100_p7 = scmp.ne.s32.totalorder %s301_s13, %s5099_s21  ;;  %p5105_p9 = scmp.lt.s32.totalorder %s5099_s21, %s5099_s21 }
  0xf4   :  { %p5106_p10 = por %p5105_p9, %p5104_p8 }
  0xf6   :  { %p5107_p11 = pnand %p5106_p10, %p5100_p7 }
  0xf8   :  { %5110 = shalt.err (!%p5107_p11)
}
  0xf9   :  { %303 = dma.hbm_to_vmem [thread:$0]  %s6459_s23, 128, %s301_s13, [#allocation39]  }
  0xfa   :  { %s6493_s15 = sld [smem:[#allocation56_spill]] }
 0x100   :  { %s5111_s30 = scalar_lea.hbm %s6493_s15, 128 }
 0x101   :  { %p5112_p12 = scmp.ne.s32.totalorder %s6493_s15, %s5111_s30  ;;  %p5115_p13 = scmp.lt.u32.totalorder %s5111_s30, %s6493_s15 }
 0x103   :  { %p5117_p0 = pnand %p5115_p13, %p5112_p12 }
 0x105   :  { %5120 = shalt.err (!%p5117_p0)
}
 0x106   :  { %s5121_s8 = scalar_lea.vmem %s50_s4, 128  ;;  %p5126_p2 = scmp.lt.s32.totalorder %s50_s4, %s50_s4 }
 0x107   :  { %p5122_p1 = scmp.ne.s32.totalorder %s50_s4, %s5121_s8  ;;  %p5127_p3 = scmp.lt.s32.totalorder %s5121_s8, %s5121_s8 }
 0x109   :  { %p5128_p4 = por %p5127_p3, %p5126_p2 }
 0x10b   :  { %p5129_p5 = pnand %p5128_p4, %p5122_p1 }
 0x10d   :  { %5132 = shalt.err (!%p5129_p5)
}
 0x10e   :  { %s5462_s23 = smov 64   ;;  %s5463_s13 = smov 4  }
 0x10f   :  { %55 = dma.hbm_to_vmem [thread:$0]  %s6493_s15, 128, %s50_s4, [#allocation3], %s5462_s23, %s5462_s23, %s5463_s13  }
 0x110   :  { %s5464_s22 = smov [#allocation7]   ;;  %s5465_s17 = smov [#allocation10]  }
 0x111   :  { %s74_s11 = sshll.u32 %s5464_s22, 4  ;;  %s96_s5 = sshll.u32 %s5465_s17, 4  ;;  %s75_s11 = int_to_ptr.vmem [resolvable:$true] %s74_s11  ;;  %s97_s5 = int_to_ptr.vmem [resolvable:$true] %s96_s5 }
 0x112   :  { %s6494_s21 = sld [smem:[#allocation58_spill]] }
 0x118   :  { %s5133_s24 = scalar_lea.hbm %s6494_s21, 128 }
 0x119   :  { %p5134_p6 = scmp.ne.s32.totalorder %s6494_s21, %s5133_s24  ;;  %p5137_p7 = scmp.lt.u32.totalorder %s5133_s24, %s6494_s21 }
 0x11b   :  { %p5139_p8 = pnand %p5137_p7, %p5134_p6 }
 0x11d   :  { %5142 = shalt.err (!%p5139_p8)
}
 0x11e   :  { %s5143_s4 = scalar_lea.vmem %s75_s11, 128  ;;  %p5148_p10 = scmp.lt.s32.totalorder %s75_s11, %s75_s11 }
 0x11f   :  { %p5144_p9 = scmp.ne.s32.totalorder %s75_s11, %s5143_s4  ;;  %p5149_p11 = scmp.lt.s32.totalorder %s5143_s4, %s5143_s4 }
 0x121   :  { %p5150_p12 = por %p5149_p11, %p5148_p10 }
 0x123   :  { %p5151_p13 = pnand %p5150_p12, %p5144_p9 }
 0x125   :  { %5154 = shalt.err (!%p5151_p13)
}
 0x126   :  { %77 = dma.hbm_to_vmem [thread:$0]  %s6494_s21, 128, %s75_s11, [#allocation6]  }
 0x127   :  { %s6495_s0 = sld [smem:[#allocation60_spill]] }
 0x12d   :  { %s5155_s8 = scalar_lea.hbm %s6495_s0, 128 }
 0x12e   :  { %p5156_p0 = scmp.ne.s32.totalorder %s6495_s0, %s5155_s8  ;;  %p5159_p1 = scmp.lt.u32.totalorder %s5155_s8, %s6495_s0 }
 0x130   :  { %p5161_p2 = pnand %p5159_p1, %p5156_p0 }
 0x132   :  { %5164 = shalt.err (!%p5161_p2)
}
 0x133   :  { %s5165_s17 = scalar_lea.vmem %s97_s5, 128  ;;  %p5170_p4 = scmp.lt.s32.totalorder %s97_s5, %s97_s5 }
 0x134   :  { %p5166_p3 = scmp.ne.s32.totalorder %s97_s5, %s5165_s17  ;;  %p5171_p5 = scmp.lt.s32.totalorder %s5165_s17, %s5165_s17 }
 0x136   :  { %p5172_p6 = por %p5171_p5, %p5170_p4 }
 0x138   :  { %p5173_p7 = pnand %p5172_p6, %p5166_p3 }
 0x13a   :  { %5176 = shalt.err (!%p5173_p7)
}
 0x13b   :  { %99 = dma.hbm_to_vmem [thread:$0]  %s6495_s0, 128, %s97_s5, [#allocation9]  }
 0x13c   :  { %s5466_s29 = smov [#allocation13]   ;;  %s5467_s24 = smov [#allocation16]  }
 0x13d   :  { %s118_s21 = sshll.u32 %s5466_s29, 4  ;;  %s138_s26 = sshll.u32 %s5467_s24, 4  ;;  %s119_s21 = int_to_ptr.vmem [resolvable:$true] %s118_s21  ;;  %s139_s26 = int_to_ptr.vmem [resolvable:$true] %s138_s26 }
 0x13e   :  { %s6496_s30 = sld [smem:[#allocation62_spill]] }
 0x144   :  { %s5177_s4 = scalar_lea.hbm %s6496_s30, 128 }
 0x145   :  { %p5178_p8 = scmp.ne.s32.totalorder %s6496_s30, %s5177_s4  ;;  %p5181_p9 = scmp.lt.u32.totalorder %s5177_s4, %s6496_s30 }
 0x147   :  { %p5183_p10 = pnand %p5181_p9, %p5178_p8 }
 0x149   :  { %5186 = shalt.err (!%p5183_p10)
}
 0x14a   :  { %s5187_s5 = scalar_lea.vmem %s119_s21, 128  ;;  %p5192_p12 = scmp.lt.s32.totalorder %s119_s21, %s119_s21 }
 0x14b   :  { %p5188_p11 = scmp.ne.s32.totalorder %s119_s21, %s5187_s5  ;;  %p5193_p13 = scmp.lt.s32.totalorder %s5187_s5, %s5187_s5 }
 0x14d   :  { %p5194_p0 = por %p5193_p13, %p5192_p12 }
 0x14f   :  { %p5195_p1 = pnand %p5194_p0, %p5188_p11 }
 0x151   :  { %5198 = shalt.err (!%p5195_p1)
}
 0x152   :  { %121 = dma.hbm_to_vmem [thread:$0]  %s6496_s30, 128, %s119_s21, [#allocation12]  }
 0x153   :  { %s6497_s25 = sld [smem:[#allocation64_spill]] }
 0x159   :  { %s5199_s22 = scalar_lea.hbm %s6497_s25, 128 }
 0x15a   :  { %p5200_p2 = scmp.ne.s32.totalorder %s6497_s25, %s5199_s22  ;;  %p5203_p3 = scmp.lt.u32.totalorder %s5199_s22, %s6497_s25 }
 0x15c   :  { %p5205_p4 = pnand %p5203_p3, %p5200_p2 }
 0x15e   :  { %5208 = shalt.err (!%p5205_p4)
}
 0x15f   :  { %s5209_s24 = scalar_lea.vmem %s139_s26, 128  ;;  %p5214_p6 = scmp.lt.s32.totalorder %s139_s26, %s139_s26 }
 0x160   :  { %p5210_p5 = scmp.ne.s32.totalorder %s139_s26, %s5209_s24  ;;  %p5215_p7 = scmp.lt.s32.totalorder %s5209_s24, %s5209_s24 }
 0x162   :  { %p5216_p8 = por %p5215_p7, %p5214_p6 }
 0x164   :  { %p5217_p9 = pnand %p5216_p8, %p5210_p5 }
 0x166   :  { %5220 = shalt.err (!%p5217_p9)
}
 0x167   :  { %141 = dma.hbm_to_vmem [thread:$0]  %s6497_s25, 128, %s139_s26, [#allocation15]  }
 0x168   :  { %s5468_s1 = smov [#allocation19]   ;;  %s5469_s4 = smov [#allocation22]  }
 0x169   :  { %s160_s30 = sshll.u32 %s5468_s1, 4  ;;  %s182_s15 = sshll.u32 %s5469_s4, 4  ;;  %s161_s30 = int_to_ptr.vmem [resolvable:$true] %s160_s30  ;;  %s183_s15 = int_to_ptr.vmem [resolvable:$true] %s182_s15 }
 0x16a   :  { %s5221_s19 = scalar_lea.hbm %s6446_s10, 128 }
 0x16b   :  { %p5222_p10 = scmp.ne.s32.totalorder %s6446_s10, %s5221_s19  ;;  %p5225_p11 = scmp.lt.u32.totalorder %s5221_s19, %s6446_s10 }
 0x16d   :  { %p5227_p12 = pnand %p5225_p11, %p5222_p10 }
 0x16f   :  { %5230 = shalt.err (!%p5227_p12)
}
 0x170   :  { %s5231_s26 = scalar_lea.vmem %s161_s30, 128  ;;  %p5236_p0 = scmp.lt.s32.totalorder %s161_s30, %s161_s30 }
 0x171   :  { %p5232_p13 = scmp.ne.s32.totalorder %s161_s30, %s5231_s26  ;;  %p5237_p1 = scmp.lt.s32.totalorder %s5231_s26, %s5231_s26 }
 0x173   :  { %p5238_p2 = por %p5237_p1, %p5236_p0 }
 0x175   :  { %p5239_p3 = pnand %p5238_p2, %p5232_p13 }
 0x177   :  { %5242 = shalt.err (!%p5239_p3)
}
 0x178   :  { %163 = dma.hbm_to_vmem [thread:$0]  %s6446_s10, 128, %s161_s30, [#allocation18]  }
 0x179   :  { %s5243_s11 = scalar_lea.hbm %s6448_s12, 128 }
 0x17a   :  { %p5244_p4 = scmp.ne.s32.totalorder %s6448_s12, %s5243_s11  ;;  %p5247_p5 = scmp.lt.u32.totalorder %s5243_s11, %s6448_s12 }
 0x17c   :  { %p5249_p6 = pnand %p5247_p5, %p5244_p4 }
 0x17e   :  { %5252 = shalt.err (!%p5249_p6)
}
 0x17f   :  { %s5253_s7 = scalar_lea.vmem %s183_s15, 128  ;;  %p5258_p8 = scmp.lt.s32.totalorder %s183_s15, %s183_s15 }
 0x180   :  { %p5254_p7 = scmp.ne.s32.totalorder %s183_s15, %s5253_s7  ;;  %p5259_p9 = scmp.lt.s32.totalorder %s5253_s7, %s5253_s7 }
 0x182   :  { %p5260_p10 = por %p5259_p9, %p5258_p8 }
 0x184   :  { %p5261_p11 = pnand %p5260_p10, %p5254_p7 }
 0x186   :  { %5264 = shalt.err (!%p5261_p11)
}
 0x187   :  { %185 = dma.hbm_to_vmem [thread:$0]  %s6448_s12, 128, %s183_s15, [#allocation21]  }
 0x188   :  { %s5470_s30 = smov [#allocation25]   ;;  %s5471_s2 = smov [#allocation28]  }
 0x189   :  { %s204_s4 = sshll.u32 %s5470_s30, 4  ;;  %s224_s27 = sshll.u32 %s5471_s2, 4  ;;  %s205_s4 = int_to_ptr.vmem [resolvable:$true] %s204_s4  ;;  %s225_s27 = int_to_ptr.vmem [resolvable:$true] %s224_s27 }
 0x18a   :  { %s5265_s0 = scalar_lea.hbm %s6450_s14, 128 }
 0x18b   :  { %p5266_p12 = scmp.ne.s32.totalorder %s6450_s14, %s5265_s0  ;;  %p5269_p13 = scmp.lt.u32.totalorder %s5265_s0, %s6450_s14 }
 0x18d   :  { %p5271_p0 = pnand %p5269_p13, %p5266_p12 }
 0x18f   :  { %5274 = shalt.err (!%p5271_p0)
}
 0x190   :  { %s5275_s12 = scalar_lea.vmem %s205_s4, 128  ;;  %p5280_p2 = scmp.lt.s32.totalorder %s205_s4, %s205_s4 }
 0x191   :  { %p5276_p1 = scmp.ne.s32.totalorder %s205_s4, %s5275_s12  ;;  %p5281_p3 = scmp.lt.s32.totalorder %s5275_s12, %s5275_s12 }
 0x193   :  { %p5282_p4 = por %p5281_p3, %p5280_p2 }
 0x195   :  { %p5283_p5 = pnand %p5282_p4, %p5276_p1 }
 0x197   :  { %5286 = shalt.err (!%p5283_p5)
}
 0x198   :  { %207 = dma.hbm_to_vmem [thread:$0]  %s6450_s14, 128, %s205_s4, [#allocation24]  }
 0x199   :  { %s5287_s11 = scalar_lea.hbm %s6452_s16, 128 }
 0x19a   :  { %p5288_p6 = scmp.ne.s32.totalorder %s6452_s16, %s5287_s11  ;;  %p5291_p7 = scmp.lt.u32.totalorder %s5287_s11, %s6452_s16 }
 0x19c   :  { %p5293_p8 = pnand %p5291_p7, %p5288_p6 }
 0x19e   :  { %5296 = shalt.err (!%p5293_p8)
}
 0x19f   :  { %s5297_s7 = scalar_lea.vmem %s225_s27, 128  ;;  %p5302_p10 = scmp.lt.s32.totalorder %s225_s27, %s225_s27 }
 0x1a0   :  { %p5298_p9 = scmp.ne.s32.totalorder %s225_s27, %s5297_s7  ;;  %p5303_p11 = scmp.lt.s32.totalorder %s5297_s7, %s5297_s7 }
 0x1a2   :  { %p5304_p12 = por %p5303_p11, %p5302_p10 }
 0x1a4   :  { %p5305_p13 = pnand %p5304_p12, %p5298_p9 }
 0x1a6   :  { %5308 = shalt.err (!%p5305_p13)
}
 0x1a7   :  { %227 = dma.hbm_to_vmem [thread:$0]  %s6452_s16, 128, %s225_s27, [#allocation27]  }
 0x1a8   :  { %s5472_s1 = smov [#allocation31]   ;;  %s5473_s4 = smov [#allocation34]  }
 0x1a9   :  { %s246_s30 = sshll.u32 %s5472_s1, 4  ;;  %s268_s2 = sshll.u32 %s5473_s4, 4  ;;  %s247_s30 = int_to_ptr.vmem [resolvable:$true] %s246_s30  ;;  %s269_s2 = int_to_ptr.vmem [resolvable:$true] %s268_s2 }
 0x1aa   :  { %s5309_s0 = scalar_lea.hbm %s6454_s18, 128 }
 0x1ab   :  { %p5310_p0 = scmp.ne.s32.totalorder %s6454_s18, %s5309_s0  ;;  %p5313_p1 = scmp.lt.u32.totalorder %s5309_s0, %s6454_s18 }
 0x1ad   :  { %p5315_p2 = pnand %p5313_p1, %p5310_p0 }
 0x1af   :  { %5318 = shalt.err (!%p5315_p2)
}
 0x1b0   :  { %s5319_s16 = scalar_lea.vmem %s247_s30, 128  ;;  %p5324_p4 = scmp.lt.s32.totalorder %s247_s30, %s247_s30 }
 0x1b1   :  { %p5320_p3 = scmp.ne.s32.totalorder %s247_s30, %s5319_s16  ;;  %p5325_p5 = scmp.lt.s32.totalorder %s5319_s16, %s5319_s16 }
 0x1b3   :  { %p5326_p6 = por %p5325_p5, %p5324_p4 }
 0x1b5   :  { %p5327_p7 = pnand %p5326_p6, %p5320_p3 }
 0x1b7   :  { %5330 = shalt.err (!%p5327_p7)
}
 0x1b8   :  { %249 = dma.hbm_to_vmem [thread:$0]  %s6454_s18, 128, %s247_s30, [#allocation30]  }
 0x1b9   :  { %s5331_s22 = scalar_lea.hbm %s6456_s20, 128 }
 0x1ba   :  { %p5332_p8 = scmp.ne.s32.totalorder %s6456_s20, %s5331_s22  ;;  %p5335_p9 = scmp.lt.u32.totalorder %s5331_s22, %s6456_s20 }
 0x1bc   :  { %p5337_p10 = pnand %p5335_p9, %p5332_p8 }
 0x1be   :  { %5340 = shalt.err (!%p5337_p10)
}
 0x1bf   :  { %s5341_s24 = scalar_lea.vmem %s269_s2, 128  ;;  %p5346_p12 = scmp.lt.s32.totalorder %s269_s2, %s269_s2 }
 0x1c0   :  { %p5342_p11 = scmp.ne.s32.totalorder %s269_s2, %s5341_s24  ;;  %p5347_p13 = scmp.lt.s32.totalorder %s5341_s24, %s5341_s24 }
 0x1c2   :  { %p5348_p0 = por %p5347_p13, %p5346_p12 }
 0x1c4   :  { %p5349_p1 = pnand %p5348_p0, %p5342_p11 }
 0x1c6   :  { %5352 = shalt.err (!%p5349_p1)
}
 0x1c7   :  { %271 = dma.hbm_to_vmem [thread:$0]  %s6456_s20, 128, %s269_s2, [#allocation33]  }
 0x1c8   :  { %s5474_s7 = smov [#allocation37]   ;;  %s5475_s10 = smov [#allocation40]  }
 0x1c9   :  { %s290_s14 = sshll.u32 %s5474_s7, 4  ;;  %s310_s1 = sshll.u32 %s5475_s10, 4  ;;  %s291_s14 = int_to_ptr.vmem [resolvable:$true] %s290_s14  ;;  %s311_s1 = int_to_ptr.vmem [resolvable:$true] %s310_s1 }
 0x1ca   :  { %s6498_s19 = sld [smem:[#allocation66_spill]] }
 0x1d0   :  { %s5353_s5 = scalar_lea.hbm %s6498_s19, 128 }
 0x1d1   :  { %p5354_p2 = scmp.ne.s32.totalorder %s6498_s19, %s5353_s5  ;;  %p5357_p3 = scmp.lt.u32.totalorder %s5353_s5, %s6498_s19 }
 0x1d3   :  { %p5359_p4 = pnand %p5357_p3, %p5354_p2 }
 0x1d5   :  { %5362 = shalt.err (!%p5359_p4)
}
 0x1d6   :  { %s5363_s20 = scalar_lea.vmem %s291_s14, 128  ;;  %p5368_p6 = scmp.lt.s32.totalorder %s291_s14, %s291_s14 }
 0x1d7   :  { %p5364_p5 = scmp.ne.s32.totalorder %s291_s14, %s5363_s20  ;;  %p5369_p7 = scmp.lt.s32.totalorder %s5363_s20, %s5363_s20 }
 0x1d9   :  { %p5370_p8 = por %p5369_p7, %p5368_p6 }
 0x1db   :  { %p5371_p9 = pnand %p5370_p8, %p5364_p5 }
 0x1dd   :  { %5374 = shalt.err (!%p5371_p9)
}
 0x1de   :  { %293 = dma.hbm_to_vmem [thread:$0]  %s6498_s19, 128, %s291_s14, [#allocation36]  }
 0x1df   :  { %s6499_s12 = sld [smem:[#allocation67_spill]] }
 0x1e5   :  { %s5375_s15 = scalar_lea.hbm %s6499_s12, 128 }
 0x1e6   :  { %p5376_p10 = scmp.ne.s32.totalorder %s6499_s12, %s5375_s15  ;;  %p5379_p11 = scmp.lt.u32.totalorder %s5375_s15, %s6499_s12 }
 0x1e8   :  { %p5381_p12 = pnand %p5379_p11, %p5376_p10 }
 0x1ea   :  { %5384 = shalt.err (!%p5381_p12)
}
 0x1eb   :  { %s5385_s3 = scalar_lea.vmem %s311_s1, 128  ;;  %p5390_p0 = scmp.lt.s32.totalorder %s311_s1, %s311_s1 }
 0x1ec   :  { %p5386_p13 = scmp.ne.s32.totalorder %s311_s1, %s5385_s3  ;;  %p5391_p1 = scmp.lt.s32.totalorder %s5385_s3, %s5385_s3 }
 0x1ee   :  { %p5392_p2 = por %p5391_p1, %p5390_p0 }
 0x1f0   :  { %p5393_p3 = pnand %p5392_p2, %p5386_p13 }
 0x1f2   :  { %5396 = shalt.err (!%p5393_p3)
}
 0x1f3   :  { %313 = dma.hbm_to_vmem [thread:$0]  %s6499_s12, 128, %s311_s1, [#allocation39]  }
 0x1f4   :  { %5419 = dma.done.wait [#allocation3], 128  }
 0x1f5   :  { %5420 = vsyncadd [#allocation3], 4294967168 }
 0x1f6   :  { %5421 = dma.done.wait [#allocation6], 1024  }
 0x1f7   :  { %5422 = vsyncadd [#allocation6], 4294966272 }
 0x1f8   :  { %5423 = dma.done.wait [#allocation9], 768  }
 0x1f9   :  { %5424 = vsyncadd [#allocation9], 4294966528 }
 0x1fa   :  { %5425 = dma.done.wait [#allocation12], 512  }
 0x1fb   :  { %5426 = vsyncadd [#allocation12], 4294966784 }
 0x1fc   :  { %5427 = dma.done.wait [#allocation15], 256  }
 0x1fd   :  { %5428 = vsyncadd [#allocation15], 4294967040 }
 0x1fe   :  { %5429 = dma.done.wait [#allocation18], 1024  }
 0x1ff   :  { %5430 = vsyncadd [#allocation18], 4294966272 }
 0x200   :  { %5431 = dma.done.wait [#allocation21], 768  }
 0x201   :  { %5432 = vsyncadd [#allocation21], 4294966528 }
 0x202   :  { %5433 = dma.done.wait [#allocation24], 512  }
 0x203   :  { %5434 = vsyncadd [#allocation24], 4294966784 }
 0x204   :  { %5435 = dma.done.wait [#allocation27], 256  }
 0x205   :  { %5436 = vsyncadd [#allocation27], 4294967040 }
 0x206   :  { %5437 = dma.done.wait [#allocation30], 1024  }
 0x207   :  { %5438 = vsyncadd [#allocation30], 4294966272 }
 0x208   :  { %5439 = dma.done.wait [#allocation33], 768  }
 0x209   :  { %5440 = vsyncadd [#allocation33], 4294966528 }
 0x20a   :  { %5441 = dma.done.wait [#allocation36], 512  }
 0x20b   :  { %5442 = vsyncadd [#allocation36], 4294966784 }
 0x20c   :  { %5443 = dma.done.wait [#allocation39], 256  }
 0x20d   :  { %5444 = vsyncadd [#allocation39], 4294967040  ;;  %v5476_v0 = vmov 0.0   ;;  %v5948_v1 = vld [vmem:[#allocation2] sm:$0xf]  ;;  %s5477_s18 = smov 2   ;;  %v389_v5 = vlaneseq }
 0x20e   :  { %501 = vmatprep.mubr.f32.mxu0 %v5476_v0  ;;  %1201 = vmatprep.mubr.f32.mxu1 %v5476_v0  ;;  %s5478_s21 = smov 3   ;;  %v5954_v2 = vld [vmem:[#allocation2 + $0x4] sm:$0xf]  ;;  %v5479_v3 = vmov 0   ;;  %s5480_s7 = smov 1   ;;  %vm430_vm2 = vcmask 1043456  }
 0x20f   :  { %419 = vrot.lane.b32.xlu0 %v5948_v1, %s5477_s18  ;;  %412 = vrot.lane.b32.xlu1 %v5948_v1, %s5478_s21  ;;  %s5481_s14 = smov 127   ;;  %s5482_s10 = smov 126   ;;  %v1026_v4 = vld [vmem:[#allocation7] sm:$0xff]  ;;  %v5976_v6 = vand.u32 127, %v389_v5  ;;  %v1037_v11 = vshrl.u32 %v389_v5, 7  ;;  %v406_v15 = vld [vmem:[#allocation5 + $0x8] sm:$0xff] }
 0x210   :  { %4837 = vset.pattern.permute.xlu0 %v5479_v3  ;;  %4838 = vset.pattern.permute.xlu1 %v5479_v3  ;;  %s5483_s1 = smov 125   ;;  %vm426_vm3 = vcmask 31744   ;;  %v405_v25 = vld [vmem:[#allocation5] sm:$0xff]  ;;  %v407_v30 = vld [vmem:[#allocation5 + $0x10] sm:$0xff]  ;;  %v408_v34 = vld [vmem:[#allocation5 + $0x18] sm:$0xff]  ;;  %s5484_s30 = smov 6  }
 0x211   :  { %vm423_vm0 = vcmp.lt.s32.totalorder %v5976_v6, 2  ;;  %vm416_vm1 = vcmp.lt.s32.totalorder %v5976_v6, 3  ;;  %vm592_vm4 = vcmp.lt.s32.totalorder %v5976_v6, 1  ;;  %vm391_vm5 = vcmp.lt.s32.totalorder %v5976_v6, 16  ;;  %v409_v38 = vld [vmem:[#allocation5 + $0x20] sm:$0xff]  ;;  %v410_v41 = vld [vmem:[#allocation5 + $0x28] sm:$0xff] }
 0x212   :  { %v5994_v19 = vsub.s32 0, %v1037_v11  ;;  %v6001_v21 = vsel %vm391_vm5, 1.0, %v5476_v0  ;;  %vm763_vm6 = vcmp.lt.s32.totalorder %v5976_v6, 127  ;;  %vm852_vm7 = vcmp.lt.s32.totalorder %v5976_v6, 126  ;;  %v411_v43 = vld [vmem:[#allocation5 + $0x30] sm:$0xff]  ;;  %s5485_s4 = smov 124  }
 0x213   :  { %421 = vrot.lane.b32.xlu0 %v5954_v2, %s5477_s18  ;;  %414 = vrot.lane.b32.xlu1 %v5954_v2, %s5478_s21  ;;  %vm941_vm8 = vcmp.lt.s32.totalorder %v5976_v6, 125  ;;  %s5486_s19 = smov 122   ;;  %v1448_v55 = vld [vmem:[#allocation10] sm:$0xff]  ;;  %v2413_v56 = vld [vmem:[#allocation19] sm:$0xff]  ;;  %vm1059_vm9 = vcmask 64512   ;;  %vm1814_vm10 = vcmp.lt.s32.totalorder %v5976_v6, 4 }
 0x214   :  { %v6007_v23 = vrot.slane %v6001_v21, %v5994_v19  ;;  %v1043_v63 = vld [vmem:[#allocation8 + $0x8] sm:$0xff]  ;;  %vm1807_vm11 = vcmp.lt.s32.totalorder %v5976_v6, 6  ;;  %vm2239_vm12 = vcmp.lt.s32.totalorder %v5976_v6, 124  ;;  %vm2328_vm13 = vcmp.lt.s32.totalorder %v5976_v6, 122 }
 0x215   :  { %vm397_vm15 = vcmp.eq.s32.totalorder %v5976_v6, 0 }
 0x217   :  { %590 = vrot.lane.b32.xlu1 %v5954_v2, %s5480_s7  ;;  %588 = vrot.lane.b32.xlu0 %v5948_v1, %s5480_s7 }
 0x21b   :  { %761 = vrot.lane.b32.xlu1 %v5954_v2, %s5481_s14  ;;  %759 = vrot.lane.b32.xlu0 %v5948_v1, %s5481_s14 }
 0x21f   :  { %850 = vrot.lane.b32.xlu1 %v5954_v2, %s5482_s10  ;;  %848 = vrot.lane.b32.xlu0 %v5948_v1, %s5482_s10 }
 0x223   :  { %939 = vrot.lane.b32.xlu1 %v5954_v2, %s5483_s1  ;;  %937 = vrot.lane.b32.xlu0 %v5948_v1, %s5483_s1 }
 0x227   :  { %1029 = vperm.xlu0 %4837, %v1026_v4  }
 0x281   :  { %v420_v7 = vpop.permute.xlu0 %419  ;;  %v413_v8 = vpop.permute.xlu1 %412 }
 0x285   :  { %v422_v9 = vpop.permute.xlu0 %421  ;;  %v415_v10 = vpop.permute.xlu1 %414 }
 0x286   :  { %v424_v12 = vsel %vm423_vm0, %v420_v7, %v422_v9  ;;  %v417_v13 = vsel %vm416_vm1, %v413_v8, %v415_v10  ;;  %v425_v14 = vsel %vm423_vm0, %v422_v9, %v420_v7  ;;  %v418_v16 = vsel %vm416_vm1, %v415_v10, %v413_v8  ;;  %v1797_v8 = vld [vmem:[#allocation17 + $0x8] sm:$0xff] }
 0x287   :  { %4624 = vmatprep.subr.msk.mxu0 %vm430_vm2, %v424_v12 }
 0x288   :  { %4625 = vmatpush1.msk.msra.mxu0 %vm430_vm2, %v425_v14 }
 0x289   :  { %4626 = vmatmul.mubr.msk.f32.vlgmr.msra.gmra.mrb[0].mxu0 %vm426_vm3, %v406_v15  ;;  %4627 = vmatprep.subr.msk.mxu0 %vm430_vm2, %v417_v13  ;;  %v591_v17 = vpop.permute.xlu1 %590  ;;  %v589_v18 = vpop.permute.xlu0 %588  ;;  %v1042_v13 = vld [vmem:[#allocation8] sm:$0xff] }
 0x28a   :  { %4628 = vmatpush1.msk.msra.mxu0 %vm430_vm2, %v418_v16  ;;  %581 = vmatprep.mubr.f32.mxu0 %v5476_v0  ;;  %v593_v20 = vsel %vm592_vm4, %v589_v18, %v591_v17  ;;  %v594_v27 = vsel %vm592_vm4, %v591_v17, %v589_v18  ;;  %v1796_v17 = vld [vmem:[#allocation17] sm:$0xff] }
 0x28b   :  { %4630 = vmatprep.subr.msk.mxu0 %vm430_vm2, %v593_v20 }
 0x28d   :  { %v762_v22 = vpop.permute.xlu1 %761  ;;  %v760_v24 = vpop.permute.xlu0 %759 }
 0x28e   :  { %v764_v26 = vsel %vm763_vm6, %v760_v24, %v762_v22  ;;  %v765_v31 = vsel %vm763_vm6, %v762_v22, %v760_v24 }
 0x28f   :  { %v1792_v28 = vmax.f32 %v5948_v1, %v764_v26  ;;  %v1793_v52 = vmax.f32 %v5954_v2, %v765_v31 }
 0x291   :  { %4629 = vmatmul.mubr.msk.f32.vlgmr.msra.gmra.mrb[0].mxu0 %vm426_vm3, %v405_v25  ;;  %v6016_v29 = vmul.f32 %v1792_v28, %v6007_v23  ;;  %v851_v32 = vpop.permute.xlu1 %850  ;;  %v849_v33 = vpop.permute.xlu0 %848  ;;  %v6066_v54 = vmul.f32 %v1793_v52, %v6007_v23  ;;  %v1044_v25 = vld [vmem:[#allocation8 + $0x10] sm:$0xff] }
 0x292   :  { %4631 = vmatpush1.msk.msra.mxu0 %vm430_vm2, %v594_v27  ;;  %668 = vmatprep.mubr.f32.mxu0 %v5476_v0  ;;  %v854_v35 = vsel %vm852_vm7, %v851_v32, %v849_v33  ;;  %v853_v39 = vsel %vm852_vm7, %v849_v33, %v851_v32  ;;  %v1802_v52 = vld [vmem:[#allocation17 + $0x30] sm:$0xff] }
 0x293   :  { %4633 = vmatprep.subr.msk.mxu0 %vm430_vm2, %v5954_v2  ;;  %1810 = vrot.lane.b32.xlu0 %v6016_v29, %s5463_s13 }
 0x295   :  { %v940_v36 = vpop.permute.xlu1 %939  ;;  %v938_v37 = vpop.permute.xlu0 %937 }
 0x296   :  { %v943_v40 = vsel %vm941_vm8, %v940_v36, %v938_v37  ;;  %v942_v42 = vsel %vm941_vm8, %v938_v37, %v940_v36 }
 0x299   :  { %4632 = vmatmul.mubr.msk.f32.vlgmr.msra.gmra.mrb[0].mxu0 %vm426_vm3, %v407_v30 }
 0x29a   :  { %4634 = vmatpush1.msk.msra.mxu0 %vm430_vm2, %v5948_v1  ;;  %750 = vmatprep.mubr.f32.mxu0 %v5476_v0 }
 0x29b   :  { %4636 = vmatprep.subr.msk.mxu0 %vm430_vm2, %v765_v31  ;;  %v1798_v31 = vld [vmem:[#allocation17 + $0x10] sm:$0xff] }
 0x2a1   :  { %4635 = vmatmul.mubr.msk.f32.vlgmr.msra.gmra.mrb[0].mxu0 %vm426_vm3, %v408_v34  ;;  %v1045_v34 = vld [vmem:[#allocation8 + $0x18] sm:$0xff] }
 0x2a2   :  { %4637 = vmatpush1.msk.msra.mxu0 %vm430_vm2, %v764_v26  ;;  %839 = vmatprep.mubr.f32.mxu0 %v5476_v0 }
 0x2a3   :  { %4639 = vmatprep.subr.msk.mxu0 %vm430_vm2, %v854_v35 }
 0x2a6   :  { %v1030_v44 = vpop.permute.xlu0 %1029 }
 0x2a9   :  { %4638 = vmatmul.mubr.msk.f32.vlgmr.msra.gmra.mrb[0].mxu0 %vm426_vm3, %v409_v38 }
 0x2aa   :  { %4640 = vmatpush1.msk.msra.mxu0 %vm430_vm2, %v853_v39  ;;  %928 = vmatprep.mubr.f32.mxu0 %v5476_v0  ;;  %v1799_v39 = vld [vmem:[#allocation17 + $0x18] sm:$0xff] }
 0x2ab   :  { %4642 = vmatprep.subr.msk.mxu0 %vm430_vm2, %v943_v40 }
 0x2b1   :  { %4641 = vmatmul.mubr.msk.f32.vlgmr.msra.gmra.mrb[0].mxu0 %vm426_vm3, %v410_v41 }
 0x2b2   :  { %4643 = vmatpush1.msk.msra.mxu0 %vm430_vm2, %v942_v42  ;;  %1017 = vmatprep.mubr.f32.mxu0 %v5476_v0 }
 0x2b9   :  { %4644 = vmatmul.mubr.msk.f32.vlgmr.msra.gmra.mrb[0].mxu0 %vm426_vm3, %v411_v43 }
 0x2ba   :  { %1127 = vmatprep.mubr.f32.mxu0 %v5476_v0 }
 0x305   :  { %v1811_v57 = vpop.permute.xlu0 %1810 }
 0x38c   :  { %v1019_v45 = vpop.f32.mrb[0].mxu0 }
 0x38d   :  { %v1032_v46 = vadd.f32 %v1030_v44, %v1019_v45  ;;  %v1021_v47 = vpop.f32.mrb[1].mxu0  ;;  %v1800_v45 = vld [vmem:[#allocation17 + $0x20] sm:$0xff] }
 0x38e   :  { %v1033_v48 = vadd.f32 %v1030_v44, %v1021_v47  ;;  %v1046_v44 = vld [vmem:[#allocation8 + $0x20] sm:$0xff] }
 0x38f   :  { %v1034_v49 = vmax.f32 %v1032_v46, 0.0 }
 0x390   :  { %v1035_v51 = vmax.f32 %v1033_v48, 0.0 }
 0x391   :  { %v6055_v50 = vmul.f32 %v6007_v23, %v1034_v49 }
 0x392   :  { %v1041_v53 = vmul.f32 %v6007_v23, %v1035_v51 }
 0x393   :  { %1047 = vrot.lane.b32.xlu0 %v6055_v50, %s5477_s18  ;;  %1053 = vrot.lane.b32.xlu1 %v6055_v50, %s5480_s7 }
 0x397   :  { %1803 = vrot.lane.b32.xlu0 %v6016_v29, %s5484_s30  ;;  %1055 = vrot.lane.b32.xlu1 %v1041_v53, %s5480_s7 }
 0x39b   :  { %1977 = vrot.lane.b32.xlu0 %v6016_v29, %s5477_s18  ;;  %1812 = vrot.lane.b32.xlu1 %v6066_v54, %s5463_s13 }
 0x39f   :  { %1284 = vrot.lane.b32.xlu0 %v6055_v50, %s5481_s14  ;;  %1049 = vrot.lane.b32.xlu1 %v1041_v53, %s5477_s18 }
 0x3a3   :  { %1366 = vrot.lane.b32.xlu0 %v6055_v50, %s5482_s10  ;;  %1805 = vrot.lane.b32.xlu1 %v6066_v54, %s5484_s30 }
 0x3a7   :  { %2147 = vrot.lane.b32.xlu0 %v6016_v29, %s5482_s10  ;;  %1979 = vrot.lane.b32.xlu1 %v6066_v54, %s5477_s18 }
 0x3ab   :  { %2235 = vrot.lane.b32.xlu0 %v6016_v29, %s5485_s4  ;;  %1286 = vrot.lane.b32.xlu1 %v1041_v53, %s5481_s14 }
 0x3af   :  { %2324 = vrot.lane.b32.xlu0 %v6016_v29, %s5486_s19  ;;  %1368 = vrot.lane.b32.xlu1 %v1041_v53, %s5482_s10 }
 0x3b3   :  { %1451 = vperm.xlu0 %4837, %v1448_v55   ;;  %2149 = vrot.lane.b32.xlu1 %v6066_v54, %s5482_s10 }
 0x3b7   :  { %2237 = vrot.lane.b32.xlu1 %v6066_v54, %s5485_s4 }
 0x3bb   :  { %2326 = vrot.lane.b32.xlu1 %v6066_v54, %s5486_s19 }
 0x3bf   :  { %2416 = vperm.xlu1 %4838, %v2413_v56  }
 0x405   :  { %v1054_v58 = vpop.permute.xlu1 %1053  ;;  %v1048_v59 = vpop.permute.xlu0 %1047 }
 0x409   :  { %v1056_v60 = vpop.permute.xlu1 %1055  ;;  %v1804_v3 = vpop.permute.xlu0 %1803 }
 0x40a   :  { %v1058_v61 = vsel %vm592_vm4, %v1056_v60, %v1054_v58  ;;  %v1057_v62 = vsel %vm592_vm4, %v1054_v58, %v1056_v60 }
 0x40b   :  { %1063 = vmatprep.subr.mxu0 %v1057_v62 }
 0x40c   :  { %1064 = vmatpush1.msra.mxu0 %v1058_v61 }
 0x40d   :  { %4645 = vmatmul.mubr.msk.f32.vlgmr.msra.gmra.mrb[2].mxu0 %vm1059_vm9, %v1043_v63  ;;  %v1813_v4 = vpop.permute.xlu1 %1812  ;;  %v1978_v9 = vpop.permute.xlu0 %1977 }
 0x40e   :  { %v1815_v5 = vsel %vm1814_vm10, %v1811_v57, %v1813_v4  ;;  %v1816_v7 = vsel %vm1814_vm10, %v1813_v4, %v1811_v57  ;;  %1890 = vmatprep.mubr.f32.mxu0 %v5476_v0 }
 0x40f   :  { %4656 = vmatprep.subr.msk.mxu0 %vm430_vm2, %v1815_v5 }
 0x410   :  { %4657 = vmatpush1.msk.msra.mxu0 %vm430_vm2, %v1816_v7  ;;  %v1461_v7 = vld [vmem:[#allocation11 + $0x8] sm:$0xff] }
 0x411   :  { %v1050_v10 = vpop.permute.xlu1 %1049  ;;  %4658 = vmatmul.mubr.msk.f32.vlgmr.msra.gmra.mrb[4].mxu0 %vm426_vm3, %v1797_v8  ;;  %v1285_v18 = vpop.permute.xlu0 %1284 }
 0x412   :  { %v1051_v11 = vsel %vm423_vm0, %v1048_v59, %v1050_v10  ;;  %v1052_v12 = vsel %vm423_vm0, %v1050_v10, %v1048_v59  ;;  %1970 = vmatprep.mubr.f32.mxu0 %v5476_v0 }
 0x413   :  { %1137 = vmatprep.subr.mxu1 %v1051_v11 }
 0x414   :  { %1138 = vmatpush1.msra.mxu1 %v1052_v12 }
 0x415   :  { %v1806_v14 = vpop.permute.xlu1 %1805  ;;  %4646 = vmatmul.mubr.msk.f32.vlgmr.msra.gmra.mrb[0].mxu1 %vm1059_vm9, %v1042_v13  ;;  %1211 = vmatprep.subr.mxu1 %v1041_v53  ;;  %v1367_v26 = vpop.permute.xlu0 %1366 }
 0x416   :  { %v1808_v15 = vsel %vm1807_vm11, %v1804_v3, %v1806_v14  ;;  %v1809_v16 = vsel %vm1807_vm11, %v1806_v14, %v1804_v3  ;;  %1212 = vmatpush1.msra.mxu1 %v6055_v50  ;;  %1275 = vmatprep.mubr.f32.mxu1 %v5476_v0  ;;  %v1801_v50 = vld [vmem:[#allocation17 + $0x28] sm:$0xff] }
 0x417   :  { %4659 = vmatprep.subr.msk.mxu0 %vm430_vm2, %v1808_v15 }
 0x418   :  { %4660 = vmatpush1.msk.msra.mxu0 %vm430_vm2, %v1809_v16 }
 0x419   :  { %v1980_v20 = vpop.permute.xlu1 %1979  ;;  %4661 = vmatmul.mubr.msk.f32.vlgmr.msra.gmra.mrb[4].mxu0 %vm426_vm3, %v1796_v17  ;;  %v2148_v35 = vpop.permute.xlu0 %2147  ;;  %v2830_v17 = vld [vmem:[#allocation22] sm:$0xff] }
 0x41a   :  { %v1981_v22 = vsel %vm423_vm0, %v1978_v9, %v1980_v20  ;;  %v1982_v24 = vsel %vm423_vm0, %v1980_v20, %v1978_v9  ;;  %2056 = vmatprep.mubr.f32.mxu0 %v5476_v0 }
 0x41b   :  { %4662 = vmatprep.subr.msk.mxu0 %vm430_vm2, %v1981_v22 }
 0x41c   :  { %4663 = vmatpush1.msk.msra.mxu0 %vm430_vm2, %v1982_v24 }
 0x41d   :  { %v1287_v27 = vpop.permute.xlu1 %1286  ;;  %4647 = vmatmul.mubr.msk.f32.vlgmr.msra.gmra.mrb[0].mxu1 %vm1059_vm9, %v1044_v25  ;;  %4665 = vmatprep.subr.msk.mxu0 %vm430_vm2, %v6066_v54  ;;  %v2236_v40 = vpop.permute.xlu0 %2235  ;;  %v1460_v25 = vld [vmem:[#allocation11] sm:$0xff] }
 0x41e   :  { %v1288_v28 = vsel %vm763_vm6, %v1285_v18, %v1287_v27  ;;  %v1289_v30 = vsel %vm763_vm6, %v1287_v27, %v1285_v18  ;;  %1357 = vmatprep.mubr.f32.mxu1 %v5476_v0 }
 0x41f   :  { %1293 = vmatprep.subr.mxu1 %v1289_v30 }
 0x420   :  { %1294 = vmatpush1.msra.mxu1 %v1288_v28 }
 0x421   :  { %v1369_v32 = vpop.permute.xlu1 %1368  ;;  %4664 = vmatmul.mubr.msk.f32.vlgmr.msra.gmra.mrb[4].mxu0 %vm426_vm3, %v1798_v31  ;;  %v2325_v47 = vpop.permute.xlu0 %2324  ;;  %v1462_v31 = vld [vmem:[#allocation11 + $0x10] sm:$0xff] }
 0x422   :  { %4666 = vmatpush1.msk.msra.mxu0 %vm430_vm2, %v6016_v29  ;;  %v1371_v33 = vsel %vm852_vm7, %v1369_v32, %v1367_v26  ;;  %2138 = vmatprep.mubr.f32.mxu0 %v5476_v0  ;;  %v1370_v36 = vsel %vm852_vm7, %v1367_v26, %v1369_v32 }
 0x423   :  { %1375 = vmatprep.subr.mxu1 %v1371_v33  ;;  %v1707_v33 = vld [vmem:[#allocation14] sm:$0xff] }
 0x425   :  { %v2150_v37 = vpop.permute.xlu1 %2149  ;;  %4648 = vmatmul.mubr.msk.f32.vlgmr.msra.gmra.mrb[0].mxu1 %vm1059_vm9, %v1045_v34 }
 0x426   :  { %v2152_v38 = vsel %vm852_vm7, %v2150_v37, %v2148_v35  ;;  %1376 = vmatpush1.msra.mxu1 %v1370_v36  ;;  %1439 = vmatprep.mubr.f32.mxu1 %v5476_v0  ;;  %v2151_v41 = vsel %vm852_vm7, %v2148_v35, %v2150_v37  ;;  %v2426_v37 = vld [vmem:[#allocation20 + $0x8] sm:$0xff] }
 0x427   :  { %4668 = vmatprep.subr.msk.mxu0 %vm430_vm2, %v2152_v38 }
 0x429   :  { %v2238_v42 = vpop.permute.xlu1 %2237  ;;  %4667 = vmatmul.mubr.msk.f32.vlgmr.msra.gmra.mrb[4].mxu0 %vm426_vm3, %v1799_v39 }
 0x42a   :  { %v2241_v43 = vsel %vm2239_vm12, %v2238_v42, %v2236_v40  ;;  %4669 = vmatpush1.msk.msra.mxu0 %vm430_vm2, %v2151_v41  ;;  %2226 = vmatprep.mubr.f32.mxu0 %v5476_v0  ;;  %v2240_v48 = vsel %vm2239_vm12, %v2236_v40, %v2238_v42  ;;  %v2425_v40 = vld [vmem:[#allocation20] sm:$0xff] }
 0x42b   :  { %4671 = vmatprep.subr.msk.mxu0 %vm430_vm2, %v2241_v43 }
 0x42d   :  { %4649 = vmatmul.mubr.msk.f32.vlgmr.msra.gmra.mrb[0].mxu1 %vm1059_vm9, %v1046_v44  ;;  %v2327_v46 = vpop.permute.xlu1 %2326  ;;  %v2427_v44 = vld [vmem:[#allocation20 + $0x10] sm:$0xff] }
 0x42e   :  { %1536 = vmatprep.mubr.f32.mxu1 %v5476_v0  ;;  %v2330_v49 = vsel %vm2328_vm13, %v2327_v46, %v2325_v47  ;;  %v2329_v51 = vsel %vm2328_vm13, %v2325_v47, %v2327_v46 }
 0x431   :  { %4670 = vmatmul.mubr.msk.f32.vlgmr.msra.gmra.mrb[4].mxu0 %vm426_vm3, %v1800_v45 }
 0x432   :  { %4672 = vmatpush1.msk.msra.mxu0 %vm430_vm2, %v2240_v48  ;;  %2315 = vmatprep.mubr.f32.mxu0 %v5476_v0  ;;  %v1452_v59 = vpop.permute.xlu0 %1451 }
 0x433   :  { %4674 = vmatprep.subr.msk.mxu0 %vm430_vm2, %v2330_v49  ;;  %v2428_v49 = vld [vmem:[#allocation20 + $0x18] sm:$0xff] }
 0x439   :  { %4673 = vmatmul.mubr.msk.f32.vlgmr.msra.gmra.mrb[4].mxu0 %vm426_vm3, %v1801_v50 }
 0x43a   :  { %4675 = vmatpush1.msk.msra.mxu0 %vm430_vm2, %v2329_v51  ;;  %2404 = vmatprep.mubr.f32.mxu0 %v5476_v0  ;;  %v2429_v51 = vld [vmem:[#allocation20 + $0x20] sm:$0xff] }
 0x43e   :  { %v2417_v8 = vpop.permute.xlu1 %2416 }
 0x441   :  { %4676 = vmatmul.mubr.msk.f32.vlgmr.msra.gmra.mrb[4].mxu0 %vm426_vm3, %v1802_v52 }
 0x442   :  { %2918 = vmatprep.mubr.f32.mxu0 %v5476_v0 }
 0x4e0   :  { %v1129_v53 = vpop.f32.mrb[2].mxu0 }
 0x4e1   :  { %v1131_v55 = vpop.f32.mrb[3].mxu0 }
 0x500   :  { %v1441_v56 = vpop.f32.mrb[0].mxu1 }
 0x501   :  { %v4706_v57 = vadd.f32 %v1441_v56, %v1129_v53  ;;  %v1443_v58 = vpop.f32.mrb[1].mxu1 }
 0x502   :  { %v4707_v60 = vadd.f32 %v1443_v58, %v1131_v55 }
 0x503   :  { %v1454_v61 = vadd.f32 %v4706_v57, %v1452_v59 }
 0x504   :  { %v1455_v62 = vadd.f32 %v4707_v60, %v1452_v59 }
 0x505   :  { %v1456_v63 = vmax.f32 %v1454_v61, 0.0 }
 0x506   :  { %v1457_v3 = vmax.f32 %v1455_v62, 0.0 }
 0x507   :  { %v1458_v4 = vmul.f32 %v1456_v63, %v6007_v23 }
 0x508   :  { %v1459_v5 = vmul.f32 %v1457_v3, %v6007_v23  ;;  %v2843_v3 = vld [vmem:[#allocation23 + $0x8] sm:$0xff] }
 0x509   :  { %1463 = vrot.lane.b32.xlu0 %v1458_v4, %s5480_s7 }
 0x50a   :  { %1465 = vrot.lane.b32.xlu1 %v1459_v5, %s5480_s7  ;;  %1472 = vmatprep.subr.mxu1 %v1459_v5 }
 0x50b   :  { %1473 = vmatpush1.msra.mxu1 %v1458_v4 }
 0x50c   :  { %4650 = vmatmul.mubr.msk.f32.vlgmr.msra.gmra.mrb[2].mxu1 %vm1059_vm9, %v1461_v7 }
 0x50d   :  { %1617 = vrot.lane.b32.xlu0 %v1458_v4, %s5481_s14  ;;  %1610 = vmatprep.mubr.f32.mxu1 %v5476_v0  ;;  %v3081_v4 = vld [vmem:[#allocation25] sm:$0xff] }
 0x50e   :  { %1619 = vrot.lane.b32.xlu1 %v1459_v5, %s5481_s14  ;;  %v3090_v5 = vld [vmem:[#allocation28] sm:$0xff] }
 0x514   :  { %v2406_v9 = vpop.f32.mrb[4].mxu0 }
 0x515   :  { %v2419_v10 = vadd.f32 %v2417_v8, %v2406_v9  ;;  %v2408_v11 = vpop.f32.mrb[5].mxu0 }
 0x516   :  { %v2420_v12 = vadd.f32 %v2417_v8, %v2408_v11  ;;  %v2842_v11 = vld [vmem:[#allocation23] sm:$0xff] }
 0x517   :  { %v2421_v13 = vmax.f32 %v2419_v10, 0.0 }
 0x518   :  { %v2422_v14 = vmax.f32 %v2420_v12, 0.0 }
 0x519   :  { %v2423_v15 = vmul.f32 %v2421_v13, %v6007_v23 }
 0x51a   :  { %v2424_v16 = vmul.f32 %v2422_v14, %v6007_v23 }
 0x51b   :  { %2436 = vrot.lane.b32.xlu0 %v2423_v15, %s5477_s18 }
 0x51c   :  { %2438 = vrot.lane.b32.xlu1 %v2424_v16, %s5477_s18 }
 0x51f   :  { %2430 = vrot.lane.b32.xlu0 %v2423_v15, %s5463_s13 }
 0x520   :  { %2432 = vrot.lane.b32.xlu1 %v2424_v16, %s5463_s13  ;;  %s5487_s13 = smov [#allocation41]  }
 0x521   :  { %s4600_s5 = sshll.u32 %s5487_s13, 4  ;;  %s4601_s5 = int_to_ptr.vmem [resolvable:$true] %s4600_s5 }
 0x522   :  { %s5397_s0 = scalar_lea.vmem %s4601_s5, 256  ;;  %p5402_p5 = scmp.lt.s32.totalorder %s4601_s5, %s4601_s5 }
 0x523   :  { %2666 = vrot.lane.b32.xlu0 %v2423_v15, %s5482_s10  ;;  %p5398_p4 = scmp.ne.s32.totalorder %s4601_s5, %s5397_s0  ;;  %p5403_p6 = scmp.lt.s32.totalorder %s5397_s0, %s5397_s0 }
 0x524   :  { %2668 = vrot.lane.b32.xlu1 %v2424_v16, %s5482_s10 }
 0x525   :  { %p5404_p7 = por %p5403_p6, %p5402_p5 }
 0x527   :  { %2748 = vrot.lane.b32.xlu0 %v2423_v15, %s5485_s4  ;;  %p5405_p8 = pnand %p5404_p7, %p5398_p4 }
 0x528   :  { %2750 = vrot.lane.b32.xlu1 %v2424_v16, %s5485_s4 }
 0x52b   :  { %2833 = vperm.xlu0 %4837, %v2830_v17   ;;  %v3089_v17 = vld [vmem:[#allocation26] sm:$0xff] }
 0x57b   :  { %v1464_v18 = vpop.permute.xlu0 %1463 }
 0x57c   :  { %v1466_v20 = vpop.permute.xlu1 %1465 }
 0x57d   :  { %v1468_v22 = vsel %vm592_vm4, %v1466_v20, %v1464_v18  ;;  %v1467_v24 = vsel %vm592_vm4, %v1464_v18, %v1466_v20  ;;  %v393_v18 = vand.u32 1, %v5976_v6 }
 0x57e   :  { %1546 = vmatprep.subr.mxu1 %v1467_v24 }
 0x57f   :  { %v1618_v26 = vpop.permute.xlu0 %1617  ;;  %1547 = vmatpush1.msra.mxu1 %v1468_v22  ;;  %vm394_vm14 = vcmp.eq.s32.totalorder %v393_v18, 0 }
 0x580   :  { %v1620_v27 = vpop.permute.xlu1 %1619  ;;  %4651 = vmatmul.mubr.msk.f32.vlgmr.msra.gmra.mrb[2].mxu1 %vm1059_vm9, %v1460_v25  ;;  %v395_v20 = vsel %vm394_vm14, 1.0, %v5476_v0 }
 0x581   :  { %v1621_v28 = vsel %vm763_vm6, %v1618_v26, %v1620_v27  ;;  %v1622_v30 = vsel %vm763_vm6, %v1620_v27, %v1618_v26  ;;  %1690 = vmatprep.mubr.f32.mxu1 %v5476_v0  ;;  %v396_v24 = vmul.f32 %v395_v20, %v6001_v21 }
 0x582   :  { %1626 = vmatprep.subr.mxu1 %v1622_v30 }
 0x583   :  { %1627 = vmatpush1.msra.mxu1 %v1621_v28 }
 0x584   :  { %4653 = vmatprep.subr.msk.mxu1 %vm430_vm2, %v5954_v2 }
 0x588   :  { %4652 = vmatmul.mubr.msk.f32.vlgmr.msra.gmra.mrb[2].mxu1 %vm1059_vm9, %v1462_v31 }
 0x589   :  { %4654 = vmatpush1.msk.msra.mxu1 %vm430_vm2, %v5948_v1  ;;  %1781 = vmatprep.mubr.f32.mxu1 %v5476_v0 }
 0x58d   :  { %v2437_v32 = vpop.permute.xlu0 %2436 }
 0x58e   :  { %v2439_v34 = vpop.permute.xlu1 %2438 }
 0x58f   :  { %v2441_v35 = vsel %vm423_vm0, %v2439_v34, %v2437_v32  ;;  %v2440_v36 = vsel %vm423_vm0, %v2437_v32, %v2439_v34 }
 0x590   :  { %4655 = vmatmul.mubr.msk.f32.vlgmr.msra.gmra.mrb[2].mxu1 %vm426_vm3, %v1707_v33  ;;  %2445 = vmatprep.subr.mxu1 %v2440_v36 }
 0x591   :  { %v2431_v2 = vpop.permute.xlu0 %2430  ;;  %2446 = vmatpush1.msra.mxu1 %v2441_v35  ;;  %2509 = vmatprep.mubr.f32.mxu1 %v5476_v0 }
 0x592   :  { %v2433_v1 = vpop.permute.xlu1 %2432 }
 0x593   :  { %v2435_v38 = vsel %vm1814_vm10, %v2433_v1, %v2431_v2  ;;  %v2434_v39 = vsel %vm1814_vm10, %v2431_v2, %v2433_v1 }
 0x594   :  { %4677 = vmatmul.mubr.msk.f32.vlgmr.msra.gmra.mrb[4].mxu1 %vm1059_vm9, %v2426_v37  ;;  %2519 = vmatprep.subr.mxu1 %v2434_v39 }
 0x595   :  { %2520 = vmatpush1.msra.mxu1 %v2435_v38  ;;  %2583 = vmatprep.mubr.f32.mxu1 %v5476_v0  ;;  %v2667_v41 = vpop.permute.xlu0 %2666  ;;  %v398_v38 = vsel %vm397_vm15, 1.0, %v5476_v0 }
 0x596   :  { %2593 = vmatprep.subr.mxu1 %v2424_v16  ;;  %v2669_v42 = vpop.permute.xlu1 %2668  ;;  %v2844_v16 = vld [vmem:[#allocation23 + $0x10] sm:$0xff] }
 0x597   :  { %v2671_v43 = vsel %vm852_vm7, %v2669_v42, %v2667_v41  ;;  %v2670_v47 = vsel %vm852_vm7, %v2667_v41, %v2669_v42 }
 0x599   :  { %v2749_v45 = vpop.permute.xlu0 %2748 }
 0x59a   :  { %v2751_v46 = vpop.permute.xlu1 %2750 }
 0x59b   :  { %v2753_v48 = vsel %vm2239_vm12, %v2751_v46, %v2749_v45  ;;  %v2752_v50 = vsel %vm2239_vm12, %v2749_v45, %v2751_v46 }
 0x59c   :  { %4678 = vmatmul.mubr.msk.f32.vlgmr.msra.gmra.mrb[4].mxu1 %vm1059_vm9, %v2425_v40 }
 0x59d   :  { %2594 = vmatpush1.msra.mxu1 %v2423_v15  ;;  %2657 = vmatprep.mubr.f32.mxu1 %v5476_v0 }
 0x59e   :  { %2675 = vmatprep.subr.mxu1 %v2671_v43 }
 0x5a4   :  { %4679 = vmatmul.mubr.msk.f32.vlgmr.msra.gmra.mrb[4].mxu1 %vm1059_vm9, %v2427_v44  ;;  %v3212_v44 = vsub.f32 1.0, %v395_v20 }
 0x5a5   :  { %2676 = vmatpush1.msra.mxu1 %v2670_v47  ;;  %2739 = vmatprep.mubr.f32.mxu1 %v5476_v0 }
 0x5a6   :  { %2757 = vmatprep.subr.mxu1 %v2753_v48 }
 0x5aa   :  { %v2834_v55 = vpop.permute.xlu0 %2833 }
 0x5ac   :  { %4680 = vmatmul.mubr.msk.f32.vlgmr.msra.gmra.mrb[4].mxu1 %vm1059_vm9, %v2428_v49  ;;  %v3209_v49 = vrot.slane %v395_v20, %v5994_v19 }
 0x5ad   :  { %2758 = vmatpush1.msra.mxu1 %v2752_v50  ;;  %2821 = vmatprep.mubr.f32.mxu1 %v5476_v0 }
 0x5b4   :  { %4681 = vmatmul.mubr.msk.f32.vlgmr.msra.gmra.mrb[4].mxu1 %vm1059_vm9, %v2429_v51 }
 0x5b5   :  { %3328 = vmatprep.mubr.f32.mxu1 %v5476_v0 }
 0x663   :  { %v6231_v52 = vpop.f32.mrb[2].mxu1 }
 0x664   :  { %v6233_v53 = vpop.f32.mrb[3].mxu1 }
 0x687   :  { %v2823_v56 = vpop.f32.mrb[4].mxu1 }
 0x688   :  { %v2836_v57 = vadd.f32 %v2834_v55, %v2823_v56  ;;  %v2825_v58 = vpop.f32.mrb[5].mxu1  ;;  %v3220_v56 = vrot.slane %v3212_v44, %v5994_v19  ;;  %v3246_v44 = vld [vmem:[#allocation29 + $0x20] sm:$0xff] }
 0x689   :  { %v2837_v59 = vadd.f32 %v2834_v55, %v2825_v58 }
 0x68a   :  { %v2838_v60 = vmax.f32 %v2836_v57, 0.0 }
 0x68b   :  { %v2839_v61 = vmax.f32 %v2837_v59, 0.0 }
 0x68c   :  { %v2840_v62 = vmul.f32 %v2838_v60, %v6007_v23 }
 0x68d   :  { %v2841_v63 = vmul.f32 %v2839_v61, %v6007_v23 }
 0x68e   :  { %2845 = vrot.lane.b32.xlu1 %v2840_v62, %s5477_s18 }
 0x68f   :  { %2847 = vrot.lane.b32.xlu0 %v2841_v63, %s5477_s18  ;;  %2854 = vmatprep.subr.mxu0 %v2841_v63 }
 0x690   :  { %2855 = vmatpush1.msra.mxu0 %v2840_v62 }
 0x691   :  { %4682 = vmatmul.mubr.msk.f32.vlgmr.msra.gmra.mrb[6].mxu0 %vm1059_vm9, %v2843_v3 }
 0x692   :  { %2999 = vrot.lane.b32.xlu1 %v2840_v62, %s5482_s10  ;;  %2992 = vmatprep.mubr.f32.mxu0 %v5476_v0 }
 0x693   :  { %3001 = vrot.lane.b32.xlu0 %v2841_v63, %s5482_s10 }
 0x696   :  { %3084 = vperm.xlu1 %4838, %v3081_v4  }
 0x697   :  { %3093 = vperm.xlu0 %4837, %v3090_v5  }
 0x700   :  { %v2846_v7 = vpop.permute.xlu1 %2845 }
 0x701   :  { %v2848_v8 = vpop.permute.xlu0 %2847 }
 0x702   :  { %v2850_v9 = vsel %vm423_vm0, %v2848_v8, %v2846_v7  ;;  %v2849_v10 = vsel %vm423_vm0, %v2846_v7, %v2848_v8 }
 0x703   :  { %2928 = vmatprep.subr.mxu0 %v2849_v10 }
 0x704   :  { %v3000_v12 = vpop.permute.xlu1 %2999  ;;  %2929 = vmatpush1.msra.mxu0 %v2850_v9 }
 0x705   :  { %v3002_v13 = vpop.permute.xlu0 %3001  ;;  %4683 = vmatmul.mubr.msk.f32.vlgmr.msra.gmra.mrb[6].mxu0 %vm1059_vm9, %v2842_v11 }
 0x706   :  { %v3003_v14 = vsel %vm852_vm7, %v3000_v12, %v3002_v13  ;;  %v3004_v15 = vsel %vm852_vm7, %v3002_v13, %v3000_v12  ;;  %3072 = vmatprep.mubr.f32.mxu0 %v5476_v0 }
 0x707   :  { %3008 = vmatprep.subr.mxu0 %v3004_v15 }
 0x708   :  { %3009 = vmatpush1.msra.mxu0 %v3003_v14 }
 0x709   :  { %4685 = vmatprep.subr.msk.mxu0 %vm430_vm2, %v6066_v54 }
 0x70d   :  { %4684 = vmatmul.mubr.msk.f32.vlgmr.msra.gmra.mrb[6].mxu0 %vm1059_vm9, %v2844_v16 }
 0x70e   :  { %4686 = vmatpush1.msk.msra.mxu0 %vm430_vm2, %v6016_v29  ;;  %3163 = vmatprep.mubr.f32.mxu0 %v5476_v0  ;;  %v3177_v29 = vrot.slane %v396_v24, %v5994_v19  ;;  %vm399_vm2 = vcmp.eq.s32.totalorder %v5976_v6, 15 }
 0x70f   :  { %v400_v39 = vsel %vm399_vm2, 1.0, %v5476_v0 }
 0x710   :  { %v401_v47 = vadd.f32 %v400_v39, %v398_v38  ;;  %v3245_v39 = vld [vmem:[#allocation29 + $0x18] sm:$0xff] }
 0x712   :  { %v3231_v57 = vsub.f32 1.0, %v401_v47  ;;  %v3228_v5 = vrot.slane %v401_v47, %v5994_v19 }
 0x714   :  { %v3235_v7 = vrot.slane %v3231_v57, %v5994_v19  ;;  %v3813_v19 = vld [vmem:[#allocation31] sm:$0xff] }
 0x715   :  { %4687 = vmatmul.mubr.msk.f32.vlgmr.msra.gmra.mrb[6].mxu0 %vm426_vm3, %v3089_v17  ;;  %v3085_v22 = vpop.permute.xlu1 %3084 }
 0x716   :  { %3909 = vmatprep.mubr.f32.mxu0 %v5476_v0  ;;  %v3094_v54 = vpop.permute.xlu0 %3093 }
 0x717   :  { %v4712_v25 = vadd.f32 %v3094_v54, %v3085_v22 }
 0x7e8   :  { %v3165_v26 = vpop.f32.mrb[6].mxu0 }
 0x7e9   :  { %v4713_v27 = vadd.f32 %v4712_v25, %v3165_v26  ;;  %v3167_v28 = vpop.f32.mrb[7].mxu0 }
 0x7ea   :  { %v4715_v30 = vadd.f32 %v4712_v25, %v3167_v28 }
 0x7eb   :  { %v3172_v31 = vmax.f32 %v4713_v27, 0.0 }
 0x7ec   :  { %v3173_v32 = vmax.f32 %v4715_v30, 0.0 }
 0x7ed   :  { %v3178_v33 = vmul.f32 %v3177_v29, %v3172_v31 }
 0x7ee   :  { %v3179_v34 = vmul.f32 %v3177_v29, %v3173_v32  ;;  %v3243_v29 = vld [vmem:[#allocation29 + $0x8] sm:$0xff] }
 0x7ef   :  { %3180 = vrot.lane.b32.xlu1 %v3178_v33, %s5480_s7 }
 0x7f0   :  { %3182 = vrot.lane.b32.xlu0 %v3179_v34, %s5480_s7 }
 0x861   :  { %v3181_v35 = vpop.permute.xlu1 %3180 }
 0x862   :  { %v3183_v36 = vpop.permute.xlu0 %3182 }
 0x863   :  { %v3184_v21 = vsel %vm592_vm4, %v3181_v35, %v3183_v36  ;;  %v3185_v2 = vsel %vm592_vm4, %v3183_v36, %v3181_v35  ;;  %v3242_v36 = vld [vmem:[#allocation29] sm:$0xff] }
 0x864   :  { %v3186_v37 = vadd.f32 %v3185_v2, %v3178_v33  ;;  %v3187_v1 = vadd.f32 %v3184_v21, %v3179_v34  ;;  %v3244_v2 = vld [vmem:[#allocation29 + $0x10] sm:$0xff] }
 0x866   :  { %3188 = vrot.lane.b32.xlu1 %v3186_v37, %s5480_s7  ;;  %3190 = vrot.lane.b32.xlu0 %v3187_v1, %s5480_s7  ;;  %v3202_v48 = vmul.f32 0.75, %v3186_v37  ;;  %v3203_v50 = vmul.f32 0.75, %v3187_v1  ;;  %v3229_v14 = vmul.f32 %v3228_v5, %v3186_v37  ;;  %v3230_v15 = vmul.f32 %v3228_v5, %v3187_v1 }
 0x86a   :  { %3194 = vrot.lane.b32.xlu1 %v3186_v37, %s5481_s14  ;;  %3196 = vrot.lane.b32.xlu0 %v3187_v1, %s5481_s14 }
 0x8d8   :  { %v3189_v40 = vpop.permute.xlu1 %3188  ;;  %v3191_v41 = vpop.permute.xlu0 %3190 }
 0x8d9   :  { %v3192_v42 = vsel %vm592_vm4, %v3189_v40, %v3191_v41  ;;  %v3193_v43 = vsel %vm592_vm4, %v3191_v41, %v3189_v40 }
 0x8da   :  { %v3200_v45 = vmul.f32 0.25, %v3193_v43  ;;  %v3201_v46 = vmul.f32 0.25, %v3192_v42 }
 0x8dc   :  { %v3195_v51 = vpop.permute.xlu1 %3194  ;;  %v3197_v55 = vpop.permute.xlu0 %3196  ;;  %v3204_v60 = vadd.f32 %v3202_v48, %v3200_v45  ;;  %v3205_v61 = vadd.f32 %v3203_v50, %v3201_v46 }
 0x8dd   :  { %v3198_v58 = vsel %vm763_vm6, %v3195_v51, %v3197_v55  ;;  %v3199_v59 = vsel %vm763_vm6, %v3197_v55, %v3195_v51  ;;  %v3248_v51 = vld [vmem:[#allocation29 + $0x30] sm:$0xff] }
 0x8de   :  { %v3213_v62 = vmul.f32 0.25, %v3198_v58  ;;  %v3214_v63 = vmul.f32 0.25, %v3199_v59  ;;  %v3210_v8 = vmul.f32 %v3209_v49, %v3204_v60  ;;  %v3211_v9 = vmul.f32 %v3209_v49, %v3205_v61  ;;  %v3247_v49 = vld [vmem:[#allocation29 + $0x28] sm:$0xff] }
 0x8e0   :  { %v3215_v3 = vadd.f32 %v3213_v62, %v3202_v48  ;;  %v3216_v4 = vadd.f32 %v3214_v63, %v3203_v50 }
 0x8e2   :  { %v3221_v10 = vmul.f32 %v3220_v56, %v3215_v3  ;;  %v3222_v11 = vmul.f32 %v3220_v56, %v3216_v4  ;;  %v4230_v3 = vld [vmem:[#allocation34] sm:$0xff] }
 0x8e4   :  { %v3223_v12 = vadd.f32 %v3221_v10, %v3210_v8  ;;  %v3224_v13 = vadd.f32 %v3222_v11, %v3211_v9  ;;  %v3826_v9 = vld [vmem:[#allocation32 + $0x8] sm:$0xff] }
 0x8e6   :  { %v3236_v16 = vmul.f32 %v3235_v7, %v3223_v12  ;;  %v3237_v17 = vmul.f32 %v3235_v7, %v3224_v13 }
 0x8e8   :  { %v3238_v18 = vadd.f32 %v3236_v16, %v3229_v14  ;;  %v3239_v20 = vadd.f32 %v3237_v17, %v3230_v15  ;;  %v3825_v14 = vld [vmem:[#allocation32] sm:$0xff] }
 0x8ea   :  { %v6292_v22 = vmul.f32 %v3238_v18, %v6007_v23  ;;  %v6295_v54 = vmul.f32 %v3239_v20, %v6007_v23  ;;  %v3827_v18 = vld [vmem:[#allocation32 + $0x10] sm:$0xff] }
 0x8ec   :  { %3255 = vrot.lane.b32.xlu1 %v6292_v22, %s5477_s18  ;;  %3257 = vrot.lane.b32.xlu0 %v6295_v54, %s5477_s18 }
 0x8f0   :  { %3249 = vrot.lane.b32.xlu1 %v6292_v22, %s5478_s21  ;;  %3251 = vrot.lane.b32.xlu0 %v6295_v54, %s5478_s21 }
 0x8f4   :  { %3409 = vrot.lane.b32.xlu1 %v6292_v22, %s5480_s7  ;;  %3411 = vrot.lane.b32.xlu0 %v6295_v54, %s5480_s7 }
 0x8f8   :  { %3567 = vrot.lane.b32.xlu1 %v6292_v22, %s5481_s14  ;;  %3569 = vrot.lane.b32.xlu0 %v6295_v54, %s5481_s14 }
 0x8fc   :  { %3649 = vrot.lane.b32.xlu1 %v6292_v22, %s5482_s10  ;;  %3651 = vrot.lane.b32.xlu0 %v6295_v54, %s5482_s10 }
 0x900   :  { %3731 = vrot.lane.b32.xlu1 %v6292_v22, %s5483_s1  ;;  %3733 = vrot.lane.b32.xlu0 %v6295_v54, %s5483_s1 }
 0x904   :  { %3816 = vperm.xlu1 %4838, %v3813_v19  }
 0x95e   :  { %v3256_v24 = vpop.permute.xlu1 %3255  ;;  %v3258_v25 = vpop.permute.xlu0 %3257 }
 0x95f   :  { %v3260_v26 = vsel %vm423_vm0, %v3258_v25, %v3256_v24  ;;  %v3259_v27 = vsel %vm423_vm0, %v3256_v24, %v3258_v25 }
 0x960   :  { %3264 = vmatprep.subr.mxu1 %v3259_v27 }
 0x961   :  { %3265 = vmatpush1.msra.mxu1 %v3260_v26  ;;  %v3828_v26 = vld [vmem:[#allocation32 + $0x18] sm:$0xff] }
 0x962   :  { %v3250_v28 = vpop.permute.xlu1 %3249  ;;  %4688 = vmatmul.mubr.msk.f32.vlgmr.msra.gmra.mrb[6].mxu1 %vm1059_vm9, %v3243_v29  ;;  %v3252_v30 = vpop.permute.xlu0 %3251  ;;  %v3829_v29 = vld [vmem:[#allocation32 + $0x20] sm:$0xff] }
 0x963   :  { %v3254_v31 = vsel %vm416_vm1, %v3252_v30, %v3250_v28  ;;  %v3253_v32 = vsel %vm416_vm1, %v3250_v28, %v3252_v30  ;;  %3402 = vmatprep.mubr.f32.mxu1 %v5476_v0 }
 0x964   :  { %3338 = vmatprep.subr.mxu1 %v3253_v32 }
 0x965   :  { %3339 = vmatpush1.msra.mxu1 %v3254_v31 }
 0x966   :  { %v3410_v33 = vpop.permute.xlu1 %3409  ;;  %v3412_v34 = vpop.permute.xlu0 %3411 }
 0x967   :  { %v3413_v35 = vsel %vm592_vm4, %v3410_v33, %v3412_v34  ;;  %v3414_v21 = vsel %vm592_vm4, %v3412_v34, %v3410_v33 }
 0x968   :  { %3418 = vmatprep.subr.mxu1 %v3413_v35 }
 0x96a   :  { %4689 = vmatmul.mubr.msk.f32.vlgmr.msra.gmra.mrb[6].mxu1 %vm1059_vm9, %v3242_v36  ;;  %v3568_v37 = vpop.permute.xlu1 %3567  ;;  %v3570_v1 = vpop.permute.xlu0 %3569 }
 0x96b   :  { %3419 = vmatpush1.msra.mxu1 %v3414_v21  ;;  %3482 = vmatprep.mubr.f32.mxu1 %v5476_v0  ;;  %v3572_v38 = vsel %vm763_vm6, %v3570_v1, %v3568_v37  ;;  %v3571_v42 = vsel %vm763_vm6, %v3568_v37, %v3570_v1  ;;  %v4481_v37 = vld [vmem:[#allocation37] sm:$0xff]  ;;  %v4490_v1 = vld [vmem:[#allocation40] sm:$0xff] }
 0x96c   :  { %3494 = vmatprep.subr.mxu1 %v6295_v54 }
 0x96e   :  { %v3650_v40 = vpop.permute.xlu1 %3649  ;;  %v3652_v41 = vpop.permute.xlu0 %3651 }
 0x96f   :  { %v3654_v43 = vsel %vm852_vm7, %v3652_v41, %v3650_v40  ;;  %v3653_v47 = vsel %vm852_vm7, %v3650_v40, %v3652_v41 }
 0x972   :  { %4690 = vmatmul.mubr.msk.f32.vlgmr.msra.gmra.mrb[6].mxu1 %vm1059_vm9, %v3244_v2  ;;  %v3732_v45 = vpop.permute.xlu1 %3731  ;;  %v3734_v46 = vpop.permute.xlu0 %3733  ;;  %v4243_v2 = vld [vmem:[#allocation35 + $0x8] sm:$0xff] }
 0x973   :  { %3495 = vmatpush1.msra.mxu1 %v6292_v22  ;;  %3558 = vmatprep.mubr.f32.mxu1 %v5476_v0  ;;  %v3736_v48 = vsel %vm941_vm8, %v3734_v46, %v3732_v45  ;;  %v3735_v50 = vsel %vm941_vm8, %v3732_v45, %v3734_v46 }
 0x974   :  { %3576 = vmatprep.subr.mxu1 %v3572_v38  ;;  %v1708_v38 = vld [vmem:[#allocation16] sm:$0xff] }
 0x97a   :  { %4691 = vmatmul.mubr.msk.f32.vlgmr.msra.gmra.mrb[6].mxu1 %vm1059_vm9, %v3245_v39 }
 0x97b   :  { %3577 = vmatpush1.msra.mxu1 %v3571_v42  ;;  %3640 = vmatprep.mubr.f32.mxu1 %v5476_v0 }
 0x97c   :  { %3658 = vmatprep.subr.mxu1 %v3654_v43  ;;  %v4242_v43 = vld [vmem:[#allocation35] sm:$0xff] }
 0x982   :  { %4692 = vmatmul.mubr.msk.f32.vlgmr.msra.gmra.mrb[6].mxu1 %vm1059_vm9, %v3246_v44 }
 0x983   :  { %3659 = vmatpush1.msra.mxu1 %v3653_v47  ;;  %3722 = vmatprep.mubr.f32.mxu1 %v5476_v0  ;;  %v3817_v55 = vpop.permute.xlu1 %3816 }
 0x984   :  { %3740 = vmatprep.subr.mxu1 %v3736_v48  ;;  %v4244_v48 = vld [vmem:[#allocation35 + $0x10] sm:$0xff] }
 0x98a   :  { %4693 = vmatmul.mubr.msk.f32.vlgmr.msra.gmra.mrb[6].mxu1 %vm1059_vm9, %v3247_v49  ;;  %v4489_v49 = vld [vmem:[#allocation38] sm:$0xff] }
 0x98b   :  { %3741 = vmatpush1.msra.mxu1 %v3735_v50  ;;  %3804 = vmatprep.mubr.f32.mxu1 %v5476_v0 }
 0x992   :  { %4694 = vmatmul.mubr.msk.f32.vlgmr.msra.gmra.mrb[6].mxu1 %vm1059_vm9, %v3248_v51 }
 0x993   :  { %4318 = vmatprep.mubr.f32.mxu1 %v5476_v0 }
 0xa65   :  { %v3806_v56 = vpop.f32.mrb[6].mxu1 }
 0xa66   :  { %v3819_v57 = vadd.f32 %v3817_v55, %v3806_v56  ;;  %v3808_v58 = vpop.f32.mrb[7].mxu1 }
 0xa67   :  { %v3820_v59 = vadd.f32 %v3817_v55, %v3808_v58 }
 0xa68   :  { %v3821_v60 = vmax.f32 %v3819_v57, 0.0 }
 0xa69   :  { %v3822_v61 = vmax.f32 %v3820_v59, 0.0 }
 0xa6a   :  { %v3823_v62 = vmul.f32 %v3821_v60, %v6007_v23 }
 0xa6b   :  { %v3824_v63 = vmul.f32 %v3822_v61, %v6007_v23 }
 0xa6c   :  { %3836 = vrot.lane.b32.xlu0 %v3823_v62, %s5480_s7 }
 0xa6d   :  { %3838 = vrot.lane.b32.xlu1 %v3824_v63, %s5480_s7 }
 0xa70   :  { %3830 = vrot.lane.b32.xlu0 %v3823_v62, %s5477_s18 }
 0xa71   :  { %3832 = vrot.lane.b32.xlu1 %v3824_v63, %s5477_s18 }
 0xa74   :  { %4066 = vrot.lane.b32.xlu0 %v3823_v62, %s5481_s14 }
 0xa75   :  { %4068 = vrot.lane.b32.xlu1 %v3824_v63, %s5481_s14 }
 0xa78   :  { %4148 = vrot.lane.b32.xlu0 %v3823_v62, %s5482_s10 }
 0xa79   :  { %4150 = vrot.lane.b32.xlu1 %v3824_v63, %s5482_s10 }
 0xa7c   :  { %4233 = vperm.xlu0 %4837, %v4230_v3  }
 0xade   :  { %v3837_v4 = vpop.permute.xlu0 %3836 }
 0xadf   :  { %v3839_v5 = vpop.permute.xlu1 %3838 }
 0xae0   :  { %v3841_v7 = vsel %vm592_vm4, %v3839_v5, %v3837_v4  ;;  %v3840_v8 = vsel %vm592_vm4, %v3837_v4, %v3839_v5 }
 0xae1   :  { %3845 = vmatprep.subr.mxu0 %v3840_v8 }
 0xae2   :  { %v3831_v10 = vpop.permute.xlu0 %3830  ;;  %3846 = vmatpush1.msra.mxu0 %v3841_v7 }
 0xae3   :  { %4695 = vmatmul.mubr.msk.f32.vlgmr.msra.gmra.mrb[8].mxu0 %vm1059_vm9, %v3826_v9  ;;  %v3833_v11 = vpop.permute.xlu1 %3832 }
 0xae4   :  { %v3835_v12 = vsel %vm423_vm0, %v3833_v11, %v3831_v10  ;;  %v3834_v13 = vsel %vm423_vm0, %v3831_v10, %v3833_v11  ;;  %3983 = vmatprep.mubr.f32.mxu0 %v5476_v0 }
 0xae5   :  { %3919 = vmatprep.subr.mxu0 %v3834_v13 }
 0xae6   :  { %3920 = vmatpush1.msra.mxu0 %v3835_v12  ;;  %v4067_v15 = vpop.permute.xlu0 %4066 }
 0xae7   :  { %3993 = vmatprep.subr.mxu0 %v3824_v63  ;;  %v4069_v16 = vpop.permute.xlu1 %4068 }
 0xae8   :  { %v4071_v17 = vsel %vm763_vm6, %v4069_v16, %v4067_v15  ;;  %v4070_v24 = vsel %vm763_vm6, %v4067_v15, %v4069_v16 }
 0xaea   :  { %v4149_v20 = vpop.permute.xlu0 %4148 }
 0xaeb   :  { %4696 = vmatmul.mubr.msk.f32.vlgmr.msra.gmra.mrb[8].mxu0 %vm1059_vm9, %v3825_v14  ;;  %v4151_v19 = vpop.permute.xlu1 %4150 }
 0xaec   :  { %3994 = vmatpush1.msra.mxu0 %v3823_v62  ;;  %4057 = vmatprep.mubr.f32.mxu0 %v5476_v0  ;;  %v4153_v25 = vsel %vm852_vm7, %v4151_v19, %v4149_v20  ;;  %v4152_v27 = vsel %vm852_vm7, %v4149_v20, %v4151_v19 }
 0xaed   :  { %4075 = vmatprep.subr.mxu0 %v4071_v17 }
 0xaf3   :  { %4697 = vmatmul.mubr.msk.f32.vlgmr.msra.gmra.mrb[8].mxu0 %vm1059_vm9, %v3827_v18 }
 0xaf4   :  { %4076 = vmatpush1.msra.mxu0 %v4070_v24  ;;  %4139 = vmatprep.mubr.f32.mxu0 %v5476_v0 }
 0xaf5   :  { %4157 = vmatprep.subr.mxu0 %v4153_v25 }
 0xafb   :  { %4698 = vmatmul.mubr.msk.f32.vlgmr.msra.gmra.mrb[8].mxu0 %vm1059_vm9, %v3828_v26  ;;  %v4234_v28 = vpop.permute.xlu0 %4233 }
 0xafc   :  { %4158 = vmatpush1.msra.mxu0 %v4152_v27  ;;  %4221 = vmatprep.mubr.f32.mxu0 %v5476_v0 }
 0xb03   :  { %4699 = vmatmul.mubr.msk.f32.vlgmr.msra.gmra.mrb[8].mxu0 %vm1059_vm9, %v3829_v29 }
 0xbd6   :  { %v4223_v30 = vpop.f32.mrb[8].mxu0 }
 0xbd7   :  { %v4236_v31 = vadd.f32 %v4234_v28, %v4223_v30  ;;  %v4225_v32 = vpop.f32.mrb[9].mxu0 }
 0xbd8   :  { %v4237_v33 = vadd.f32 %v4234_v28, %v4225_v32 }
 0xbd9   :  { %v4238_v34 = vmax.f32 %v4236_v31, 0.0 }
 0xbda   :  { %v4239_v35 = vmax.f32 %v4237_v33, 0.0 }
 0xbdb   :  { %v4240_v36 = vmul.f32 %v4238_v34, %v6007_v23 }
 0xbdc   :  { %v4241_v21 = vmul.f32 %v4239_v35, %v6007_v23  ;;  %v1699_v23 = vld [vmem:[#allocation13] sm:$0xff] }
 0xbdd   :  { %4245 = vrot.lane.b32.xlu1 %v4240_v36, %s5480_s7 }
 0xbde   :  { %4247 = vrot.lane.b32.xlu0 %v4241_v21, %s5480_s7  ;;  %4254 = vmatprep.subr.mxu1 %v4241_v21 }
 0xbdf   :  { %4255 = vmatpush1.msra.mxu1 %v4240_v36 }
 0xbe0   :  { %4700 = vmatmul.mubr.msk.f32.vlgmr.msra.gmra.mrb[8].mxu1 %vm1059_vm9, %v4243_v2 }
 0xbe1   :  { %4399 = vrot.lane.b32.xlu1 %v4240_v36, %s5481_s14  ;;  %4392 = vmatprep.mubr.f32.mxu1 %v5476_v0 }
 0xbe2   :  { %4401 = vrot.lane.b32.xlu0 %v4241_v21, %s5481_s14 }
 0xbe5   :  { %4484 = vperm.xlu1 %4838, %v4481_v37  }
 0xbe6   :  { %4493 = vperm.xlu0 %4837, %v4490_v1  }
 0xbe9   :  { %1702 = vperm.xlu1 %4838, %v1699_v23  }
 0xbea   :  { %1711 = vperm.xlu0 %4837, %v1708_v38  }
 0xc4f   :  { %v4246_v39 = vpop.permute.xlu1 %4245 }
 0xc50   :  { %v4248_v40 = vpop.permute.xlu0 %4247 }
 0xc51   :  { %v4250_v41 = vsel %vm592_vm4, %v4248_v40, %v4246_v39  ;;  %v4249_v42 = vsel %vm592_vm4, %v4246_v39, %v4248_v40 }
 0xc52   :  { %4328 = vmatprep.subr.mxu1 %v4249_v42 }
 0xc53   :  { %v4400_v44 = vpop.permute.xlu1 %4399  ;;  %4329 = vmatpush1.msra.mxu1 %v4250_v41 }
 0xc54   :  { %v4402_v45 = vpop.permute.xlu0 %4401  ;;  %4701 = vmatmul.mubr.msk.f32.vlgmr.msra.gmra.mrb[8].mxu1 %vm1059_vm9, %v4242_v43 }
 0xc55   :  { %v4403_v46 = vsel %vm763_vm6, %v4400_v44, %v4402_v45  ;;  %v4404_v47 = vsel %vm763_vm6, %v4402_v45, %v4400_v44  ;;  %4472 = vmatprep.mubr.f32.mxu1 %v5476_v0 }
 0xc56   :  { %4408 = vmatprep.subr.mxu1 %v4404_v47 }
 0xc57   :  { %4409 = vmatpush1.msra.mxu1 %v4403_v46 }
 0xc58   :  { %4499 = vmatprep.subr.mxu1 %v6295_v54 }
 0xc5c   :  { %4702 = vmatmul.mubr.msk.f32.vlgmr.msra.gmra.mrb[8].mxu1 %vm1059_vm9, %v4244_v48 }
 0xc5d   :  { %4500 = vmatpush1.msra.mxu1 %v6292_v22  ;;  %4563 = vmatprep.mubr.f32.mxu1 %v5476_v0 }
 0xc64   :  { %4703 = vmatmul.mubr.msk.f32.vlgmr.msra.gmra.mrb[8].mxu1 %vm1059_vm9, %v4489_v49  ;;  %v4485_v50 = vpop.permute.xlu1 %4484 }
 0xc65   :  { %v4494_v51 = vpop.permute.xlu0 %4493 }
 0xc66   :  { %v4716_v6 = vadd.f32 %v4494_v51, %v4485_v50 }
 0xc68   :  { %v1703_v63 = vpop.permute.xlu1 %1702 }
 0xc69   :  { %v1712_v0 = vpop.permute.xlu0 %1711 }
 0xc6a   :  { %v4708_v5 = vadd.f32 %v1712_v0, %v1703_v63 }
 0xc6c   :  { %v4709_v7 = vadd.f32 %v4708_v5, %v6231_v52  ;;  %v4711_v8 = vadd.f32 %v4708_v5, %v6233_v53 }
 0xc6e   :  { %v1790_v9 = vmax.f32 %v4709_v7, 0.0  ;;  %v1791_v11 = vmax.f32 %v4711_v8, 0.0 }
 0xd37   :  { %v4565_v55 = vpop.f32.mrb[8].mxu1 }
 0xd38   :  { %v4717_v56 = vadd.f32 %v4716_v6, %v4565_v55  ;;  %v4567_v57 = vpop.f32.mrb[9].mxu1 }
 0xd39   :  { %v4719_v58 = vadd.f32 %v4716_v6, %v4567_v57 }
 0xd3a   :  { %v4572_v59 = vmax.f32 %v4717_v56, 0.0 }
 0xd3b   :  { %v4573_v60 = vmax.f32 %v4719_v58, 0.0 }
 0xd3c   :  { %v4704_v54 = vmul.f32 -1.442695, %v4572_v59 }
 0xd3d   :  { %v4705_v61 = vmul.f32 -1.442695, %v4573_v60 }
 0xd3e   :  { %4839 = vpow2.f32 %v4704_v54 }
 0xd3f   :  { %4841 = vpow2.f32 %v4705_v61 }
 0xd48   :  { %v4840_v62 = vpop.eup %4839 }
 0xd49   :  { %v4842_v22 = vpop.eup %4841  ;;  %v4580_v3 = vadd.f32 1.0, %v4840_v62 }
 0xd4a   :  { %v4581_v4 = vadd.f32 1.0, %v4842_v22 }
 0xd4b   :  { %4843 = vrcp.f32 %v4580_v3 }
 0xd4c   :  { %4845 = vrcp.f32 %v4581_v4 }
 0xd55   :  { %v4844_v10 = vpop.eup %4843 }
 0xd56   :  { %v4846_v12 = vpop.eup %4845  ;;  %v4586_v13 = vmul.f32 %v4844_v10, %v1790_v9 }
 0xd57   :  { %v4587_v14 = vmul.f32 %v4846_v12, %v1791_v11 }
 0xd58   :  { %v4588_v15 = vadd.f32 %v4586_v13, %v1790_v9 }
 0xd59   :  { %v4589_v16 = vadd.f32 %v4587_v14, %v1791_v11 }
 0xd5a   :  { %v4590_v17 = vmax.f32 %v4588_v15, 0.0 }
 0xd5b   :  { %v4591_v18 = vmax.f32 %v4589_v16, 0.0 }
 0xd5c   :  { %4592 = vst [vmem:[#allocation41] sm:$0xff] %v4590_v17 }
 0xd5d   :  { %4594 = vst [vmem:[#allocation41 + $0x8] sm:$0xff] %v4591_v18 }
 0xd5e   :  { %5408 = shalt.err (!%p5405_p8)
}
 0xd5f   :  { %s6500_s26 = sld [smem:[#allocation68_spill]] }
 0xd65   :  { %s5409_s20 = scalar_lea.hbm %s6500_s26, 256 }
 0xd66   :  { %p5410_p9 = scmp.ne.s32.totalorder %s6500_s26, %s5409_s20  ;;  %p5413_p10 = scmp.lt.u32.totalorder %s5409_s20, %s6500_s26 }
 0xd68   :  { %p5415_p11 = pnand %p5413_p10, %p5410_p9 }
 0xd6a   :  { %5418 = shalt.err (!%p5415_p11)
}
 0xd6b   :  { %4606 = dma.vmem_to_hbm [thread:$0]  %s4601_s5, 256, %s6500_s26, [#allocation4], %s5448_s28, %s5448_s28, %s5449_s9  }
 0xd6c   :  { %5445 = dma.done.wait [#allocation4], 256  }
 0xd6d   :  { %5446 = vsyncadd [#allocation4], 4294967040 }
 0xd6e   :  { %4610 = vsyncpa [#allocation3], 1 }
 0xd6f   :  { %4611 = vsyncpa [#allocation6], 1 }
 0xd70   :  { %4612 = vsyncpa [#allocation9], 1 }
 0xd71   :  { %4613 = vsyncpa [#allocation12], 1 }
 0xd72   :  { %4614 = vsyncpa [#allocation15], 1 }
 0xd73   :  { %4615 = vsyncpa [#allocation18], 1 }
 0xd74   :  { %4616 = vsyncpa [#allocation21], 1 }
 0xd75   :  { %4617 = vsyncpa [#allocation24], 1 }
 0xd76   :  { %4618 = vsyncpa [#allocation27], 1 }
 0xd77   :  { %4619 = vsyncpa [#allocation30], 1 }
 0xd78   :  { %4620 = vsyncpa [#allocation33], 1 }
 0xd79   :  { %4621 = vsyncpa [#allocation36], 1 }
 0xd7a   :  { %4622 = vsyncpa [#allocation39], 1 }
 0xd7b   :  { %4623 = vsyncpa [#allocation4], 1 }

</bundles_post_ra>
